<compile_context>
chip_gen: v7x
topology: tpu7x:2x2x1
jax: 0.10.0
libtpu: 0.0.40
codegen_flags: <defaults>
</compile_context>

<pallas_src>
import numpy as np

import jax
import jax.numpy as jnp
from jax import lax
from jax.experimental import pallas as pl
from jax.experimental.pallas import tpu as pltpu

EPS = 1e-5  # PyTorch BatchNorm2d default eps


# ---------------------------------------------------------------------------
# Per-layer fused block: 1x1 Conv (pad=1) -> BN(train) -> ReLU -> MaxPool2d(2)
# ---------------------------------------------------------------------------
def _conv_bn_relu_pool(a, w_ref, g_ref, be_ref, tap_copy, tap_ref, mn):
    """One conv_block on a lane-dense per-sample activation.

    a        : (N, Cin, Mp)  f32, Mp = Hp*Wp (zero border already in place)
    w_ref    : (Cout, Cin)   1x1 conv weight (bias dropped: cancels under BN)
    g_ref    : (1, Cout, 1)  BN gamma
    be_ref   : (1, Cout, 1)  BN beta
    tap_copy : in-flight DMA of tap_ref (waited on right before the tap dot)
    tap_ref  : (Mp, 4*128)   bf16 0/1 pool-tap gather + next-layer pad scatter
    mn       : live (un-padded) per-sample width handed to the next layer
    returns  : (N, Cout, mn)
    """
    n, cin, mp = a.shape
    cout = w_ref.shape[0]

    # 1x1 conv == per-pixel channel matmul, batched over samples on the MXU.
    wb = jnp.broadcast_to(w_ref[...], (n, cout, cin))
    y = jnp.einsum("noc,ncm->nom", wb, a,
                   preferred_element_type=jnp.float32)          # (N, Cout, Mp)

    # BatchNorm2d, training mode: biased batch stats over all N*Hp*Wp pixels
    # (padded border included, exactly as PyTorch sees them).  Single-pass
    # fused stats: sum(y) and sum(y*y); the mean is folded into the shift so
    # no separate (y - mean) sweep is needed.
    inv_m = 1.0 / float(n * mp)
    s1 = jnp.sum(jnp.sum(y, axis=2, keepdims=True), axis=0, keepdims=True)
    s2 = jnp.sum(jnp.sum(y * y, axis=2, keepdims=True), axis=0, keepdims=True)
    mean = s1 * inv_m                                            # (1, Cout, 1)
    var = s2 * inv_m - mean * mean                               # biased var
    scale = g_ref[...] * lax.rsqrt(var + EPS)
    shift = be_ref[...] - mean * scale
    z = jnp.maximum(y * scale + shift, 0.0)                      # BN + ReLU

    # MaxPool2d(2) fused with the next layer's zero padding: one exact 0/1
    # gather/scatter matmul (4 taps concatenated on 128-lane aligned chunks),
    # then an elementwise max of the lane-aligned chunks.
    tap_copy.wait()                                              # prefetch done?
    t = tap_ref[...].astype(jnp.float32)                         # bf16 -> f32 (exact)
    p = t.shape[1] // 4
    tb = jnp.broadcast_to(t, (n,) + t.shape)
    pall = jnp.einsum("ncm,nmq->ncq", z, tb,
                      preferred_element_type=jnp.float32)        # (N, Cout, 4*p)
    pooled = jnp.maximum(
        jnp.maximum(pall[:, :, 0:p], pall[:, :, p:2 * p]),
        jnp.maximum(pall[:, :, 2 * p:3 * p], pall[:, :, 3 * p:4 * p]))
    # Drop the dead padded columns BEFORE the next BatchNorm: they must never
    # enter the next layer's batch statistics or pooling windows.
    return pooled[:, :, :mn]


def _omninet_kernel(x_ref,
                    w1, g1, be1, w2, g2, be2, w3, g3, be3, w4, g4, be4,
                    t1_hbm, t2_hbm, t3_hbm, t4_hbm,
                    o_ref,
                    t1_v, t2_v, t3_v, t4_v, dma_sem):
    # Issue all tap prefetches up front; the DMA engine drains them in issue
    # order, so tap l's copy overlaps the conv/BN/ReLU compute of layers <= l.
    # The auto-DMA'd VMEM inputs (x + weights + BN params) are only ~15 KB, so
    # compute starts almost immediately instead of waiting on ~3 MiB as before.
    hbm = (t1_hbm, t2_hbm, t3_hbm, t4_hbm)
    vmem = (t1_v, t2_v, t3_v, t4_v)
    copies = []
    for i in range(4):
        cp = pltpu.make_async_copy(hbm[i], vmem[i], dma_sem.at[i])
        cp.start()
        copies.append(cp)

    layer_params = ((w1, g1, be1), (w2, g2, be2), (w3, g3, be3), (w4, g4, be4))
    # Live per-sample width each layer hands to the next (derived from shapes).
    mns = (t2_v.shape[0], t3_v.shape[0], t4_v.shape[0], o_ref.shape[-1])

    a = x_ref[...]                                               # (N, Cin, 18*18)
    for l in range(4):
        w_ref, g_ref, be_ref = layer_params[l]
        a = _conv_bn_relu_pool(a, w_ref, g_ref, be_ref,
                               copies[l], vmem[l], mns[l])
    o_ref[...] = a                                               # (N, z_dim, 2*2)


# ---------------------------------------------------------------------------
# Static plan: per-sample 0/1 pool-tap / pad-scatter matrices (bf16, built once)
# ---------------------------------------------------------------------------
def _round_up(v, m):
    return (v + m - 1) // m * m


def _tap_matrix(hp, wp, pad_next):
    """(hp*wp, 4*P) bf16 matrix; tap k of MaxPool2d(2) gathered from the padded
    (hp, wp) grid and scattered into the next layer's zero-padded grid (or the
    final un-padded pooled layout).  Each tap's chunk is padded to P=128 lanes;
    the padded columns are all-zero and are sliced off after the max."""
    ho, wo = hp // 2, wp // 2
    if pad_next:
        hn, wn = ho + 2, wo + 2

        def dst(i, j):
            return (i + 1) * wn + (j + 1)
    else:
        hn, wn = ho, wo

        def dst(i, j):
            return i * wn + j

    mn = hn * wn
    p = _round_up(mn, 128)
    t = np.zeros((hp * wp, 4 * p), np.float32)
    for k, (di, dj) in enumerate(((0, 0), (0, 1), (1, 0), (1, 1))):
        for i in range(ho):
            for j in range(wo):
                src = (2 * i + di) * wp + (2 * j + dj)
                t[src, k * p + dst(i, j)] = 1.0
    return jnp.asarray(t, jnp.bfloat16)        # 0/1 exact in bf16


def build_pool_taps(H, W, num_blocks=4):
    """Per-block per-sample tap matrices for the chain H -> H+2 -> (H+2)//2 ..."""
    taps = []
    h, w = H, W
    for l in range(num_blocks):
        hp, wp = h + 2, w + 2
        taps.append(_tap_matrix(hp, wp, pad_next=(l < num_blocks - 1)))
        h, w = hp // 2, wp // 2
    return taps


# ---------------------------------------------------------------------------
# Parameters (synthetic, matching the PyTorch module's init)
# ---------------------------------------------------------------------------
def init_params(key, x_dim, hid_dim, z_dim):
    dims = [
        (x_dim, hid_dim),
        (hid_dim, 2 * hid_dim),
        (2 * hid_dim, 2 * hid_dim),
        (2 * hid_dim, z_dim),
    ]
    params = []
    for i, (cin, cout) in enumerate(dims):
        kw, kb, kg = jax.random.split(jax.random.fold_in(key, i), 3)
        bound = 1.0 / (cin ** 0.5)                     # Conv2d default init (1x1)
        w = jax.random.uniform(kw, (cout, cin), jnp.float32, -bound, bound)
        # Conv bias: kept for module fidelity, but NOT used by the kernel — it
        # cancels exactly under training-mode BatchNorm (mean subtraction).
        b = jax.random.uniform(kb, (cout,), jnp.float32, -bound, bound)
        gamma = jax.random.uniform(kg, (cout,), jnp.float32, 0.0, 1.0)  # nn.init.uniform_
        beta = jnp.zeros((cout,), jnp.float32)                          # BN default bias
        params.append((w, b, gamma, beta))
    return params


# ---------------------------------------------------------------------------
# Forward
# ---------------------------------------------------------------------------
@jax.jit
def omninet_forward(x_nchw, params, pool_taps):
    N, cin, H, W = x_nchw.shape
    x = x_nchw.astype(jnp.float32)

    # Tiny wrapper glue: zero-pad the raw input (layer-1 conv padding) and
    # flatten the per-sample spatial axis onto the lanes: (N, Cin, 18*18).
    xp = jnp.pad(x, ((0, 0), (0, 0), (1, 1), (1, 1)))
    a0 = xp.reshape(N, cin, (H + 2) * (W + 2))

    vmem_spec = pl.BlockSpec(memory_space=pltpu.MemorySpace.VMEM)
    args = [a0]
    in_specs = [vmem_spec]
    for (w, _b, gamma, beta) in params:
        cout = w.shape[0]
        args += [w, gamma.reshape(1, cout, 1), beta.reshape(1, cout, 1)]
        in_specs += [vmem_spec] * 3
    for t in pool_taps:
        args.append(t)
        in_specs.append(pl.BlockSpec(memory_space=pl.ANY))   # prefetched manually

    # Final per-sample pooled spatial size (2*2 for H=W=16).
    h, w = H, W
    for _ in range(len(pool_taps)):
        h, w = (h + 2) // 2, (w + 2) // 2
    m_out = h * w
    z_dim = params[-1][0].shape[0]

    out = pl.pallas_call(
        _omninet_kernel,
        out_shape=jax.ShapeDtypeStruct((N, z_dim, m_out), jnp.float32),
        in_specs=in_specs,
        out_specs=pl.BlockSpec(memory_space=pltpu.MemorySpace.VMEM),
        scratch_shapes=[pltpu.VMEM(tuple(t.shape), jnp.bfloat16) for t in pool_taps]
                       + [pltpu.SemaphoreType.DMA((len(pool_taps),))],
    )(*args)

    # (N, C, Ho*Wo) -> PyTorch x.view(N, -1) order (NCHW flatten).
    return out.reshape(N, -1)


# ---------------------------------------------------------------------------
# Pure-JAX reference (mirrors the PyTorch module, incl. the conv bias)
# ---------------------------------------------------------------------------
def omninet_reference(x_nchw, params):
    x = x_nchw.astype(jnp.float32)
    for (w, b, gamma, beta) in params:
        xp = jnp.pad(x, ((0, 0), (0, 0), (1, 1), (1, 1)))
        y = jnp.einsum("oc,nchw->nohw", w, xp,
                       precision=jax.lax.Precision.HIGHEST) + b[None, :, None, None]
        mean = jnp.mean(y, axis=(0, 2, 3), keepdims=True)
        var = jnp.mean((y - mean) ** 2, axis=(0, 2, 3), keepdims=True)  # biased
        y = (y - mean) * lax.rsqrt(var + EPS) * gamma[None, :, None, None] \
            + beta[None, :, None, None]
        y = jnp.maximum(y, 0.0)
        n, c, hp, wp = y.shape
        ho, wo = hp // 2, wp // 2
        x = y[:, :, :2 * ho, :2 * wo].reshape(n, c, ho, 2, wo, 2).max(axis=(3, 5))
    return x.reshape(x.shape[0], -1)


if __name__ == "__main__":
    key = jax.random.PRNGKey(0)
    kx, kp = jax.random.split(key)

    # Small shapes consistent with the module: Omninet(x_dim=4, hid_dim=16, z_dim=16)
    N, x_dim, H, W = 2, 4, 16, 16
    hid_dim, z_dim = 16, 16

    x = jax.random.normal(kx, (N, x_dim, H, W), jnp.float32)
    params = init_params(kp, x_dim, hid_dim, z_dim)
    pool_taps = build_pool_taps(H, W)

    out = omninet_forward(x, params, pool_taps)
    out = jax.block_until_ready(out)

    # spatial chain: 16 -> 18 -> 9 -> 11 -> 5 -> 7 -> 3 -> 5 -> 2  => (N, z_dim*2*2)
    assert out.shape == (N, z_dim * 2 * 2), out.shape
    assert bool(jnp.all(jnp.isfinite(out)))

    ref = omninet_reference(x, params)
    assert bool(jnp.allclose(out, ref, rtol=2e-2, atol=2e-2)), \
        float(jnp.max(jnp.abs(out - ref)))

    print("KERNEL_OK")
</pallas_src>

<mosaic_0001>
module attributes {stable_mosaic.version = 11 : i64} {
  func.func @_omninet_kernel(%arg0: memref<2x4x324xf32, #tpu.memory_space<vmem>>, %arg1: memref<16x4xf32, #tpu.memory_space<vmem>>, %arg2: memref<1x16x1xf32, #tpu.memory_space<vmem>>, %arg3: memref<1x16x1xf32, #tpu.memory_space<vmem>>, %arg4: memref<32x16xf32, #tpu.memory_space<vmem>>, %arg5: memref<1x32x1xf32, #tpu.memory_space<vmem>>, %arg6: memref<1x32x1xf32, #tpu.memory_space<vmem>>, %arg7: memref<32x32xf32, #tpu.memory_space<vmem>>, %arg8: memref<1x32x1xf32, #tpu.memory_space<vmem>>, %arg9: memref<1x32x1xf32, #tpu.memory_space<vmem>>, %arg10: memref<16x32xf32, #tpu.memory_space<vmem>>, %arg11: memref<1x16x1xf32, #tpu.memory_space<vmem>>, %arg12: memref<1x16x1xf32, #tpu.memory_space<vmem>>, %arg13: memref<324x512xbf16, #tpu.memory_space<any>>, %arg14: memref<121x512xbf16, #tpu.memory_space<any>>, %arg15: memref<49x512xbf16, #tpu.memory_space<any>>, %arg16: memref<25x512xbf16, #tpu.memory_space<any>>, %arg17: memref<2x16x4xf32, #tpu.memory_space<vmem>>, %arg18: memref<324x512xbf16, #tpu.memory_space<vmem>>, %arg19: memref<121x512xbf16, #tpu.memory_space<vmem>>, %arg20: memref<49x512xbf16, #tpu.memory_space<vmem>>, %arg21: memref<25x512xbf16, #tpu.memory_space<vmem>>, %arg22: memref<4x!tpu.dma_semaphore, #tpu.memory_space<semaphore_mem>>) attributes {dimension_semantics = [], scalar_prefetch = 0 : i64, scratch_operands = 5 : i64, tpu.core_type = #tpu.core_type<tc>} {
    %c0_i32 = arith.constant 0 : i32
    %0 = tpu.memref_slice %arg22[%c0_i32] : memref<4x!tpu.dma_semaphore, #tpu.memory_space<semaphore_mem>> -> memref<1x!tpu.dma_semaphore, #tpu.memory_space<semaphore_mem>>
    %1 = tpu.memref_squeeze %0 : memref<1x!tpu.dma_semaphore, #tpu.memory_space<semaphore_mem>> -> memref<!tpu.dma_semaphore, #tpu.memory_space<semaphore_mem>>
    tpu.enqueue_dma source(%arg13 : memref<324x512xbf16, #tpu.memory_space<any>>) target(%arg18 : memref<324x512xbf16, #tpu.memory_space<vmem>>) target_semaphore(%1 : memref<!tpu.dma_semaphore, #tpu.memory_space<semaphore_mem>>)
    %c1_i32 = arith.constant 1 : i32
    %2 = tpu.memref_slice %arg22[%c1_i32] : memref<4x!tpu.dma_semaphore, #tpu.memory_space<semaphore_mem>> -> memref<1x!tpu.dma_semaphore, #tpu.memory_space<semaphore_mem>>
    %3 = tpu.memref_squeeze %2 : memref<1x!tpu.dma_semaphore, #tpu.memory_space<semaphore_mem>> -> memref<!tpu.dma_semaphore, #tpu.memory_space<semaphore_mem>>
    tpu.enqueue_dma source(%arg14 : memref<121x512xbf16, #tpu.memory_space<any>>) target(%arg19 : memref<121x512xbf16, #tpu.memory_space<vmem>>) target_semaphore(%3 : memref<!tpu.dma_semaphore, #tpu.memory_space<semaphore_mem>>)
    %c2_i32 = arith.constant 2 : i32
    %4 = tpu.memref_slice %arg22[%c2_i32] : memref<4x!tpu.dma_semaphore, #tpu.memory_space<semaphore_mem>> -> memref<1x!tpu.dma_semaphore, #tpu.memory_space<semaphore_mem>>
    %5 = tpu.memref_squeeze %4 : memref<1x!tpu.dma_semaphore, #tpu.memory_space<semaphore_mem>> -> memref<!tpu.dma_semaphore, #tpu.memory_space<semaphore_mem>>
    tpu.enqueue_dma source(%arg15 : memref<49x512xbf16, #tpu.memory_space<any>>) target(%arg20 : memref<49x512xbf16, #tpu.memory_space<vmem>>) target_semaphore(%5 : memref<!tpu.dma_semaphore, #tpu.memory_space<semaphore_mem>>)
    %c3_i32 = arith.constant 3 : i32
    %6 = tpu.memref_slice %arg22[%c3_i32] : memref<4x!tpu.dma_semaphore, #tpu.memory_space<semaphore_mem>> -> memref<1x!tpu.dma_semaphore, #tpu.memory_space<semaphore_mem>>
    %7 = tpu.memref_squeeze %6 : memref<1x!tpu.dma_semaphore, #tpu.memory_space<semaphore_mem>> -> memref<!tpu.dma_semaphore, #tpu.memory_space<semaphore_mem>>
    tpu.enqueue_dma source(%arg16 : memref<25x512xbf16, #tpu.memory_space<any>>) target(%arg21 : memref<25x512xbf16, #tpu.memory_space<vmem>>) target_semaphore(%7 : memref<!tpu.dma_semaphore, #tpu.memory_space<semaphore_mem>>)
    %c0 = arith.constant 0 : index
    %c0_0 = arith.constant 0 : index
    %c0_1 = arith.constant 0 : index
    %8 = vector.load %arg0[%c0, %c0_0, %c0_1] : memref<2x4x324xf32, #tpu.memory_space<vmem>>, vector<2x4x324xf32>
    %c0_2 = arith.constant 0 : index
    %c0_3 = arith.constant 0 : index
    %9 = vector.load %arg1[%c0_2, %c0_3] : memref<16x4xf32, #tpu.memory_space<vmem>>, vector<16x4xf32>
    %10 = vector.shape_cast %9 : vector<16x4xf32> to vector<1x16x4xf32>
    %11 = vector.broadcast %10 : vector<1x16x4xf32> to vector<2x16x4xf32>
    "tpu.trace_start"() <{level = 10 : i32, message = "noc,ncm->nom"}> : () -> ()
    %cst = arith.constant dense<0.000000e+00> : vector<2x16x324xf32>
    %12 = tpu.matmul %11, %8, %cst {dimension_numbers = #tpu.dot_dimension_numbers<[2], [1], [1], [2], [0, 0, 0, 1, 1, 2], [0], [0]>} : vector<2x16x4xf32>, vector<2x4x324xf32>, vector<2x16x324xf32> -> vector<2x16x324xf32>
    "tpu.trace_stop"() : () -> ()
    %cst_4 = arith.constant dense<0.000000e+00> : vector<2x16xf32>
    %13 = vector.multi_reduction <add>, %12, %cst_4 [2] : vector<2x16x324xf32> to vector<2x16xf32>
    %14 = vector.shape_cast %13 : vector<2x16xf32> to vector<2x16x1xf32>
    %cst_5 = arith.constant dense<0.000000e+00> : vector<16x1xf32>
    %15 = vector.multi_reduction <add>, %14, %cst_5 [0] : vector<2x16x1xf32> to vector<16x1xf32>
    %16 = vector.shape_cast %15 : vector<16x1xf32> to vector<1x16x1xf32>
    %17 = arith.mulf %12, %12 : vector<2x16x324xf32>
    %cst_6 = arith.constant dense<0.000000e+00> : vector<2x16xf32>
    %18 = vector.multi_reduction <add>, %17, %cst_6 [2] : vector<2x16x324xf32> to vector<2x16xf32>
    %19 = vector.shape_cast %18 : vector<2x16xf32> to vector<2x16x1xf32>
    %cst_7 = arith.constant dense<0.000000e+00> : vector<16x1xf32>
    %20 = vector.multi_reduction <add>, %19, %cst_7 [0] : vector<2x16x1xf32> to vector<16x1xf32>
    %21 = vector.shape_cast %20 : vector<16x1xf32> to vector<1x16x1xf32>
    %cst_8 = arith.constant 0.00154320989 : f32
    %22 = vector.broadcast %cst_8 : f32 to vector<1x16x1xf32>
    %23 = arith.mulf %16, %22 : vector<1x16x1xf32>
    %cst_9 = arith.constant 0.00154320989 : f32
    %24 = vector.broadcast %cst_9 : f32 to vector<1x16x1xf32>
    %25 = arith.mulf %21, %24 : vector<1x16x1xf32>
    %26 = arith.mulf %23, %23 : vector<1x16x1xf32>
    %27 = arith.subf %25, %26 : vector<1x16x1xf32>
    %c0_10 = arith.constant 0 : index
    %c0_11 = arith.constant 0 : index
    %c0_12 = arith.constant 0 : index
    %28 = vector.load %arg2[%c0_10, %c0_11, %c0_12] : memref<1x16x1xf32, #tpu.memory_space<vmem>>, vector<1x16x1xf32>
    %cst_13 = arith.constant 9.99999974E-6 : f32
    %29 = vector.broadcast %cst_13 : f32 to vector<1x16x1xf32>
    %30 = arith.addf %27, %29 : vector<1x16x1xf32>
    %31 = math.rsqrt %30 : vector<1x16x1xf32>
    %32 = arith.mulf %28, %31 : vector<1x16x1xf32>
    %c0_14 = arith.constant 0 : index
    %c0_15 = arith.constant 0 : index
    %c0_16 = arith.constant 0 : index
    %33 = vector.load %arg3[%c0_14, %c0_15, %c0_16] : memref<1x16x1xf32, #tpu.memory_space<vmem>>, vector<1x16x1xf32>
    %34 = arith.mulf %23, %32 : vector<1x16x1xf32>
    %35 = arith.subf %33, %34 : vector<1x16x1xf32>
    %36 = vector.broadcast %32 : vector<1x16x1xf32> to vector<2x16x324xf32>
    %37 = arith.mulf %12, %36 : vector<2x16x324xf32>
    %38 = vector.broadcast %35 : vector<1x16x1xf32> to vector<2x16x324xf32>
    %39 = arith.addf %37, %38 : vector<2x16x324xf32>
    %cst_17 = arith.constant 0.000000e+00 : f32
    %40 = vector.broadcast %cst_17 : f32 to vector<2x16x324xf32>
    %41 = arith.maximumf %39, %40 : vector<2x16x324xf32>
    %c0_i32_18 = arith.constant 0 : i32
    %42 = tpu.memref_slice %arg22[%c0_i32_18] : memref<4x!tpu.dma_semaphore, #tpu.memory_space<semaphore_mem>> -> memref<1x!tpu.dma_semaphore, #tpu.memory_space<semaphore_mem>>
    %43 = tpu.memref_squeeze %42 : memref<1x!tpu.dma_semaphore, #tpu.memory_space<semaphore_mem>> -> memref<!tpu.dma_semaphore, #tpu.memory_space<semaphore_mem>>
    tpu.wait_dma2 semaphore(%43 : memref<!tpu.dma_semaphore, #tpu.memory_space<semaphore_mem>>) src(%arg13 : memref<324x512xbf16, #tpu.memory_space<any>>) dst(%arg18 : memref<324x512xbf16, #tpu.memory_space<vmem>>)
    %c0_19 = arith.constant 0 : index
    %c0_20 = arith.constant 0 : index
    %44 = vector.load %arg18[%c0_19, %c0_20] : memref<324x512xbf16, #tpu.memory_space<vmem>>, vector<324x512xbf16>
    %45 = arith.extf %44 : vector<324x512xbf16> to vector<324x512xf32>
    %46 = vector.shape_cast %45 : vector<324x512xf32> to vector<1x324x512xf32>
    %47 = vector.broadcast %46 : vector<1x324x512xf32> to vector<2x324x512xf32>
    "tpu.trace_start"() <{level = 10 : i32, message = "ncm,nmq->ncq"}> : () -> ()
    %cst_21 = arith.constant dense<0.000000e+00> : vector<2x16x512xf32>
    %48 = tpu.matmul %41, %47, %cst_21 {dimension_numbers = #tpu.dot_dimension_numbers<[2], [1], [1], [2], [0, 0, 0, 1, 1, 2], [0], [0]>} : vector<2x16x324xf32>, vector<2x324x512xf32>, vector<2x16x512xf32> -> vector<2x16x512xf32>
    "tpu.trace_stop"() : () -> ()
    %49 = vector.extract_strided_slice %48 {offsets = [0, 0, 0], sizes = [2, 16, 128], strides = [1, 1, 1]} : vector<2x16x512xf32> to vector<2x16x128xf32>
    %50 = vector.extract_strided_slice %48 {offsets = [0, 0, 128], sizes = [2, 16, 128], strides = [1, 1, 1]} : vector<2x16x512xf32> to vector<2x16x128xf32>
    %51 = arith.maximumf %49, %50 : vector<2x16x128xf32>
    %52 = vector.extract_strided_slice %48 {offsets = [0, 0, 256], sizes = [2, 16, 128], strides = [1, 1, 1]} : vector<2x16x512xf32> to vector<2x16x128xf32>
    %53 = vector.extract_strided_slice %48 {offsets = [0, 0, 384], sizes = [2, 16, 128], strides = [1, 1, 1]} : vector<2x16x512xf32> to vector<2x16x128xf32>
    %54 = arith.maximumf %52, %53 : vector<2x16x128xf32>
    %55 = arith.maximumf %51, %54 : vector<2x16x128xf32>
    %56 = vector.extract_strided_slice %55 {offsets = [0, 0, 0], sizes = [2, 16, 121], strides = [1, 1, 1]} : vector<2x16x128xf32> to vector<2x16x121xf32>
    %c0_22 = arith.constant 0 : index
    %c0_23 = arith.constant 0 : index
    %57 = vector.load %arg4[%c0_22, %c0_23] : memref<32x16xf32, #tpu.memory_space<vmem>>, vector<32x16xf32>
    %58 = vector.shape_cast %57 : vector<32x16xf32> to vector<1x32x16xf32>
    %59 = vector.broadcast %58 : vector<1x32x16xf32> to vector<2x32x16xf32>
    "tpu.trace_start"() <{level = 10 : i32, message = "noc,ncm->nom"}> : () -> ()
    %cst_24 = arith.constant dense<0.000000e+00> : vector<2x32x121xf32>
    %60 = tpu.matmul %59, %56, %cst_24 {dimension_numbers = #tpu.dot_dimension_numbers<[2], [1], [1], [2], [0, 0, 0, 1, 1, 2], [0], [0]>} : vector<2x32x16xf32>, vector<2x16x121xf32>, vector<2x32x121xf32> -> vector<2x32x121xf32>
    "tpu.trace_stop"() : () -> ()
    %cst_25 = arith.constant dense<0.000000e+00> : vector<2x32xf32>
    %61 = vector.multi_reduction <add>, %60, %cst_25 [2] : vector<2x32x121xf32> to vector<2x32xf32>
    %62 = vector.shape_cast %61 : vector<2x32xf32> to vector<2x32x1xf32>
    %cst_26 = arith.constant dense<0.000000e+00> : vector<32x1xf32>
    %63 = vector.multi_reduction <add>, %62, %cst_26 [0] : vector<2x32x1xf32> to vector<32x1xf32>
    %64 = vector.shape_cast %63 : vector<32x1xf32> to vector<1x32x1xf32>
    %65 = arith.mulf %60, %60 : vector<2x32x121xf32>
    %cst_27 = arith.constant dense<0.000000e+00> : vector<2x32xf32>
    %66 = vector.multi_reduction <add>, %65, %cst_27 [2] : vector<2x32x121xf32> to vector<2x32xf32>
    %67 = vector.shape_cast %66 : vector<2x32xf32> to vector<2x32x1xf32>
    %cst_28 = arith.constant dense<0.000000e+00> : vector<32x1xf32>
    %68 = vector.multi_reduction <add>, %67, %cst_28 [0] : vector<2x32x1xf32> to vector<32x1xf32>
    %69 = vector.shape_cast %68 : vector<32x1xf32> to vector<1x32x1xf32>
    %cst_29 = arith.constant 0.00413223123 : f32
    %70 = vector.broadcast %cst_29 : f32 to vector<1x32x1xf32>
    %71 = arith.mulf %64, %70 : vector<1x32x1xf32>
    %cst_30 = arith.constant 0.00413223123 : f32
    %72 = vector.broadcast %cst_30 : f32 to vector<1x32x1xf32>
    %73 = arith.mulf %69, %72 : vector<1x32x1xf32>
    %74 = arith.mulf %71, %71 : vector<1x32x1xf32>
    %75 = arith.subf %73, %74 : vector<1x32x1xf32>
    %c0_31 = arith.constant 0 : index
    %c0_32 = arith.constant 0 : index
    %c0_33 = arith.constant 0 : index
    %76 = vector.load %arg5[%c0_31, %c0_32, %c0_33] : memref<1x32x1xf32, #tpu.memory_space<vmem>>, vector<1x32x1xf32>
    %cst_34 = arith.constant 9.99999974E-6 : f32
    %77 = vector.broadcast %cst_34 : f32 to vector<1x32x1xf32>
    %78 = arith.addf %75, %77 : vector<1x32x1xf32>
    %79 = math.rsqrt %78 : vector<1x32x1xf32>
    %80 = arith.mulf %76, %79 : vector<1x32x1xf32>
    %c0_35 = arith.constant 0 : index
    %c0_36 = arith.constant 0 : index
    %c0_37 = arith.constant 0 : index
    %81 = vector.load %arg6[%c0_35, %c0_36, %c0_37] : memref<1x32x1xf32, #tpu.memory_space<vmem>>, vector<1x32x1xf32>
    %82 = arith.mulf %71, %80 : vector<1x32x1xf32>
    %83 = arith.subf %81, %82 : vector<1x32x1xf32>
    %84 = vector.broadcast %80 : vector<1x32x1xf32> to vector<2x32x121xf32>
    %85 = arith.mulf %60, %84 : vector<2x32x121xf32>
    %86 = vector.broadcast %83 : vector<1x32x1xf32> to vector<2x32x121xf32>
    %87 = arith.addf %85, %86 : vector<2x32x121xf32>
    %cst_38 = arith.constant 0.000000e+00 : f32
    %88 = vector.broadcast %cst_38 : f32 to vector<2x32x121xf32>
    %89 = arith.maximumf %87, %88 : vector<2x32x121xf32>
    %c1_i32_39 = arith.constant 1 : i32
    %90 = tpu.memref_slice %arg22[%c1_i32_39] : memref<4x!tpu.dma_semaphore, #tpu.memory_space<semaphore_mem>> -> memref<1x!tpu.dma_semaphore, #tpu.memory_space<semaphore_mem>>
    %91 = tpu.memref_squeeze %90 : memref<1x!tpu.dma_semaphore, #tpu.memory_space<semaphore_mem>> -> memref<!tpu.dma_semaphore, #tpu.memory_space<semaphore_mem>>
    tpu.wait_dma2 semaphore(%91 : memref<!tpu.dma_semaphore, #tpu.memory_space<semaphore_mem>>) src(%arg14 : memref<121x512xbf16, #tpu.memory_space<any>>) dst(%arg19 : memref<121x512xbf16, #tpu.memory_space<vmem>>)
    %c0_40 = arith.constant 0 : index
    %c0_41 = arith.constant 0 : index
    %92 = vector.load %arg19[%c0_40, %c0_41] : memref<121x512xbf16, #tpu.memory_space<vmem>>, vector<121x512xbf16>
    %93 = arith.extf %92 : vector<121x512xbf16> to vector<121x512xf32>
    %94 = vector.shape_cast %93 : vector<121x512xf32> to vector<1x121x512xf32>
    %95 = vector.broadcast %94 : vector<1x121x512xf32> to vector<2x121x512xf32>
    "tpu.trace_start"() <{level = 10 : i32, message = "ncm,nmq->ncq"}> : () -> ()
    %cst_42 = arith.constant dense<0.000000e+00> : vector<2x32x512xf32>
    %96 = tpu.matmul %89, %95, %cst_42 {dimension_numbers = #tpu.dot_dimension_numbers<[2], [1], [1], [2], [0, 0, 0, 1, 1, 2], [0], [0]>} : vector<2x32x121xf32>, vector<2x121x512xf32>, vector<2x32x512xf32> -> vector<2x32x512xf32>
    "tpu.trace_stop"() : () -> ()
    %97 = vector.extract_strided_slice %96 {offsets = [0, 0, 0], sizes = [2, 32, 128], strides = [1, 1, 1]} : vector<2x32x512xf32> to vector<2x32x128xf32>
    %98 = vector.extract_strided_slice %96 {offsets = [0, 0, 128], sizes = [2, 32, 128], strides = [1, 1, 1]} : vector<2x32x512xf32> to vector<2x32x128xf32>
    %99 = arith.maximumf %97, %98 : vector<2x32x128xf32>
    %100 = vector.extract_strided_slice %96 {offsets = [0, 0, 256], sizes = [2, 32, 128], strides = [1, 1, 1]} : vector<2x32x512xf32> to vector<2x32x128xf32>
    %101 = vector.extract_strided_slice %96 {offsets = [0, 0, 384], sizes = [2, 32, 128], strides = [1, 1, 1]} : vector<2x32x512xf32> to vector<2x32x128xf32>
    %102 = arith.maximumf %100, %101 : vector<2x32x128xf32>
    %103 = arith.maximumf %99, %102 : vector<2x32x128xf32>
    %104 = vector.extract_strided_slice %103 {offsets = [0, 0, 0], sizes = [2, 32, 49], strides = [1, 1, 1]} : vector<2x32x128xf32> to vector<2x32x49xf32>
    %c0_43 = arith.constant 0 : index
    %c0_44 = arith.constant 0 : index
    %105 = vector.load %arg7[%c0_43, %c0_44] : memref<32x32xf32, #tpu.memory_space<vmem>>, vector<32x32xf32>
    %106 = vector.shape_cast %105 : vector<32x32xf32> to vector<1x32x32xf32>
    %107 = vector.broadcast %106 : vector<1x32x32xf32> to vector<2x32x32xf32>
    "tpu.trace_start"() <{level = 10 : i32, message = "noc,ncm->nom"}> : () -> ()
    %cst_45 = arith.constant dense<0.000000e+00> : vector<2x32x49xf32>
    %108 = tpu.matmul %107, %104, %cst_45 {dimension_numbers = #tpu.dot_dimension_numbers<[2], [1], [1], [2], [0, 0, 0, 1, 1, 2], [0], [0]>} : vector<2x32x32xf32>, vector<2x32x49xf32>, vector<2x32x49xf32> -> vector<2x32x49xf32>
    "tpu.trace_stop"() : () -> ()
    %cst_46 = arith.constant dense<0.000000e+00> : vector<2x32xf32>
    %109 = vector.multi_reduction <add>, %108, %cst_46 [2] : vector<2x32x49xf32> to vector<2x32xf32>
    %110 = vector.shape_cast %109 : vector<2x32xf32> to vector<2x32x1xf32>
    %cst_47 = arith.constant dense<0.000000e+00> : vector<32x1xf32>
    %111 = vector.multi_reduction <add>, %110, %cst_47 [0] : vector<2x32x1xf32> to vector<32x1xf32>
    %112 = vector.shape_cast %111 : vector<32x1xf32> to vector<1x32x1xf32>
    %113 = arith.mulf %108, %108 : vector<2x32x49xf32>
    %cst_48 = arith.constant dense<0.000000e+00> : vector<2x32xf32>
    %114 = vector.multi_reduction <add>, %113, %cst_48 [2] : vector<2x32x49xf32> to vector<2x32xf32>
    %115 = vector.shape_cast %114 : vector<2x32xf32> to vector<2x32x1xf32>
    %cst_49 = arith.constant dense<0.000000e+00> : vector<32x1xf32>
    %116 = vector.multi_reduction <add>, %115, %cst_49 [0] : vector<2x32x1xf32> to vector<32x1xf32>
    %117 = vector.shape_cast %116 : vector<32x1xf32> to vector<1x32x1xf32>
    %cst_50 = arith.constant 0.0102040814 : f32
    %118 = vector.broadcast %cst_50 : f32 to vector<1x32x1xf32>
    %119 = arith.mulf %112, %118 : vector<1x32x1xf32>
    %cst_51 = arith.constant 0.0102040814 : f32
    %120 = vector.broadcast %cst_51 : f32 to vector<1x32x1xf32>
    %121 = arith.mulf %117, %120 : vector<1x32x1xf32>
    %122 = arith.mulf %119, %119 : vector<1x32x1xf32>
    %123 = arith.subf %121, %122 : vector<1x32x1xf32>
    %c0_52 = arith.constant 0 : index
    %c0_53 = arith.constant 0 : index
    %c0_54 = arith.constant 0 : index
    %124 = vector.load %arg8[%c0_52, %c0_53, %c0_54] : memref<1x32x1xf32, #tpu.memory_space<vmem>>, vector<1x32x1xf32>
    %cst_55 = arith.constant 9.99999974E-6 : f32
    %125 = vector.broadcast %cst_55 : f32 to vector<1x32x1xf32>
    %126 = arith.addf %123, %125 : vector<1x32x1xf32>
    %127 = math.rsqrt %126 : vector<1x32x1xf32>
    %128 = arith.mulf %124, %127 : vector<1x32x1xf32>
    %c0_56 = arith.constant 0 : index
    %c0_57 = arith.constant 0 : index
    %c0_58 = arith.constant 0 : index
    %129 = vector.load %arg9[%c0_56, %c0_57, %c0_58] : memref<1x32x1xf32, #tpu.memory_space<vmem>>, vector<1x32x1xf32>
    %130 = arith.mulf %119, %128 : vector<1x32x1xf32>
    %131 = arith.subf %129, %130 : vector<1x32x1xf32>
    %132 = vector.broadcast %128 : vector<1x32x1xf32> to vector<2x32x49xf32>
    %133 = arith.mulf %108, %132 : vector<2x32x49xf32>
    %134 = vector.broadcast %131 : vector<1x32x1xf32> to vector<2x32x49xf32>
    %135 = arith.addf %133, %134 : vector<2x32x49xf32>
    %cst_59 = arith.constant 0.000000e+00 : f32
    %136 = vector.broadcast %cst_59 : f32 to vector<2x32x49xf32>
    %137 = arith.maximumf %135, %136 : vector<2x32x49xf32>
    %c2_i32_60 = arith.constant 2 : i32
    %138 = tpu.memref_slice %arg22[%c2_i32_60] : memref<4x!tpu.dma_semaphore, #tpu.memory_space<semaphore_mem>> -> memref<1x!tpu.dma_semaphore, #tpu.memory_space<semaphore_mem>>
    %139 = tpu.memref_squeeze %138 : memref<1x!tpu.dma_semaphore, #tpu.memory_space<semaphore_mem>> -> memref<!tpu.dma_semaphore, #tpu.memory_space<semaphore_mem>>
    tpu.wait_dma2 semaphore(%139 : memref<!tpu.dma_semaphore, #tpu.memory_space<semaphore_mem>>) src(%arg15 : memref<49x512xbf16, #tpu.memory_space<any>>) dst(%arg20 : memref<49x512xbf16, #tpu.memory_space<vmem>>)
    %c0_61 = arith.constant 0 : index
    %c0_62 = arith.constant 0 : index
    %140 = vector.load %arg20[%c0_61, %c0_62] : memref<49x512xbf16, #tpu.memory_space<vmem>>, vector<49x512xbf16>
    %141 = arith.extf %140 : vector<49x512xbf16> to vector<49x512xf32>
    %142 = vector.shape_cast %141 : vector<49x512xf32> to vector<1x49x512xf32>
    %143 = vector.broadcast %142 : vector<1x49x512xf32> to vector<2x49x512xf32>
    "tpu.trace_start"() <{level = 10 : i32, message = "ncm,nmq->ncq"}> : () -> ()
    %cst_63 = arith.constant dense<0.000000e+00> : vector<2x32x512xf32>
    %144 = tpu.matmul %137, %143, %cst_63 {dimension_numbers = #tpu.dot_dimension_numbers<[2], [1], [1], [2], [0, 0, 0, 1, 1, 2], [0], [0]>} : vector<2x32x49xf32>, vector<2x49x512xf32>, vector<2x32x512xf32> -> vector<2x32x512xf32>
    "tpu.trace_stop"() : () -> ()
    %145 = vector.extract_strided_slice %144 {offsets = [0, 0, 0], sizes = [2, 32, 128], strides = [1, 1, 1]} : vector<2x32x512xf32> to vector<2x32x128xf32>
    %146 = vector.extract_strided_slice %144 {offsets = [0, 0, 128], sizes = [2, 32, 128], strides = [1, 1, 1]} : vector<2x32x512xf32> to vector<2x32x128xf32>
    %147 = arith.maximumf %145, %146 : vector<2x32x128xf32>
    %148 = vector.extract_strided_slice %144 {offsets = [0, 0, 256], sizes = [2, 32, 128], strides = [1, 1, 1]} : vector<2x32x512xf32> to vector<2x32x128xf32>
    %149 = vector.extract_strided_slice %144 {offsets = [0, 0, 384], sizes = [2, 32, 128], strides = [1, 1, 1]} : vector<2x32x512xf32> to vector<2x32x128xf32>
    %150 = arith.maximumf %148, %149 : vector<2x32x128xf32>
    %151 = arith.maximumf %147, %150 : vector<2x32x128xf32>
    %152 = vector.extract_strided_slice %151 {offsets = [0, 0, 0], sizes = [2, 32, 25], strides = [1, 1, 1]} : vector<2x32x128xf32> to vector<2x32x25xf32>
    %c0_64 = arith.constant 0 : index
    %c0_65 = arith.constant 0 : index
    %153 = vector.load %arg10[%c0_64, %c0_65] : memref<16x32xf32, #tpu.memory_space<vmem>>, vector<16x32xf32>
    %154 = vector.shape_cast %153 : vector<16x32xf32> to vector<1x16x32xf32>
    %155 = vector.broadcast %154 : vector<1x16x32xf32> to vector<2x16x32xf32>
    "tpu.trace_start"() <{level = 10 : i32, message = "noc,ncm->nom"}> : () -> ()
    %cst_66 = arith.constant dense<0.000000e+00> : vector<2x16x25xf32>
    %156 = tpu.matmul %155, %152, %cst_66 {dimension_numbers = #tpu.dot_dimension_numbers<[2], [1], [1], [2], [0, 0, 0, 1, 1, 2], [0], [0]>} : vector<2x16x32xf32>, vector<2x32x25xf32>, vector<2x16x25xf32> -> vector<2x16x25xf32>
    "tpu.trace_stop"() : () -> ()
    %cst_67 = arith.constant dense<0.000000e+00> : vector<2x16xf32>
    %157 = vector.multi_reduction <add>, %156, %cst_67 [2] : vector<2x16x25xf32> to vector<2x16xf32>
    %158 = vector.shape_cast %157 : vector<2x16xf32> to vector<2x16x1xf32>
    %cst_68 = arith.constant dense<0.000000e+00> : vector<16x1xf32>
    %159 = vector.multi_reduction <add>, %158, %cst_68 [0] : vector<2x16x1xf32> to vector<16x1xf32>
    %160 = vector.shape_cast %159 : vector<16x1xf32> to vector<1x16x1xf32>
    %161 = arith.mulf %156, %156 : vector<2x16x25xf32>
    %cst_69 = arith.constant dense<0.000000e+00> : vector<2x16xf32>
    %162 = vector.multi_reduction <add>, %161, %cst_69 [2] : vector<2x16x25xf32> to vector<2x16xf32>
    %163 = vector.shape_cast %162 : vector<2x16xf32> to vector<2x16x1xf32>
    %cst_70 = arith.constant dense<0.000000e+00> : vector<16x1xf32>
    %164 = vector.multi_reduction <add>, %163, %cst_70 [0] : vector<2x16x1xf32> to vector<16x1xf32>
    %165 = vector.shape_cast %164 : vector<16x1xf32> to vector<1x16x1xf32>
    %cst_71 = arith.constant 2.000000e-02 : f32
    %166 = vector.broadcast %cst_71 : f32 to vector<1x16x1xf32>
    %167 = arith.mulf %160, %166 : vector<1x16x1xf32>
    %cst_72 = arith.constant 2.000000e-02 : f32
    %168 = vector.broadcast %cst_72 : f32 to vector<1x16x1xf32>
    %169 = arith.mulf %165, %168 : vector<1x16x1xf32>
    %170 = arith.mulf %167, %167 : vector<1x16x1xf32>
    %171 = arith.subf %169, %170 : vector<1x16x1xf32>
    %c0_73 = arith.constant 0 : index
    %c0_74 = arith.constant 0 : index
    %c0_75 = arith.constant 0 : index
    %172 = vector.load %arg11[%c0_73, %c0_74, %c0_75] : memref<1x16x1xf32, #tpu.memory_space<vmem>>, vector<1x16x1xf32>
    %cst_76 = arith.constant 9.99999974E-6 : f32
    %173 = vector.broadcast %cst_76 : f32 to vector<1x16x1xf32>
    %174 = arith.addf %171, %173 : vector<1x16x1xf32>
    %175 = math.rsqrt %174 : vector<1x16x1xf32>
    %176 = arith.mulf %172, %175 : vector<1x16x1xf32>
    %c0_77 = arith.constant 0 : index
    %c0_78 = arith.constant 0 : index
    %c0_79 = arith.constant 0 : index
    %177 = vector.load %arg12[%c0_77, %c0_78, %c0_79] : memref<1x16x1xf32, #tpu.memory_space<vmem>>, vector<1x16x1xf32>
    %178 = arith.mulf %167, %176 : vector<1x16x1xf32>
    %179 = arith.subf %177, %178 : vector<1x16x1xf32>
    %180 = vector.broadcast %176 : vector<1x16x1xf32> to vector<2x16x25xf32>
    %181 = arith.mulf %156, %180 : vector<2x16x25xf32>
    %182 = vector.broadcast %179 : vector<1x16x1xf32> to vector<2x16x25xf32>
    %183 = arith.addf %181, %182 : vector<2x16x25xf32>
    %cst_80 = arith.constant 0.000000e+00 : f32
    %184 = vector.broadcast %cst_80 : f32 to vector<2x16x25xf32>
    %185 = arith.maximumf %183, %184 : vector<2x16x25xf32>
    %c3_i32_81 = arith.constant 3 : i32
    %186 = tpu.memref_slice %arg22[%c3_i32_81] : memref<4x!tpu.dma_semaphore, #tpu.memory_space<semaphore_mem>> -> memref<1x!tpu.dma_semaphore, #tpu.memory_space<semaphore_mem>>
    %187 = tpu.memref_squeeze %186 : memref<1x!tpu.dma_semaphore, #tpu.memory_space<semaphore_mem>> -> memref<!tpu.dma_semaphore, #tpu.memory_space<semaphore_mem>>
    tpu.wait_dma2 semaphore(%187 : memref<!tpu.dma_semaphore, #tpu.memory_space<semaphore_mem>>) src(%arg16 : memref<25x512xbf16, #tpu.memory_space<any>>) dst(%arg21 : memref<25x512xbf16, #tpu.memory_space<vmem>>)
    %c0_82 = arith.constant 0 : index
    %c0_83 = arith.constant 0 : index
    %188 = vector.load %arg21[%c0_82, %c0_83] : memref<25x512xbf16, #tpu.memory_space<vmem>>, vector<25x512xbf16>
    %189 = arith.extf %188 : vector<25x512xbf16> to vector<25x512xf32>
    %190 = vector.shape_cast %189 : vector<25x512xf32> to vector<1x25x512xf32>
    %191 = vector.broadcast %190 : vector<1x25x512xf32> to vector<2x25x512xf32>
    "tpu.trace_start"() <{level = 10 : i32, message = "ncm,nmq->ncq"}> : () -> ()
    %cst_84 = arith.constant dense<0.000000e+00> : vector<2x16x512xf32>
    %192 = tpu.matmul %185, %191, %cst_84 {dimension_numbers = #tpu.dot_dimension_numbers<[2], [1], [1], [2], [0, 0, 0, 1, 1, 2], [0], [0]>} : vector<2x16x25xf32>, vector<2x25x512xf32>, vector<2x16x512xf32> -> vector<2x16x512xf32>
    "tpu.trace_stop"() : () -> ()
    %193 = vector.extract_strided_slice %192 {offsets = [0, 0, 0], sizes = [2, 16, 128], strides = [1, 1, 1]} : vector<2x16x512xf32> to vector<2x16x128xf32>
    %194 = vector.extract_strided_slice %192 {offsets = [0, 0, 128], sizes = [2, 16, 128], strides = [1, 1, 1]} : vector<2x16x512xf32> to vector<2x16x128xf32>
    %195 = arith.maximumf %193, %194 : vector<2x16x128xf32>
    %196 = vector.extract_strided_slice %192 {offsets = [0, 0, 256], sizes = [2, 16, 128], strides = [1, 1, 1]} : vector<2x16x512xf32> to vector<2x16x128xf32>
    %197 = vector.extract_strided_slice %192 {offsets = [0, 0, 384], sizes = [2, 16, 128], strides = [1, 1, 1]} : vector<2x16x512xf32> to vector<2x16x128xf32>
    %198 = arith.maximumf %196, %197 : vector<2x16x128xf32>
    %199 = arith.maximumf %195, %198 : vector<2x16x128xf32>
    %200 = vector.extract_strided_slice %199 {offsets = [0, 0, 0], sizes = [2, 16, 4], strides = [1, 1, 1]} : vector<2x16x128xf32> to vector<2x16x4xf32>
    %c0_85 = arith.constant 0 : index
    %c0_86 = arith.constant 0 : index
    %c0_87 = arith.constant 0 : index
    %201 = vector.load %arg17[%c0_85, %c0_86, %c0_87] : memref<2x16x4xf32, #tpu.memory_space<vmem>>, vector<2x16x4xf32>
    tpu.vector_store %arg17[%c0_85, %c0_86, %c0_87], %200 {strides = array<i32>} : memref<2x16x4xf32, #tpu.memory_space<vmem>>, vector<2x16x4xf32>,
    return
  }
}

</mosaic_0001>

<bundles_post_ra>
// kernel: omninet_forward.1
= control target key start
LH: loop header
LB: loop body
LE: loop exit
PB: predicated region body
PF: predicated region fallthrough
CT: control target
= control target key end

     0   :  { %s7197_s0 = inlined_call_operand.vmem [shape: f32[2,4,324], index: 0, kind: input, shape index: {}]   ;;  %s7198_s1 = inlined_call_operand.vmem [shape: f32[16,4], index: 1, kind: input, shape index: {}]   ;;  %s7199_s2 = inlined_call_operand.vmem [shape: f32[1,16,1], index: 2, kind: input, shape index: {}]   ;;  %s7200_s3 = inlined_call_operand.vmem [shape: f32[1,16,1], index: 3, kind: input, shape index: {}]   ;;  %s7201_s4 = inlined_call_operand.vmem [shape: f32[32,16], index: 4, kind: input, shape index: {}]   ;;  %s7202_s5 = inlined_call_operand.vmem [shape: f32[1,32,1], index: 5, kind: input, shape index: {}]   ;;  %s7203_s6 = inlined_call_operand.vmem [shape: f32[1,32,1], index: 6, kind: input, shape index: {}]   ;;  %s7204_s7 = inlined_call_operand.hbm [shape: f32[32,32], index: 7, kind: input, shape index: {}]   ;;  %s7205_s8 = inlined_call_operand.vmem [shape: f32[1,32,1], index: 8, kind: input, shape index: {}]   ;;  %s7206_s9 = inlined_call_operand.vmem [shape: f32[1,32,1], index: 9, kind: input, shape index: {}]   ;;  %s7207_s10 = inlined_call_operand.hbm [shape: f32[16,32], index: 10, kind: input, shape index: {}]   ;;  %s7208_s11 = inlined_call_operand.vmem [shape: f32[1,16,1], index: 11, kind: input, shape index: {}]   ;;  %s7209_s12 = inlined_call_operand.vmem [shape: f32[1,16,1], index: 12, kind: input, shape index: {}]   ;;  %s7210_s13 = inlined_call_operand.vmem [shape: bf16[324,512], index: 13, kind: input, shape index: {}]   ;;  %s7211_s14 = inlined_call_operand.hbm [shape: bf16[121,512], index: 14, kind: input, shape index: {}]   ;;  %s7212_s15 = inlined_call_operand.vmem [shape: bf16[49,512], index: 15, kind: input, shape index: {}]   ;;  %s7213_s16 = inlined_call_operand.vmem [shape: bf16[25,512], index: 16, kind: input, shape index: {}]   ;;  %s7214_s17 = inlined_call_operand.vmem [shape: f32[2,16,4], index: 17, kind: output, shape index: {}]  }
   0x1   :  { %7260 = sst [smem:[#allocation57_spill]] %s7197_s0 }
   0x2   :  { %7261 = sst [smem:[#allocation58_spill]] %s7198_s1 }
   0x3   :  { %22 = vsyncpa [#allocation8], 0 }
   0x4   :  { %23 = vsyncpa [#allocation10], 0  ;;  %s5594_s24 = smov [#allocation7]   ;;  %s5516_s28 = scalar_lea.hbm %s7204_s7, 512 }
   0x5   :  { %s43_s25 = sshll.u32 %s5594_s24, 4  ;;  %p5517_p0 = scmp.ne.s32.totalorder %s7204_s7, %s5516_s28  ;;  %s44_s25 = int_to_ptr.vmem [resolvable:$true] %s43_s25 }
   0x6   :  { %p5520_p1 = scmp.lt.u32.totalorder %s5516_s28, %s7204_s7 }
   0x8   :  { %p5522_p2 = pnand %p5520_p1, %p5517_p0 }
   0xa   :  { %5525 = shalt.err (!%p5522_p2)
}
   0xb   :  { %s5526_s19 = scalar_lea.vmem %s44_s25, 512  ;;  %p5531_p4 = scmp.lt.s32.totalorder %s44_s25, %s44_s25 }
   0xc   :  { %p5527_p3 = scmp.ne.s32.totalorder %s44_s25, %s5526_s19  ;;  %p5532_p5 = scmp.lt.s32.totalorder %s5526_s19, %s5526_s19 }
   0xe   :  { %p5533_p6 = por %p5532_p5, %p5531_p4 }
  0x10   :  { %p5534_p7 = pnand %p5533_p6, %p5527_p3 }
  0x12   :  { %5537 = shalt.err (!%p5534_p7)
}
  0x13   :  { %s5595_s1 = smov 128   ;;  %s5596_s20 = smov 8  }
  0x14   :  { %49 = dma.hbm_to_vmem [thread:$0]  %s7204_s7, 512, %s44_s25, [#allocation8], %s5595_s1, %s5595_s1, %s5596_s20  }
  0x15   :  { %s5597_s23 = smov [#allocation9]   ;;  %s5538_s28 = scalar_lea.hbm %s7207_s10, 256 }
  0x16   :  { %s59_s24 = sshll.u32 %s5597_s23, 4  ;;  %p5539_p8 = scmp.ne.s32.totalorder %s7207_s10, %s5538_s28  ;;  %s60_s24 = int_to_ptr.vmem [resolvable:$true] %s59_s24 }
  0x17   :  { %p5542_p9 = scmp.lt.u32.totalorder %s5538_s28, %s7207_s10 }
  0x19   :  { %p5544_p10 = pnand %p5542_p9, %p5539_p8 }
  0x1b   :  { %5547 = shalt.err (!%p5544_p10)
}
  0x1c   :  { %s5548_s19 = scalar_lea.vmem %s60_s24, 256  ;;  %p5553_p12 = scmp.lt.s32.totalorder %s60_s24, %s60_s24 }
  0x1d   :  { %p5549_p11 = scmp.ne.s32.totalorder %s60_s24, %s5548_s19  ;;  %p5554_p13 = scmp.lt.s32.totalorder %s5548_s19, %s5548_s19 }
  0x1f   :  { %p5555_p0 = por %p5554_p13, %p5553_p12 }
  0x21   :  { %p5556_p1 = pnand %p5555_p0, %p5549_p11 }
  0x23   :  { %5559 = shalt.err (!%p5556_p1)
}
  0x24   :  { %65 = dma.hbm_to_vmem [thread:$0]  %s7207_s10, 256, %s60_s24, [#allocation10], %s5595_s1, %s5595_s1, %s5596_s20  }
  0x25   :  { %5582 = dma.done.wait [#allocation8], 512  }
  0x26   :  { %5583 = vsyncadd [#allocation8], 4294966784 }
  0x27   :  { %5584 = dma.done.wait [#allocation10], 256  }
  0x28   :  { %5585 = vsyncadd [#allocation10], 4294967040  ;;  %v108_v0 = vld [vmem:[%s7210_s13] sm:$0xff]  ;;  %v110_v1 = vld [vmem:[%s7210_s13 + $0x8] sm:$0xff] }
  0x29   :  { %v112_v2 = vld [vmem:[%s7210_s13 + $0x10] sm:$0xff]  ;;  %109 = vst [vmem:[#allocation2] sm:$0xff] %v108_v0  ;;  %111 = vst [vmem:[#allocation2 + $0x8] sm:$0xff] %v110_v1  ;;  %v114_v3 = vld [vmem:[%s7210_s13 + $0x18] sm:$0xff] }
  0x2a   :  { %113 = vst [vmem:[#allocation2 + $0x10] sm:$0xff] %v112_v2  ;;  %v116_v4 = vld [vmem:[%s7210_s13 + $0x20] sm:$0xff]  ;;  %v118_v5 = vld [vmem:[%s7210_s13 + $0x28] sm:$0xff]  ;;  %115 = vst [vmem:[#allocation2 + $0x18] sm:$0xff] %v114_v3 }
  0x2b   :  { %117 = vst [vmem:[#allocation2 + $0x20] sm:$0xff] %v116_v4  ;;  %119 = vst [vmem:[#allocation2 + $0x28] sm:$0xff] %v118_v5  ;;  %v120_v6 = vld [vmem:[%s7210_s13 + $0x30] sm:$0xff]  ;;  %v122_v7 = vld [vmem:[%s7210_s13 + $0x38] sm:$0xff] }
  0x2c   :  { %v124_v8 = vld [vmem:[%s7210_s13 + $0x40] sm:$0xff]  ;;  %121 = vst [vmem:[#allocation2 + $0x30] sm:$0xff] %v120_v6  ;;  %123 = vst [vmem:[#allocation2 + $0x38] sm:$0xff] %v122_v7  ;;  %v126_v9 = vld [vmem:[%s7210_s13 + $0x48] sm:$0xff] }
  0x2d   :  { %125 = vst [vmem:[#allocation2 + $0x40] sm:$0xff] %v124_v8  ;;  %v128_v10 = vld [vmem:[%s7210_s13 + $0x50] sm:$0xff]  ;;  %v130_v11 = vld [vmem:[%s7210_s13 + $0x58] sm:$0xff]  ;;  %127 = vst [vmem:[#allocation2 + $0x48] sm:$0xff] %v126_v9 }
  0x2e   :  { %129 = vst [vmem:[#allocation2 + $0x50] sm:$0xff] %v128_v10  ;;  %131 = vst [vmem:[#allocation2 + $0x58] sm:$0xff] %v130_v11  ;;  %v132_v12 = vld [vmem:[%s7210_s13 + $0x60] sm:$0xff]  ;;  %v134_v13 = vld [vmem:[%s7210_s13 + $0x68] sm:$0xff] }
  0x2f   :  { %v136_v14 = vld [vmem:[%s7210_s13 + $0x70] sm:$0xff]  ;;  %133 = vst [vmem:[#allocation2 + $0x60] sm:$0xff] %v132_v12  ;;  %135 = vst [vmem:[#allocation2 + $0x68] sm:$0xff] %v134_v13  ;;  %v138_v15 = vld [vmem:[%s7210_s13 + $0x78] sm:$0xff] }
  0x30   :  { %137 = vst [vmem:[#allocation2 + $0x70] sm:$0xff] %v136_v14  ;;  %v140_v16 = vld [vmem:[%s7210_s13 + $0x80] sm:$0xff]  ;;  %v142_v17 = vld [vmem:[%s7210_s13 + $0x88] sm:$0xff]  ;;  %139 = vst [vmem:[#allocation2 + $0x78] sm:$0xff] %v138_v15 }
  0x31   :  { %141 = vst [vmem:[#allocation2 + $0x80] sm:$0xff] %v140_v16  ;;  %143 = vst [vmem:[#allocation2 + $0x88] sm:$0xff] %v142_v17  ;;  %v144_v18 = vld [vmem:[%s7210_s13 + $0x90] sm:$0xff]  ;;  %v146_v19 = vld [vmem:[%s7210_s13 + $0x98] sm:$0xff] }
  0x32   :  { %v148_v20 = vld [vmem:[%s7210_s13 + $0xa0] sm:$0xff]  ;;  %145 = vst [vmem:[#allocation2 + $0x90] sm:$0xff] %v144_v18  ;;  %147 = vst [vmem:[#allocation2 + $0x98] sm:$0xff] %v146_v19  ;;  %v150_v21 = vld [vmem:[%s7210_s13 + $0xa8] sm:$0xff] }
  0x33   :  { %149 = vst [vmem:[#allocation2 + $0xa0] sm:$0xff] %v148_v20  ;;  %v152_v22 = vld [vmem:[%s7210_s13 + $0xb0] sm:$0xff]  ;;  %v154_v23 = vld [vmem:[%s7210_s13 + $0xb8] sm:$0xff]  ;;  %151 = vst [vmem:[#allocation2 + $0xa8] sm:$0xff] %v150_v21 }
  0x34   :  { %153 = vst [vmem:[#allocation2 + $0xb0] sm:$0xff] %v152_v22  ;;  %155 = vst [vmem:[#allocation2 + $0xb8] sm:$0xff] %v154_v23  ;;  %v156_v24 = vld [vmem:[%s7210_s13 + $0xc0] sm:$0xff]  ;;  %v158_v25 = vld [vmem:[%s7210_s13 + $0xc8] sm:$0xff] }
  0x35   :  { %v160_v26 = vld [vmem:[%s7210_s13 + $0xd0] sm:$0xff]  ;;  %157 = vst [vmem:[#allocation2 + $0xc0] sm:$0xff] %v156_v24  ;;  %159 = vst [vmem:[#allocation2 + $0xc8] sm:$0xff] %v158_v25  ;;  %v162_v27 = vld [vmem:[%s7210_s13 + $0xd8] sm:$0xff] }
  0x36   :  { %161 = vst [vmem:[#allocation2 + $0xd0] sm:$0xff] %v160_v26  ;;  %v164_v28 = vld [vmem:[%s7210_s13 + $0xe0] sm:$0xff]  ;;  %v166_v29 = vld [vmem:[%s7210_s13 + $0xe8] sm:$0xff]  ;;  %163 = vst [vmem:[#allocation2 + $0xd8] sm:$0xff] %v162_v27 }
  0x37   :  { %165 = vst [vmem:[#allocation2 + $0xe0] sm:$0xff] %v164_v28  ;;  %167 = vst [vmem:[#allocation2 + $0xe8] sm:$0xff] %v166_v29  ;;  %v168_v30 = vld [vmem:[%s7210_s13 + $0xf0] sm:$0xff]  ;;  %v170_v31 = vld [vmem:[%s7210_s13 + $0xf8] sm:$0xff] }
  0x38   :  { %v172_v32 = vld [vmem:[%s7210_s13 + $0x100] sm:$0xff]  ;;  %169 = vst [vmem:[#allocation2 + $0xf0] sm:$0xff] %v168_v30  ;;  %171 = vst [vmem:[#allocation2 + $0xf8] sm:$0xff] %v170_v31  ;;  %v174_v33 = vld [vmem:[%s7210_s13 + $0x108] sm:$0xff] }
  0x39   :  { %173 = vst [vmem:[#allocation2 + $0x100] sm:$0xff] %v172_v32  ;;  %v176_v34 = vld [vmem:[%s7210_s13 + $0x110] sm:$0xff]  ;;  %v178_v35 = vld [vmem:[%s7210_s13 + $0x118] sm:$0xff]  ;;  %175 = vst [vmem:[#allocation2 + $0x108] sm:$0xff] %v174_v33 }
  0x3a   :  { %177 = vst [vmem:[#allocation2 + $0x110] sm:$0xff] %v176_v34  ;;  %179 = vst [vmem:[#allocation2 + $0x118] sm:$0xff] %v178_v35  ;;  %v180_v36 = vld [vmem:[%s7210_s13 + $0x120] sm:$0xff]  ;;  %v182_v37 = vld [vmem:[%s7210_s13 + $0x128] sm:$0xff] }
  0x3b   :  { %v184_v38 = vld [vmem:[%s7210_s13 + $0x130] sm:$0xff]  ;;  %181 = vst [vmem:[#allocation2 + $0x120] sm:$0xff] %v180_v36  ;;  %183 = vst [vmem:[#allocation2 + $0x128] sm:$0xff] %v182_v37  ;;  %v186_v39 = vld [vmem:[%s7210_s13 + $0x138] sm:$0xff] }
  0x3c   :  { %185 = vst [vmem:[#allocation2 + $0x130] sm:$0xff] %v184_v38  ;;  %v188_v40 = vld [vmem:[%s7210_s13 + $0x140] sm:$0xff]  ;;  %v190_v41 = vld [vmem:[%s7210_s13 + $0x148] sm:$0xff]  ;;  %187 = vst [vmem:[#allocation2 + $0x138] sm:$0xff] %v186_v39 }
  0x3d   :  { %189 = vst [vmem:[#allocation2 + $0x140] sm:$0xff] %v188_v40  ;;  %191 = vst [vmem:[#allocation2 + $0x148] sm:$0xff] %v190_v41  ;;  %v192_v42 = vld [vmem:[%s7210_s13 + $0x150] sm:$0xff]  ;;  %v194_v43 = vld [vmem:[%s7210_s13 + $0x158] sm:$0xff] }
  0x3e   :  { %v196_v44 = vld [vmem:[%s7210_s13 + $0x160] sm:$0xff]  ;;  %193 = vst [vmem:[#allocation2 + $0x150] sm:$0xff] %v192_v42  ;;  %195 = vst [vmem:[#allocation2 + $0x158] sm:$0xff] %v194_v43  ;;  %v198_v45 = vld [vmem:[%s7210_s13 + $0x168] sm:$0xff] }
  0x3f   :  { %197 = vst [vmem:[#allocation2 + $0x160] sm:$0xff] %v196_v44  ;;  %v200_v46 = vld [vmem:[%s7210_s13 + $0x170] sm:$0xff]  ;;  %v202_v47 = vld [vmem:[%s7210_s13 + $0x178] sm:$0xff]  ;;  %199 = vst [vmem:[#allocation2 + $0x168] sm:$0xff] %v198_v45 }
  0x40   :  { %201 = vst [vmem:[#allocation2 + $0x170] sm:$0xff] %v200_v46  ;;  %203 = vst [vmem:[#allocation2 + $0x178] sm:$0xff] %v202_v47  ;;  %v204_v48 = vld [vmem:[%s7210_s13 + $0x180] sm:$0xff]  ;;  %v206_v49 = vld [vmem:[%s7210_s13 + $0x188] sm:$0xff] }
  0x41   :  { %v208_v50 = vld [vmem:[%s7210_s13 + $0x190] sm:$0xff]  ;;  %205 = vst [vmem:[#allocation2 + $0x180] sm:$0xff] %v204_v48  ;;  %207 = vst [vmem:[#allocation2 + $0x188] sm:$0xff] %v206_v49  ;;  %v210_v51 = vld [vmem:[%s7210_s13 + $0x198] sm:$0xff] }
  0x42   :  { %209 = vst [vmem:[#allocation2 + $0x190] sm:$0xff] %v208_v50  ;;  %v212_v52 = vld [vmem:[%s7210_s13 + $0x1a0] sm:$0xff]  ;;  %v214_v53 = vld [vmem:[%s7210_s13 + $0x1a8] sm:$0xff]  ;;  %211 = vst [vmem:[#allocation2 + $0x198] sm:$0xff] %v210_v51 }
  0x43   :  { %213 = vst [vmem:[#allocation2 + $0x1a0] sm:$0xff] %v212_v52  ;;  %215 = vst [vmem:[#allocation2 + $0x1a8] sm:$0xff] %v214_v53  ;;  %v216_v54 = vld [vmem:[%s7210_s13 + $0x1b0] sm:$0xff]  ;;  %v218_v55 = vld [vmem:[%s7210_s13 + $0x1b8] sm:$0xff] }
  0x44   :  { %v220_v56 = vld [vmem:[%s7210_s13 + $0x1c0] sm:$0xff]  ;;  %217 = vst [vmem:[#allocation2 + $0x1b0] sm:$0xff] %v216_v54  ;;  %219 = vst [vmem:[#allocation2 + $0x1b8] sm:$0xff] %v218_v55  ;;  %v222_v57 = vld [vmem:[%s7210_s13 + $0x1c8] sm:$0xff] }
  0x45   :  { %221 = vst [vmem:[#allocation2 + $0x1c0] sm:$0xff] %v220_v56  ;;  %v224_v58 = vld [vmem:[%s7210_s13 + $0x1d0] sm:$0xff]  ;;  %v226_v59 = vld [vmem:[%s7210_s13 + $0x1d8] sm:$0xff]  ;;  %223 = vst [vmem:[#allocation2 + $0x1c8] sm:$0xff] %v222_v57 }
  0x46   :  { %225 = vst [vmem:[#allocation2 + $0x1d0] sm:$0xff] %v224_v58  ;;  %227 = vst [vmem:[#allocation2 + $0x1d8] sm:$0xff] %v226_v59  ;;  %v228_v60 = vld [vmem:[%s7210_s13 + $0x1e0] sm:$0xff]  ;;  %v230_v61 = vld [vmem:[%s7210_s13 + $0x1e8] sm:$0xff] }
  0x47   :  { %v232_v62 = vld [vmem:[%s7210_s13 + $0x1f0] sm:$0xff]  ;;  %229 = vst [vmem:[#allocation2 + $0x1e0] sm:$0xff] %v228_v60  ;;  %231 = vst [vmem:[#allocation2 + $0x1e8] sm:$0xff] %v230_v61  ;;  %v234_v63 = vld [vmem:[%s7210_s13 + $0x1f8] sm:$0xff] }
  0x48   :  { %233 = vst [vmem:[#allocation2 + $0x1f0] sm:$0xff] %v232_v62  ;;  %v236_v0 = vld [vmem:[%s7210_s13 + $0x200] sm:$0xff]  ;;  %v238_v1 = vld [vmem:[%s7210_s13 + $0x208] sm:$0xff]  ;;  %235 = vst [vmem:[#allocation2 + $0x1f8] sm:$0xff] %v234_v63 }
  0x49   :  { %237 = vst [vmem:[#allocation2 + $0x200] sm:$0xff] %v236_v0  ;;  %239 = vst [vmem:[#allocation2 + $0x208] sm:$0xff] %v238_v1  ;;  %v240_v2 = vld [vmem:[%s7210_s13 + $0x210] sm:$0xff]  ;;  %v242_v3 = vld [vmem:[%s7210_s13 + $0x218] sm:$0xff] }
  0x4a   :  { %v244_v4 = vld [vmem:[%s7210_s13 + $0x220] sm:$0xff]  ;;  %241 = vst [vmem:[#allocation2 + $0x210] sm:$0xff] %v240_v2  ;;  %243 = vst [vmem:[#allocation2 + $0x218] sm:$0xff] %v242_v3  ;;  %v246_v5 = vld [vmem:[%s7210_s13 + $0x228] sm:$0xff] }
  0x4b   :  { %245 = vst [vmem:[#allocation2 + $0x220] sm:$0xff] %v244_v4  ;;  %v248_v6 = vld [vmem:[%s7210_s13 + $0x230] sm:$0xff]  ;;  %v250_v7 = vld [vmem:[%s7210_s13 + $0x238] sm:$0xff]  ;;  %247 = vst [vmem:[#allocation2 + $0x228] sm:$0xff] %v246_v5 }
  0x4c   :  { %249 = vst [vmem:[#allocation2 + $0x230] sm:$0xff] %v248_v6  ;;  %251 = vst [vmem:[#allocation2 + $0x238] sm:$0xff] %v250_v7  ;;  %v252_v8 = vld [vmem:[%s7210_s13 + $0x240] sm:$0xff]  ;;  %v254_v9 = vld [vmem:[%s7210_s13 + $0x248] sm:$0xff] }
  0x4d   :  { %v256_v10 = vld [vmem:[%s7210_s13 + $0x250] sm:$0xff]  ;;  %253 = vst [vmem:[#allocation2 + $0x240] sm:$0xff] %v252_v8  ;;  %255 = vst [vmem:[#allocation2 + $0x248] sm:$0xff] %v254_v9  ;;  %v258_v11 = vld [vmem:[%s7210_s13 + $0x258] sm:$0xff] }
  0x4e   :  { %257 = vst [vmem:[#allocation2 + $0x250] sm:$0xff] %v256_v10  ;;  %v260_v12 = vld [vmem:[%s7210_s13 + $0x260] sm:$0xff]  ;;  %v262_v13 = vld [vmem:[%s7210_s13 + $0x268] sm:$0xff]  ;;  %259 = vst [vmem:[#allocation2 + $0x258] sm:$0xff] %v258_v11 }
  0x4f   :  { %261 = vst [vmem:[#allocation2 + $0x260] sm:$0xff] %v260_v12  ;;  %263 = vst [vmem:[#allocation2 + $0x268] sm:$0xff] %v262_v13  ;;  %v264_v14 = vld [vmem:[%s7210_s13 + $0x270] sm:$0xff]  ;;  %v266_v15 = vld [vmem:[%s7210_s13 + $0x278] sm:$0xff] }
  0x50   :  { %v268_v16 = vld [vmem:[%s7210_s13 + $0x280] sm:$0xff]  ;;  %265 = vst [vmem:[#allocation2 + $0x270] sm:$0xff] %v264_v14  ;;  %267 = vst [vmem:[#allocation2 + $0x278] sm:$0xff] %v266_v15  ;;  %v270_v17 = vld [vmem:[%s7210_s13 + $0x288] sm:$0xff] }
  0x51   :  { %269 = vst [vmem:[#allocation2 + $0x280] sm:$0xff] %v268_v16  ;;  %271 = vst [vmem:[#allocation2 + $0x288] sm:$0xff] %v270_v17 }
  0x52   :  { %279 = vsyncadd [#allocation6], 10496  ;;  %v325_v18 = vld [vmem:[%s7212_s15] sm:$0xff]  ;;  %v327_v19 = vld [vmem:[%s7212_s15 + $0x8] sm:$0xff]  ;;  %s5598_s7 = smov [#allocation3]   ;;  %s5560_s18 = scalar_lea.hbm %s7211_s14, 4096 }
  0x53   :  { %s288_s25 = sshll.u32 %s5598_s7, 4  ;;  %326 = vst [vmem:[#allocation4] sm:$0xff] %v325_v18  ;;  %328 = vst [vmem:[#allocation4 + $0x8] sm:$0xff] %v327_v19  ;;  %v329_v20 = vld [vmem:[%s7212_s15 + $0x10] sm:$0xff]  ;;  %v331_v21 = vld [vmem:[%s7212_s15 + $0x18] sm:$0xff]  ;;  %p5561_p2 = scmp.ne.s32.totalorder %s7211_s14, %s5560_s18  ;;  %s289_s25 = int_to_ptr.vmem [resolvable:$true] %s288_s25 }
  0x54   :  { %v333_v22 = vld [vmem:[%s7212_s15 + $0x20] sm:$0xff]  ;;  %330 = vst [vmem:[#allocation4 + $0x10] sm:$0xff] %v329_v20  ;;  %332 = vst [vmem:[#allocation4 + $0x18] sm:$0xff] %v331_v21  ;;  %v335_v23 = vld [vmem:[%s7212_s15 + $0x28] sm:$0xff]  ;;  %p5564_p3 = scmp.lt.u32.totalorder %s5560_s18, %s7211_s14 }
  0x55   :  { %334 = vst [vmem:[#allocation4 + $0x20] sm:$0xff] %v333_v22  ;;  %v337_v24 = vld [vmem:[%s7212_s15 + $0x30] sm:$0xff]  ;;  %v339_v25 = vld [vmem:[%s7212_s15 + $0x38] sm:$0xff] }
  0x56   :  { %p5566_p4 = pnand %p5564_p3, %p5561_p2 }
  0x58   :  { %5569 = shalt.err (!%p5566_p4)  }
  0x59   :  { %s5570_s23 = scalar_lea.vmem %s289_s25, 4096  ;;  %p5575_p6 = scmp.lt.s32.totalorder %s289_s25, %s289_s25 }
  0x5a   :  { %p5571_p5 = scmp.ne.s32.totalorder %s289_s25, %s5570_s23  ;;  %p5576_p7 = scmp.lt.s32.totalorder %s5570_s23, %s5570_s23 }
  0x5c   :  { %p5577_p8 = por %p5576_p7, %p5575_p6 }
  0x5e   :  { %p5578_p9 = pnand %p5577_p8, %p5571_p5 }
  0x60   :  { %5581 = shalt.err (!%p5578_p9)  }
  0x61   :  { %291 = dma.hbm_to_vmem [thread:$0]  %s7211_s14, 4096, %s289_s25, [#allocation6 + $0x1]  ;;  %336 = vst [vmem:[#allocation4 + $0x28] sm:$0xff] %v335_v23  ;;  %338 = vst [vmem:[#allocation4 + $0x30] sm:$0xff] %v337_v24  ;;  %v341_v26 = vld [vmem:[%s7212_s15 + $0x40] sm:$0xff]  ;;  %v343_v27 = vld [vmem:[%s7212_s15 + $0x48] sm:$0xff] }
  0x62   :  { %340 = vst [vmem:[#allocation4 + $0x38] sm:$0xff] %v339_v25  ;;  %v345_v28 = vld [vmem:[%s7212_s15 + $0x50] sm:$0xff]  ;;  %342 = vst [vmem:[#allocation4 + $0x40] sm:$0xff] %v341_v26  ;;  %v347_v29 = vld [vmem:[%s7212_s15 + $0x58] sm:$0xff] }
  0x63   :  { %344 = vst [vmem:[#allocation4 + $0x48] sm:$0xff] %v343_v27  ;;  %346 = vst [vmem:[#allocation4 + $0x50] sm:$0xff] %v345_v28  ;;  %v349_v30 = vld [vmem:[%s7212_s15 + $0x60] sm:$0xff]  ;;  %v351_v31 = vld [vmem:[%s7212_s15 + $0x68] sm:$0xff] }
  0x64   :  { %348 = vst [vmem:[#allocation4 + $0x58] sm:$0xff] %v347_v29  ;;  %350 = vst [vmem:[#allocation4 + $0x60] sm:$0xff] %v349_v30 }
  0x65   :  { %352 = vst [vmem:[#allocation4 + $0x68] sm:$0xff] %v351_v31 }
  0x66   :  { %360 = vsyncadd [#allocation6 + $0x2], 1792  ;;  %v394_v32 = vld [vmem:[%s7213_s16] sm:$0xff]  ;;  %v396_v33 = vld [vmem:[%s7213_s16 + $0x8] sm:$0xff]  ;;  %s7262_s30 = sld [smem:[#allocation57_spill]]  ;;  %vm434_vm0 = vcmask 1043456  }
  0x67   :  { %395 = vst [vmem:[#allocation5] sm:$0xff] %v394_v32  ;;  %397 = vst [vmem:[#allocation5 + $0x8] sm:$0xff] %v396_v33  ;;  %v398_v34 = vld [vmem:[%s7213_s16 + $0x10] sm:$0xff]  ;;  %v400_v35 = vld [vmem:[%s7213_s16 + $0x18] sm:$0xff]  ;;  %s7263_s7 = sld [smem:[#allocation58_spill]]  ;;  %vm427_vm1 = vcmask 31744  }
  0x68   :  { %v402_v36 = vld [vmem:[%s7213_s16 + $0x20] sm:$0xff]  ;;  %399 = vst [vmem:[#allocation5 + $0x10] sm:$0xff] %v398_v34  ;;  %401 = vst [vmem:[#allocation5 + $0x18] sm:$0xff] %v400_v35  ;;  %v404_v37 = vld [vmem:[%s7213_s16 + $0x28] sm:$0xff] }
  0x69   :  { %403 = vst [vmem:[#allocation5 + $0x20] sm:$0xff] %v402_v36  ;;  %v406_v38 = vld [vmem:[%s7213_s16 + $0x30] sm:$0xff]  ;;  %v408_v39 = vld [vmem:[%s7213_s16 + $0x38] sm:$0xff]  ;;  %405 = vst [vmem:[#allocation5 + $0x28] sm:$0xff] %v404_v37 }
  0x6a   :  { %407 = vst [vmem:[#allocation5 + $0x30] sm:$0xff] %v406_v38  ;;  %409 = vst [vmem:[#allocation5 + $0x38] sm:$0xff] %v408_v39 }
  0x6c   :  { %v419_v40 = vld [vmem:[%s7262_s30 + $0x8] sm:$0xf]  ;;  %v418_v42 = vld [vmem:[%s7262_s30] sm:$0xff] }
  0x6d   :  { %v422_v41 = vld [vmem:[%s7263_s7] sm:$0xff]  ;;  %4332 = vmatprep.subr.msk.mxu1 %vm434_vm0, %v419_v40 }
  0x6e   :  { %4334 = vmatprep.mubr.msk.f32.mxu1 %vm427_vm1, %v422_v41 }
  0x6f   :  { %417 = vsyncadd [#allocation6 + $0x3], 1024  ;;  %v426_v43 = vcombine.high %v418_v42, %v418_v42  ;;  %v423_v44 = vld [vmem:[%s7263_s7 + $0x8] sm:$0xff]  ;;  %4333 = vmatpush3.msk.msra.mxu1 %vm434_vm0, %v419_v40  ;;  %v7219_v47 = vmov 0.0   ;;  %v421_v48 = vld [vmem:[%s7262_s30 + $0x14] sm:$0xf] }
  0x70   :  { %v420_v45 = vld [vmem:[%s7262_s30 + $0xc] sm:$0xff]  ;;  %505 = vmatprep.mubr.f32.mxu0 %v7219_v47  ;;  %4335 = vmatmul.mubr.msk.f32.vlgmr.msra.gmra.mrb[0].mxu1 %vm427_vm1, %v423_v44  ;;  %vm755_vm2 = vcmask 556032   ;;  %v7217_v33 = vmov 0  }
  0x71   :  { %v595_v46 = vcombine.high %v420_v45, %v420_v45  ;;  %4168 = vmatprep.subr.msk.mxu0 %vm434_vm0, %v426_v43  ;;  %666 = vmatprep.mubr.f32.mxu1 %v7219_v47 }
  0x72   :  { %4169 = vmatpush1.msk.msra.mxu0 %vm434_vm0, %v418_v42  ;;  %5284 = vset.pattern.permute.xlu0 %v7217_v33 }
  0x73   :  { %4175 = vmatprep.subr.msk.mxu1 %vm434_vm0, %v595_v46  ;;  %4170 = vmatmul.mubr.msk.f32.vlgmr.msra.gmra.mrb[0].mxu0 %vm427_vm1, %v422_v41 }
  0x74   :  { %4176 = vmatpush1.msk.msra.mxu1 %vm434_vm0, %v420_v45  ;;  %4337 = vmatprep.subr.msk.mxu0 %vm434_vm0, %v421_v48 }
  0x75   :  { %4338 = vmatpush3.msk.msra.mxu0 %vm434_vm0, %v421_v48  ;;  %4177 = vmatmul.mubr.msk.f32.vlgmr.msra.gmra.mrb[2].mxu1 %vm427_vm1, %v422_v41 }
  0x76   :  { %511 = vmatprep.mubr.f32.mxu0 %v7219_v47  ;;  %672 = vmatprep.mubr.f32.mxu1 %v7219_v47 }
  0x77   :  { %4171 = vmatmul.mubr.msk.f32.gmra.mrb[2].mxu0 %vm427_vm1, %v423_v44  ;;  %5285 = vset.pattern.permute.xlu1 %v7217_v33 }
  0x78   :  { %4339 = vmatprep.mubr.msk.f32.mxu0 %vm427_vm1, %v422_v41 }
  0x79   :  { %4178 = vmatmul.mubr.msk.f32.gmra.mrb[4].mxu1 %vm427_vm1, %v423_v44 }
  0x7b   :  { %4340 = vmatmul.mubr.msk.f32.vlgmr.msra.gmra.mrb[4].mxu0 %vm427_vm1, %v423_v44 }
 0x143   :  { %v6078_v49 = vpop.f32.mrb[0].mxu1 }
 0x144   :  { %v6080_v50 = vpop.f32.mrb[1].mxu1  ;;  %v782_v2 = vmul.f32 %v6078_v49, %v6078_v49  ;;  %v761_v13 = vsel %vm755_vm2, %v6078_v49, 0.0 }
 0x145   :  { %v779_v52 = vmul.f32 %v6080_v50, %v6080_v50  ;;  %v756_v60 = vsel %vm755_vm2, %v6080_v50, 0.0 }
 0x146   :  { %v6082_v51 = vpop.f32.mrb[0].mxu0  ;;  %v795_v22 = vsel %vm755_vm2, %v782_v2, 0.0  ;;  %v820_v2 = vld [vmem:[%s7199_s2 + $0x8] sm:$0xff] }
 0x147   :  { %v777_v53 = vmul.f32 %v6082_v51, %v6082_v51  ;;  %v6088_v54 = vpop.f32.mrb[1].mxu0  ;;  %v790_v5 = vsel %vm755_vm2, %v779_v52, 0.0 }
 0x148   :  { %v778_v55 = vmul.f32 %v6088_v54, %v6088_v54  ;;  %v6092_v56 = vpop.f32.mrb[2].mxu1  ;;  %v754_v57 = vadd.f32 %v6088_v54, %v6082_v51 }
 0x149   :  { %v783_v58 = vmul.f32 %v6092_v56, %v6092_v56  ;;  %v6098_v59 = vpop.f32.mrb[3].mxu1 }
 0x14a   :  { %v784_v61 = vmul.f32 %v6098_v59, %v6098_v59  ;;  %v6104_v62 = vpop.f32.mrb[2].mxu0  ;;  %v757_v63 = vadd.f32 %v756_v60, %v754_v57  ;;  %v789_v0 = vadd.f32 %v778_v55, %v777_v53  ;;  %v765_v1 = vadd.f32 %v6098_v59, %v6092_v56 }
 0x14b   :  { %v780_v3 = vmul.f32 %v6104_v62, %v6104_v62  ;;  %v6112_v4 = vpop.f32.mrb[3].mxu0 }
 0x14c   :  { %v781_v6 = vmul.f32 %v6112_v4, %v6112_v4  ;;  %v6117_v7 = vpop.f32.mrb[4].mxu1  ;;  %758 = vadd.xlane.f32.xlu0 %v757_v63  ;;  %v791_v8 = vadd.f32 %v790_v5, %v789_v0  ;;  %v760_v9 = vadd.f32 %v6112_v4, %v6104_v62  ;;  %v799_v10 = vadd.f32 %v784_v61, %v783_v58  ;;  %v819_v0 = vld [vmem:[%s7199_s2] sm:$0xff] }
 0x14d   :  { %v786_v11 = vmul.f32 %v6117_v7, %v6117_v7  ;;  %v6123_v12 = vpop.f32.mrb[5].mxu1 }
 0x14e   :  { %v770_v14 = vadd.f32 %v6123_v12, %v6117_v7  ;;  %v787_v15 = vmul.f32 %v6123_v12, %v6123_v12  ;;  %v6131_v16 = vpop.f32.mrb[4].mxu0  ;;  %v762_v17 = vadd.f32 %v761_v13, %v760_v9  ;;  %v794_v18 = vadd.f32 %v781_v6, %v780_v3  ;;  %v827_v9 = vld [vmem:[%s7200_s3] sm:$0xff]  ;;  %v828_v13 = vld [vmem:[%s7200_s3 + $0x8] sm:$0xff] }
 0x14f   :  { %v788_v19 = vmul.f32 %v6131_v16, %v6131_v16  ;;  %v6135_v20 = vpop.f32.mrb[5].mxu0  ;;  %v771_v21 = vsel %vm755_vm2, %v6131_v16, 0.0 }
 0x150   :  { %v766_v23 = vsel %vm755_vm2, %v6135_v20, 0.0  ;;  %v785_v24 = vmul.f32 %v6135_v20, %v6135_v20  ;;  %792 = vadd.xlane.f32.xlu0 %v791_v8  ;;  %v772_v25 = vadd.f32 %v771_v21, %v770_v14  ;;  %v796_v26 = vadd.f32 %v795_v22, %v794_v18 }
 0x151   :  { %v767_v27 = vadd.f32 %v766_v23, %v765_v1  ;;  %v804_v28 = vadd.f32 %v787_v15, %v786_v11  ;;  %v805_v29 = vsel %vm755_vm2, %v788_v19, 0.0 }
 0x152   :  { %773 = vadd.xlane.f32.xlu1 %v772_v25  ;;  %v800_v30 = vsel %vm755_vm2, %v785_v24, 0.0 }
 0x153   :  { %v801_v31 = vadd.f32 %v800_v30, %v799_v10  ;;  %v806_v32 = vadd.f32 %v805_v29, %v804_v28 }
 0x154   :  { %763 = vadd.xlane.f32.xlu0 %v762_v17 }
 0x156   :  { %797 = vadd.xlane.f32.xlu1 %v796_v26 }
 0x158   :  { %802 = vadd.xlane.f32.xlu0 %v801_v31 }
 0x15a   :  { %768 = vadd.xlane.f32.xlu1 %v767_v27 }
 0x15e   :  { %807 = vadd.xlane.f32.xlu1 %v806_v32 }
 0x1d9   :  { %v759_v34 = vpop.xlane.xlu0 %758 }
 0x1dd   :  { %v793_v35 = vpop.xlane.xlu0 %792 }
 0x1df   :  { %v774_v36 = vpop.xlane.xlu1 %773 }
 0x1e1   :  { %v764_v37 = vpop.xlane.xlu0 %763 }
 0x1e2   :  { %v776_v40 = vadd.f32 %v774_v36, %v764_v37 }
 0x1e3   :  { %v798_v38 = vpop.xlane.xlu1 %797 }
 0x1e4   :  { %v812_v44 = vmul.f32 0.0015432099, %v776_v40 }
 0x1e5   :  { %v803_v39 = vpop.xlane.xlu0 %802 }
 0x1e6   :  { %v809_v42 = vadd.f32 %v803_v39, %v793_v35  ;;  %v816_v55 = vmul.f32 %v812_v44, %v812_v44 }
 0x1e7   :  { %v769_v41 = vpop.xlane.xlu1 %768 }
 0x1e8   :  { %v775_v43 = vadd.f32 %v769_v41, %v759_v34  ;;  %v813_v48 = vmul.f32 0.0015432099, %v809_v42 }
 0x1ea   :  { %v811_v45 = vmul.f32 0.0015432099, %v775_v43 }
 0x1eb   :  { %v808_v46 = vpop.xlane.xlu1 %807 }
 0x1ec   :  { %v815_v52 = vmul.f32 %v811_v45, %v811_v45  ;;  %v810_v53 = vadd.f32 %v808_v46, %v798_v38 }
 0x1ee   :  { %v817_v57 = vsub.f32 %v813_v48, %v815_v52  ;;  %v814_v58 = vmul.f32 0.0015432099, %v810_v53 }
 0x1f0   :  { %v821_v60 = vadd.f32 1e-05, %v817_v57  ;;  %v818_v61 = vsub.f32 %v814_v58, %v816_v55 }
 0x1f2   :  { %5288 = vrsqrt.f32 %v821_v60  ;;  %v822_v63 = vadd.f32 1e-05, %v818_v61 }
 0x1f4   :  { %5290 = vrsqrt.f32 %v822_v63 }
 0x1fc   :  { %v5289_v1 = vpop.eup %5288 }
 0x1fd   :  { %v825_v3 = vmul.f32 %v5289_v1, %v819_v0 }
 0x1fe   :  { %v5291_v5 = vpop.eup %5290 }
 0x1ff   :  { %v829_v6 = vmul.f32 %v825_v3, %v811_v45  ;;  %835 = vperm.xlu0 %5284, %v825_v3   ;;  %v826_v8 = vmul.f32 %v5291_v5, %v820_v2 }
 0x201   :  { %840 = vperm.xlu1 %5285, %v826_v8   ;;  %v831_v10 = vsub.f32 %v827_v9, %v829_v6  ;;  %v830_v11 = vmul.f32 %v826_v8, %v812_v44 }
 0x203   :  { %v832_v14 = vsub.f32 %v828_v13, %v830_v11 }
 0x205   :  { %857 = vperm.xlu1 %5285, %v831_v10  }
 0x209   :  { %862 = vperm.xlu1 %5285, %v832_v14  }
 0x27e   :  { %v836_v15 = vpop.permute.xlu0 %835 }
 0x27f   :  { %v843_v18 = vmul.f32 %v836_v15, %v6082_v51  ;;  %v844_v19 = vmul.f32 %v836_v15, %v6088_v54  ;;  %v845_v21 = vmul.f32 %v836_v15, %v6080_v50  ;;  %v849_v22 = vmul.f32 %v836_v15, %v6092_v56 }
 0x280   :  { %v841_v17 = vpop.permute.xlu1 %840  ;;  %v850_v23 = vmul.f32 %v836_v15, %v6098_v59  ;;  %v851_v24 = vmul.f32 %v836_v15, %v6135_v20 }
 0x281   :  { %v846_v26 = vmul.f32 %v841_v17, %v6104_v62  ;;  %v847_v27 = vmul.f32 %v841_v17, %v6112_v4  ;;  %v848_v56 = vmul.f32 %v6078_v49, %v841_v17  ;;  %v852_v59 = vmul.f32 %v841_v17, %v6117_v7 }
 0x282   :  { %v853_v35 = vmul.f32 %v841_v17, %v6123_v12  ;;  %v854_v36 = vmul.f32 %v6131_v16, %v841_v17 }
 0x284   :  { %v858_v25 = vpop.permute.xlu1 %857 }
 0x285   :  { %v6168_v28 = vadd.f32 %v858_v25, %v843_v18  ;;  %v866_v29 = vadd.f32 %v858_v25, %v844_v19  ;;  %v6170_v30 = vadd.f32 %v858_v25, %v845_v21  ;;  %v6172_v51 = vadd.f32 %v858_v25, %v849_v22 }
 0x286   :  { %v6174_v54 = vadd.f32 %v858_v25, %v850_v23  ;;  %v6176_v50 = vadd.f32 %v858_v25, %v851_v24 }
 0x287   :  { %7264 = vst [vmem:[#allocation24_spill] sm:$0xff] %v6172_v51  ;;  %v878_v62 = vmax.f32 %v866_v29, 0.0 }
 0x288   :  { %7265 = vst [vmem:[#allocation25_spill] sm:$0xff] %v6176_v50  ;;  %v863_v37 = vpop.permute.xlu1 %862 }
 0x289   :  { %v6187_v38 = vadd.f32 %v863_v37, %v846_v26  ;;  %v6189_v49 = vadd.f32 %v863_v37, %v847_v27  ;;  %v6191_v7 = vadd.f32 %v863_v37, %v848_v56  ;;  %v6193_v39 = vadd.f32 %v863_v37, %v852_v59 }
 0x28a   :  { %v6195_v40 = vadd.f32 %v863_v37, %v853_v35  ;;  %v6197_v41 = vadd.f32 %v863_v37, %v854_v36 }
 0x28b   :  { %7266 = vst [vmem:[#allocation26_spill] sm:$0xff] %v6193_v39 }
 0x28c   :  { %7267 = vst [vmem:[#allocation27_spill] sm:$0xff] %v6195_v40  ;;  %7268 = vst [vmem:[#allocation28_spill] sm:$0xff] %v6197_v41 }
 0x28d   :  { %5586 = dma.done.wait [#allocation6], 10496 }
 0x28e   :  { %5587 = vsyncadd [#allocation6], 4294956800  ;;  %1221 = vmatprep.mubr.f32.mxu1 %v878_v62  ;;  %1375 = vmatprep.mubr.f32.mxu0 %v878_v62  ;;  %v6207_v46 = vld [vmem:[#allocation2 + $0x4] ss:$16 sps:$4 sm:$0xff]   ;;  %v6209_v48 = vld [vmem:[#allocation2 + $0xc] ss:$16 sps:$4 sm:$0xff]  }
 0x28f   :  { %5293 = vset.pattern.permute.xlu1 %v7217_v33  ;;  %5292 = vset.pattern.permute.xlu0 %v7217_v33  ;;  %v6212_v52 = vld [vmem:[#allocation2] ss:$16 sps:$4 sm:$0xff]   ;;  %v6214_v53 = vld [vmem:[#allocation2 + $0x8] ss:$16 sps:$4 sm:$0xff]   ;;  %v6217_v55 = vld [vmem:[#allocation2 + $0x24] ss:$16 sps:$4 sm:$0xff]  }
 0x290   :  { %4413 = vmatprep.subr.bf16.mxu1 %v6207_v46  ;;  %4493 = vmatprep.subr.bf16.mxu0 %v6209_v48  ;;  %v6221_v57 = vld [vmem:[#allocation2 + $0x2c] ss:$16 sps:$4 sm:$0xff]   ;;  %v6223_v58 = vld [vmem:[#allocation2 + $0x20] ss:$16 sps:$4 sm:$0xff]   ;;  %v6226_v60 = vld [vmem:[#allocation2 + $0x28] ss:$16 sps:$4 sm:$0xff]  }
 0x291   :  { %4415 = vmatpush1.bf16.msra.mxu1 %v6212_v52  ;;  %4495 = vmatpush1.bf16.msra.mxu0 %v6214_v53  ;;  %v6229_v61 = vld [vmem:[#allocation2 + $0x44] ss:$16 sps:$4 sm:$0xff]   ;;  %v6231_v63 = vld [vmem:[#allocation2 + $0x4c] ss:$16 sps:$4 sm:$0xff]   ;;  %v6233_v0 = vld [vmem:[#allocation2 + $0x40] ss:$16 sps:$4 sm:$0xff]  }
 0x292   :  { %4417 = vmatprep.subr.bf16.mxu1 %v6217_v55  ;;  %4497 = vmatprep.subr.bf16.mxu0 %v6221_v57  ;;  %v6235_v1 = vld [vmem:[#allocation2 + $0x48] ss:$16 sps:$4 sm:$0xff]   ;;  %v6239_v2 = vld [vmem:[#allocation2 + $0x64] ss:$16 sps:$4 sm:$0xff]   ;;  %v6243_v3 = vld [vmem:[#allocation2 + $0x6c] ss:$16 sps:$4 sm:$0xff]  }
 0x293   :  { %v6245_v5 = vld [vmem:[#allocation2 + $0x60] ss:$16 sps:$4 sm:$0xff]   ;;  %v6249_v6 = vld [vmem:[#allocation2 + $0x68] ss:$16 sps:$4 sm:$0xff]   ;;  %v6251_v8 = vld [vmem:[#allocation2 + $0x84] ss:$16 sps:$4 sm:$0xff]  }
 0x294   :  { %v6255_v9 = vld [vmem:[#allocation2 + $0x8c] ss:$16 sps:$4 sm:$0xff]   ;;  %v6257_v10 = vld [vmem:[#allocation2 + $0x80] ss:$16 sps:$4 sm:$0xff]   ;;  %v6259_v11 = vld [vmem:[#allocation2 + $0x88] ss:$16 sps:$4 sm:$0xff]  }
 0x295   :  { %4419 = vmatpush1.bf16.msra.mxu1 %v6223_v58  ;;  %4499 = vmatpush1.bf16.msra.mxu0 %v6226_v60  ;;  %v6263_v13 = vld [vmem:[#allocation2 + $0xa4] ss:$16 sps:$4 sm:$0xff]   ;;  %v6267_v14 = vld [vmem:[#allocation2 + $0xac] ss:$16 sps:$4 sm:$0xff]   ;;  %v6269_v15 = vld [vmem:[#allocation2 + $0xa0] ss:$16 sps:$4 sm:$0xff]  }
 0x296   :  { %4421 = vmatprep.subr.bf16.mxu1 %v6229_v61  ;;  %4501 = vmatprep.subr.bf16.mxu0 %v6231_v63  ;;  %v6273_v17 = vld [vmem:[#allocation2 + $0xa8] ss:$16 sps:$4 sm:$0xff]   ;;  %v6275_v18 = vld [vmem:[#allocation2 + $0xc4] ss:$16 sps:$4 sm:$0xff]   ;;  %v6279_v19 = vld [vmem:[#allocation2 + $0xcc] ss:$16 sps:$4 sm:$0xff]  }
 0x297   :  { %v6281_v21 = vld [vmem:[#allocation2 + $0xc0] ss:$16 sps:$4 sm:$0xff]   ;;  %v6283_v22 = vld [vmem:[#allocation2 + $0xc8] ss:$16 sps:$4 sm:$0xff]   ;;  %v6287_v23 = vld [vmem:[#allocation2 + $0xe4] ss:$16 sps:$4 sm:$0xff]  }
 0x298   :  { %v6291_v24 = vld [vmem:[#allocation2 + $0xec] ss:$16 sps:$4 sm:$0xff]   ;;  %v6293_v25 = vld [vmem:[#allocation2 + $0xe0] ss:$16 sps:$4 sm:$0xff]   ;;  %v6297_v26 = vld [vmem:[#allocation2 + $0xe8] ss:$16 sps:$4 sm:$0xff]  }
 0x299   :  { %4423 = vmatpush1.bf16.msra.mxu1 %v6233_v0  ;;  %4503 = vmatpush1.bf16.msra.mxu0 %v6235_v1  ;;  %v6299_v27 = vld [vmem:[#allocation2 + $0x104] ss:$16 sps:$4 sm:$0xff]   ;;  %v6303_v29 = vld [vmem:[#allocation2 + $0x10c] ss:$16 sps:$4 sm:$0xff]   ;;  %v6305_v56 = vld [vmem:[#allocation2 + $0x100] ss:$16 sps:$4 sm:$0xff]  }
 0x29a   :  { %4425 = vmatprep.subr.bf16.mxu1 %v6239_v2  ;;  %4505 = vmatprep.subr.bf16.mxu0 %v6243_v3  ;;  %v6307_v59 = vld [vmem:[#allocation2 + $0x108] ss:$16 sps:$4 sm:$0xff]   ;;  %v6311_v62 = vld [vmem:[#allocation2 + $0x124] ss:$16 sps:$4 sm:$0xff]   ;;  %v6315_v35 = vld [vmem:[#allocation2 + $0x12c] ss:$16 sps:$4 sm:$0xff]  }
 0x29b   :  { %v6317_v36 = vld [vmem:[#allocation2 + $0x120] ss:$16 sps:$4 sm:$0xff]   ;;  %v6321_v37 = vld [vmem:[#allocation2 + $0x128] ss:$16 sps:$4 sm:$0xff]   ;;  %v6323_v33 = vld [vmem:[#allocation2 + $0x144] ss:$16 sps:$4 sm:$0xff]  }
 0x29c   :  { %v6327_v45 = vld [vmem:[#allocation2 + $0x14c] ss:$16 sps:$4 sm:$0xff]   ;;  %v6329_v34 = vld [vmem:[#allocation2 + $0x140] ss:$16 sps:$4 sm:$0xff]   ;;  %v6331_v16 = vld [vmem:[#allocation2 + $0x148] ss:$16 sps:$4 sm:$0xff]  }
 0x29d   :  { %4427 = vmatpush1.bf16.msra.mxu1 %v6245_v5  ;;  %4507 = vmatpush1.bf16.msra.mxu0 %v6249_v6  ;;  %v6335_v44 = vld [vmem:[#allocation2 + $0x164] ss:$16 sps:$4 sm:$0xff]   ;;  %v6339_v31 = vld [vmem:[#allocation2 + $0x16c] ss:$16 sps:$4 sm:$0xff]   ;;  %v6341_v32 = vld [vmem:[#allocation2 + $0x160] ss:$16 sps:$4 sm:$0xff]  }
 0x29e   :  { %4429 = vmatprep.subr.bf16.mxu1 %v6251_v8  ;;  %4509 = vmatprep.subr.bf16.mxu0 %v6255_v9  ;;  %v6343_v12 = vld [vmem:[#allocation2 + $0x168] ss:$16 sps:$4 sm:$0xff]   ;;  %v6347_v4 = vld [vmem:[#allocation2 + $0x184] ss:$16 sps:$4 sm:$0xff]   ;;  %v6351_v47 = vld [vmem:[#allocation2 + $0x18c] ss:$16 sps:$4 sm:$0xff]  }
 0x29f   :  { %7269 = vst [vmem:[#allocation29_spill] sm:$0xff] %v6347_v4  ;;  %7270 = vst [vmem:[#allocation30_spill] sm:$0xff] %v6351_v47  ;;  %v6353_v42 = vld [vmem:[#allocation2 + $0x180] ss:$16 sps:$4 sm:$0xff]   ;;  %v6355_v43 = vld [vmem:[#allocation2 + $0x188] ss:$16 sps:$4 sm:$0xff]  }
 0x2a0   :  { %7271 = vst [vmem:[#allocation31_spill] sm:$0xff] %v6353_v42  ;;  %7272 = vst [vmem:[#allocation32_spill] sm:$0xff] %v6355_v43  ;;  %v6359_v20 = vld [vmem:[#allocation2 + $0x1a4] ss:$16 sps:$4 sm:$0xff]   ;;  %v6363_v41 = vld [vmem:[#allocation2 + $0x1ac] ss:$16 sps:$4 sm:$0xff]  }
 0x2a1   :  { %4431 = vmatpush1.bf16.msra.mxu1 %v6257_v10  ;;  %4511 = vmatpush1.bf16.msra.mxu0 %v6259_v11  ;;  %7273 = vst [vmem:[#allocation33_spill] sm:$0xff] %v6359_v20  ;;  %7274 = vst [vmem:[#allocation34_spill] sm:$0xff] %v6363_v41  ;;  %v6365_v50 = vld [vmem:[#allocation2 + $0x1a0] ss:$16 sps:$4 sm:$0xff]   ;;  %v6369_v39 = vld [vmem:[#allocation2 + $0x1a8] ss:$16 sps:$4 sm:$0xff]  }
 0x2a2   :  { %4433 = vmatprep.subr.bf16.mxu1 %v6263_v13  ;;  %4513 = vmatprep.subr.bf16.mxu0 %v6267_v14  ;;  %7275 = vst [vmem:[#allocation35_spill] sm:$0xff] %v6365_v50  ;;  %7276 = vst [vmem:[#allocation36_spill] sm:$0xff] %v6369_v39  ;;  %v6373_v40 = vld [vmem:[#allocation2 + $0x1c4] ss:$16 sps:$4 sm:$0xff]   ;;  %v6375_v51 = vld [vmem:[#allocation2 + $0x1cc] ss:$16 sps:$4 sm:$0xff]  }
 0x2a3   :  { %7277 = vst [vmem:[#allocation37_spill] sm:$0xff] %v6373_v40  ;;  %7278 = vst [vmem:[#allocation38_spill] sm:$0xff] %v6375_v51  ;;  %vm1795_vm3 = vcmask 130048   ;;  %vm1978_vm4 = vcmask 990208  }
 0x2a5   :  { %4435 = vmatpush1.bf16.msra.mxu1 %v6269_v15  ;;  %4515 = vmatpush1.bf16.msra.mxu0 %v6273_v17 }
 0x2a6   :  { %4437 = vmatprep.subr.bf16.mxu1 %v6275_v18  ;;  %4517 = vmatprep.subr.bf16.mxu0 %v6279_v19 }
 0x2a9   :  { %4439 = vmatpush1.bf16.msra.mxu1 %v6281_v21  ;;  %4519 = vmatpush1.bf16.msra.mxu0 %v6283_v22 }
 0x2aa   :  { %4441 = vmatprep.subr.bf16.mxu1 %v6287_v23  ;;  %4521 = vmatprep.subr.bf16.mxu0 %v6291_v24 }
 0x2ad   :  { %4443 = vmatpush1.bf16.msra.mxu1 %v6293_v25  ;;  %4523 = vmatpush1.bf16.msra.mxu0 %v6297_v26 }
 0x2ae   :  { %4445 = vmatprep.subr.bf16.mxu1 %v6299_v27  ;;  %4525 = vmatprep.subr.bf16.mxu0 %v6303_v29 }
 0x2b1   :  { %4447 = vmatpush1.bf16.msra.mxu1 %v6305_v56  ;;  %4527 = vmatpush1.bf16.msra.mxu0 %v6307_v59 }
 0x2b2   :  { %4449 = vmatprep.subr.bf16.mxu1 %v6311_v62  ;;  %4529 = vmatprep.subr.bf16.mxu0 %v6315_v35 }
 0x2b5   :  { %4451 = vmatpush1.bf16.msra.mxu1 %v6317_v36  ;;  %4531 = vmatpush1.bf16.msra.mxu0 %v6321_v37 }
 0x2b6   :  { %4453 = vmatprep.subr.bf16.mxu1 %v6323_v33  ;;  %4533 = vmatprep.subr.bf16.mxu0 %v6327_v45 }
 0x2b9   :  { %4455 = vmatpush1.bf16.msra.mxu1 %v6329_v34  ;;  %4535 = vmatpush1.bf16.msra.mxu0 %v6331_v16 }
 0x2ba   :  { %4457 = vmatprep.subr.bf16.mxu1 %v6335_v44  ;;  %4537 = vmatprep.subr.bf16.mxu0 %v6339_v31 }
 0x2bd   :  { %4459 = vmatpush1.bf16.msra.mxu1 %v6341_v32  ;;  %4539 = vmatpush1.bf16.msra.mxu0 %v6343_v12 }
 0x2be   :  { %4461 = vmatprep.subr.bf16.mxu1 %v6347_v4  ;;  %4541 = vmatprep.subr.bf16.mxu0 %v6351_v47  ;;  %v6379_v47 = vld [vmem:[#allocation2 + $0x1c0] ss:$16 sps:$4 sm:$0xff]   ;;  %v6381_v4 = vld [vmem:[#allocation2 + $0x1c8] ss:$16 sps:$4 sm:$0xff]  }
 0x2bf   :  { %7279 = vst [vmem:[#allocation39_spill] sm:$0xff] %v6379_v47  ;;  %7280 = vst [vmem:[#allocation40_spill] sm:$0xff] %v6381_v4 }
 0x2c1   :  { %4463 = vmatpush1.bf16.msra.mxu1 %v6353_v42  ;;  %4543 = vmatpush1.bf16.msra.mxu0 %v6355_v43  ;;  %v6385_v43 = vld [vmem:[#allocation2 + $0x1e4] ss:$16 sps:$4 sm:$0xff]  }
 0x2c2   :  { %4465 = vmatprep.subr.bf16.mxu1 %v6359_v20  ;;  %4545 = vmatprep.subr.bf16.mxu0 %v6363_v41  ;;  %7281 = vst [vmem:[#allocation41_spill] sm:$0xff] %v6385_v43  ;;  %v6387_v20 = vld [vmem:[#allocation2 + $0x1ec] ss:$16 sps:$4 sm:$0xff]   ;;  %v6391_v41 = vld [vmem:[#allocation2 + $0x1e0] ss:$16 sps:$4 sm:$0xff]  }
 0x2c3   :  { %7282 = vst [vmem:[#allocation42_spill] sm:$0xff] %v6387_v20  ;;  %7283 = vst [vmem:[#allocation43_spill] sm:$0xff] %v6391_v41 }
 0x2c5   :  { %4467 = vmatpush1.bf16.msra.mxu1 %v6365_v50  ;;  %4547 = vmatpush1.bf16.msra.mxu0 %v6369_v39  ;;  %v6393_v50 = vld [vmem:[#allocation2 + $0x1e8] ss:$16 sps:$4 sm:$0xff]   ;;  %v6397_v39 = vld [vmem:[#allocation2 + $0x204] ss:$16 sps:$4 sm:$0xff]  }
 0x2c6   :  { %4469 = vmatprep.subr.bf16.mxu1 %v6373_v40  ;;  %4549 = vmatprep.subr.bf16.mxu0 %v6375_v51  ;;  %7284 = vst [vmem:[#allocation44_spill] sm:$0xff] %v6393_v50  ;;  %7285 = vst [vmem:[#allocation45_spill] sm:$0xff] %v6397_v39  ;;  %v6399_v40 = vld [vmem:[#allocation2 + $0x20c] ss:$16 sps:$4 sm:$0xff]   ;;  %v6403_v51 = vld [vmem:[#allocation2 + $0x200] ss:$16 sps:$4 sm:$0xff]  }
 0x2c7   :  { %7286 = vst [vmem:[#allocation46_spill] sm:$0xff] %v6399_v40 }
 0x2c9   :  { %4471 = vmatpush1.bf16.msra.mxu1 %v6379_v47  ;;  %4551 = vmatpush1.bf16.msra.mxu0 %v6381_v4  ;;  %v6405_v47 = vld [vmem:[#allocation2 + $0x208] ss:$16 sps:$4 sm:$0xff]   ;;  %v6409_v4 = vld [vmem:[#allocation2 + $0x224] ss:$16 sps:$4 sm:$0xff]  }
 0x2ca   :  { %4473 = vmatprep.subr.bf16.mxu1 %v6385_v43  ;;  %4553 = vmatprep.subr.bf16.mxu0 %v6387_v20  ;;  %7287 = vst [vmem:[#allocation47_spill] sm:$0xff] %v6405_v47  ;;  %7288 = vst [vmem:[#allocation48_spill] sm:$0xff] %v6409_v4  ;;  %v6411_v43 = vld [vmem:[#allocation2 + $0x22c] ss:$16 sps:$4 sm:$0xff]   ;;  %v7290_v20 = vmax.f32 %v6168_v28, 0.0 }
 0x2cb   :  { %7289 = vst [vmem:[#allocation49_spill] sm:$0xff] %v6411_v43 }
 0x2cc   :  { %v7291_v42 = vmov %v7290_v20 }
 0x2cd   :  { %4475 = vmatpush1.bf16.msra.mxu1 %v6391_v41  ;;  %4555 = vmatpush1.bf16.msra.mxu0 %v6393_v50  ;;  %v6419_v50 = vld [vmem:[#allocation2 + $0x220] ss:$16 sps:$4 sm:$0xff]   ;;  %v6421_v41 = vld [vmem:[#allocation2 + $0x228] ss:$16 sps:$4 sm:$0xff]  }
 0x2ce   :  { %4477 = vmatprep.subr.bf16.mxu1 %v6397_v39  ;;  %4557 = vmatprep.subr.bf16.mxu0 %v6399_v40  ;;  %7292 = vst [vmem:[#allocation50_spill] sm:$0xff] %v6421_v41  ;;  %v6425_v40 = vld [vmem:[#allocation2 + $0x244] ss:$16 sps:$4 sm:$0xff]   ;;  %v6427_v39 = vld [vmem:[#allocation2 + $0x24c] ss:$16 sps:$4 sm:$0xff]  }
 0x2cf   :  { %7293 = vst [vmem:[#allocation51_spill] sm:$0xff] %v6425_v40  ;;  %7294 = vst [vmem:[#allocation52_spill] sm:$0xff] %v6427_v39 }
 0x2d0   :  { %1222 = vmatmul.mubr.f32.vlgmr.msra.gmra.mrb[6].mxu1 %v7290_v20  ;;  %1376 = vmatmul.mubr.f32.vlgmr.msra.gmra.mrb[6].mxu0 %v7291_v42  ;;  %v7295_v20 = vmax.f32 %v6189_v49, 0.0  ;;  %v7297_v42 = vmax.f32 %v6187_v38, 0.0  ;;  %v6445_v49 = vld [vmem:[#allocation2 + $0x264] ss:$16 sps:$4 sm:$0xff]   ;;  %v6451_v38 = vld [vmem:[#allocation2 + $0x288] sm:$0x33] }
 0x2d1   :  { %4479 = vmatpush1.bf16.msra.mxu1 %v6403_v51  ;;  %4559 = vmatpush1.bf16.msra.mxu0 %v6405_v47 }
 0x2d2   :  { %4481 = vmatprep.subr.bf16.mxu1 %v6409_v4  ;;  %4561 = vmatprep.subr.bf16.mxu0 %v6411_v43  ;;  %v7296_v28 = vmov %v7295_v20  ;;  %v7298_v47 = vmov %v7297_v42  ;;  %v6439_v43 = vld [vmem:[#allocation2 + $0x240] ss:$16 sps:$4 sm:$0xff]   ;;  %v6441_v4 = vld [vmem:[#allocation2 + $0x248] ss:$16 sps:$4 sm:$0xff]  }
 0x2d3   :  { %1227 = vmatprep.mubr.f32.mxu1 %v7295_v20  ;;  %1381 = vmatprep.mubr.f32.mxu0 %v7296_v28  ;;  %7299 = vst [vmem:[#allocation53_spill] sm:$0xff] %v6439_v43  ;;  %7300 = vst [vmem:[#allocation54_spill] sm:$0xff] %v6441_v4  ;;  %v6447_v20 = vld [vmem:[#allocation2 + $0x26c] ss:$16 sps:$4 sm:$0xff]   ;;  %v6449_v28 = vld [vmem:[#allocation2 + $0x280] sm:$0x33] }
 0x2d4   :  { %1228 = vmatmul.mubr.f32.gmra.mrb[8].mxu1 %v7297_v42  ;;  %1382 = vmatmul.mubr.f32.gmra.mrb[8].mxu0 %v7298_v47  ;;  %v7301_v47 = vmov 0.0   ;;  %v6457_v42 = vld [vmem:[#allocation2 + $0x260] ss:$16 sps:$4 sm:$0xff]  }
 0x2d5   :  { %4483 = vmatpush1.bf16.msra.mxu1 %v6419_v50  ;;  %4563 = vmatpush1.bf16.msra.mxu0 %v6421_v41  ;;  %7302 = vst [vmem:[#allocation55_spill] sm:$0xff] %v6457_v42  ;;  %v1138_v41 = vunpack.c.h.bf16 %v6451_v38 }
 0x2d6   :  { %4485 = vmatprep.subr.bf16.mxu1 %v6425_v40  ;;  %4565 = vmatprep.subr.bf16.mxu0 %v6427_v39  ;;  %v6459_v40 = vld [vmem:[#allocation2 + $0x268] ss:$16 sps:$4 sm:$0xff]   ;;  %v1136_v39 = vunpack.c.h.bf16 %v6449_v28 }
 0x2d7   :  { %1298 = vmatprep.mubr.f32.mxu1 %v7301_v47  ;;  %1452 = vmatprep.mubr.f32.mxu0 %v7301_v47  ;;  %7303 = vst [vmem:[#allocation56_spill] sm:$0xff] %v6459_v40 }
 0x2d9   :  { %4487 = vmatpush1.bf16.msra.mxu1 %v6439_v43  ;;  %4567 = vmatpush1.bf16.msra.mxu0 %v6441_v4  ;;  %v1135_v43 = vunpack.c.l.bf16 %v6449_v28  ;;  %v7259_v4 = vunpack.c.l.bf16 %v6451_v38 }
 0x2da   :  { %4489 = vmatprep.subr.bf16.mxu1 %v6445_v49  ;;  %4569 = vmatprep.subr.bf16.mxu0 %v6447_v20 }
 0x2dd   :  { %4491 = vmatpush1.bf16.msra.mxu1 %v6457_v42  ;;  %4571 = vmatpush1.bf16.msra.mxu0 %v6459_v40  ;;  %v7304_v40 = vmax.f32 %v6170_v30, 0.0 }
 0x2de   :  { %4182 = vmatprep.subr.msk.mxu1 %vm434_vm0, %v1136_v39  ;;  %4186 = vmatprep.subr.msk.mxu0 %vm434_vm0, %v1138_v41 }
 0x2df   :  { %v7305_v42 = vmov %v7304_v40 }
 0x2e1   :  { %4183 = vmatpush1.msk.msra.mxu1 %vm434_vm0, %v1135_v43  ;;  %4187 = vmatpush1.msk.msra.mxu0 %vm434_vm0, %v7259_v4  ;;  %v7306_v4 = vmax.f32 %v6191_v7, 0.0  ;;  %v7311_v7 = vld [vmem:[#allocation30_spill] sm:$0xff] }
 0x2e2   :  { %4184 = vmatmul.mubr.msk.f32.vlgmr.msra.gmra.mrb[6].mxu1 %vm755_vm2, %v7304_v40  ;;  %4188 = vmatmul.mubr.msk.f32.vlgmr.msra.gmra.mrb[6].mxu0 %vm755_vm2, %v7305_v42  ;;  %v7308_v40 = vmax.f32 %v6174_v54, 0.0  ;;  %v7310_v54 = vld [vmem:[#allocation29_spill] sm:$0xff] }
 0x2e3   :  { %4573 = vmatprep.subr.bf16.mxu1 %v6207_v46  ;;  %4653 = vmatprep.subr.bf16.mxu0 %v6209_v48  ;;  %v7307_v30 = vmov %v7306_v4  ;;  %v7312_v46 = vld [vmem:[#allocation31_spill] sm:$0xff]  ;;  %v7321_v48 = vld [vmem:[#allocation40_spill] sm:$0xff] }
 0x2e4   :  { %4575 = vmatpush1.bf16.msra.mxu1 %v6212_v52  ;;  %4655 = vmatpush1.bf16.msra.mxu0 %v6214_v53  ;;  %v7322_v52 = vld [vmem:[#allocation41_spill] sm:$0xff]  ;;  %v7323_v53 = vld [vmem:[#allocation42_spill] sm:$0xff] }
 0x2e5   :  { %1304 = vmatprep.mubr.f32.mxu1 %v7301_v47  ;;  %1458 = vmatprep.mubr.f32.mxu0 %v7301_v47 }
 0x2e6   :  { %4185 = vmatmul.mubr.msk.f32.gmra.mrb[8].mxu1 %vm755_vm2, %v7306_v4  ;;  %4189 = vmatmul.mubr.msk.f32.gmra.mrb[8].mxu0 %vm755_vm2, %v7307_v30  ;;  %v7309_v4 = vmov %v7308_v40  ;;  %v1792_v30 = vld [vmem:[%s7201_s4 + $0x8] sm:$0xff] }
 0x2e7   :  { %4577 = vmatprep.subr.bf16.mxu1 %v6217_v55  ;;  %4657 = vmatprep.subr.bf16.mxu0 %v6221_v57  ;;  %v7324_v55 = vld [vmem:[#allocation43_spill] sm:$0xff]  ;;  %v7325_v57 = vld [vmem:[#allocation44_spill] sm:$0xff] }
 0x2e8   :  { %4579 = vmatpush1.bf16.msra.mxu1 %v6223_v58  ;;  %4659 = vmatpush1.bf16.msra.mxu0 %v6226_v60  ;;  %v7326_v58 = vld [vmem:[#allocation45_spill] sm:$0xff]  ;;  %v7327_v60 = vld [vmem:[#allocation46_spill] sm:$0xff] }
 0x2e9   :  { %4581 = vmatprep.subr.bf16.mxu1 %v6229_v61  ;;  %4661 = vmatprep.subr.bf16.mxu0 %v6231_v63  ;;  %v7328_v61 = vld [vmem:[#allocation24_spill] sm:$0xff] }
 0x2ea   :  { %1535 = vmatprep.mubr.f32.mxu1 %v7308_v40  ;;  %1689 = vmatprep.mubr.f32.mxu0 %v7309_v4  ;;  %v7329_v63 = vmax.f32 %v7328_v61, 0.0  ;;  %v1793_v40 = vld [vmem:[%s7201_s4 + $0x10] sm:$0xff]  ;;  %v1794_v4 = vld [vmem:[%s7201_s4 + $0x18] sm:$0xff] }
 0x2ec   :  { %4583 = vmatpush1.bf16.msra.mxu1 %v6233_v0  ;;  %4663 = vmatpush1.bf16.msra.mxu0 %v6235_v1  ;;  %v7330_v0 = vmov %v7329_v63  ;;  %v7331_v1 = vld [vmem:[#allocation47_spill] sm:$0xff] }
 0x2ed   :  { %4585 = vmatprep.subr.bf16.mxu1 %v6239_v2  ;;  %4665 = vmatprep.subr.bf16.mxu0 %v6243_v3  ;;  %v7332_v2 = vld [vmem:[#allocation48_spill] sm:$0xff]  ;;  %v7333_v3 = vld [vmem:[#allocation49_spill] sm:$0xff] }
 0x2f0   :  { %4587 = vmatpush1.bf16.msra.mxu1 %v6245_v5  ;;  %4667 = vmatpush1.bf16.msra.mxu0 %v6249_v6  ;;  %v7334_v5 = vld [vmem:[#allocation27_spill] sm:$0xff] }
 0x2f1   :  { %4589 = vmatprep.subr.bf16.mxu1 %v6251_v8  ;;  %4669 = vmatprep.subr.bf16.mxu0 %v6255_v9  ;;  %v7335_v6 = vmax.f32 %v7334_v5, 0.0  ;;  %v7337_v9 = vld [vmem:[#allocation26_spill] sm:$0xff] }
 0x2f3   :  { %v7336_v8 = vmov %v7335_v6 }
 0x2f4   :  { %4591 = vmatpush1.bf16.msra.mxu1 %v6257_v10  ;;  %4671 = vmatpush1.bf16.msra.mxu0 %v6259_v11  ;;  %v7338_v10 = vmax.f32 %v7337_v9, 0.0 }
 0x2f5   :  { %4593 = vmatprep.subr.bf16.mxu1 %v6263_v13  ;;  %4673 = vmatprep.subr.bf16.mxu0 %v6267_v14  ;;  %v7341_v13 = vld [vmem:[#allocation51_spill] sm:$0xff]  ;;  %v7342_v14 = vld [vmem:[#allocation52_spill] sm:$0xff] }
 0x2f6   :  { %v7339_v11 = vmov %v7338_v10 }
 0x2f8   :  { %4595 = vmatpush1.bf16.msra.mxu1 %v6269_v15  ;;  %4675 = vmatpush1.bf16.msra.mxu0 %v6273_v17  ;;  %v7343_v15 = vld [vmem:[#allocation53_spill] sm:$0xff]  ;;  %v7344_v17 = vld [vmem:[#allocation54_spill] sm:$0xff] }
 0x2f9   :  { %4597 = vmatprep.subr.bf16.mxu1 %v6275_v18  ;;  %4677 = vmatprep.subr.bf16.mxu0 %v6279_v19  ;;  %v7345_v18 = vld [vmem:[#allocation55_spill] sm:$0xff]  ;;  %v7347_v19 = vunpack.c.l.bf16 %v6451_v38 }
 0x2fc   :  { %4599 = vmatpush1.bf16.msra.mxu1 %v6281_v21  ;;  %4679 = vmatpush1.bf16.msra.mxu0 %v6283_v22  ;;  %v7348_v21 = vld [vmem:[#allocation25_spill] sm:$0xff] }
 0x2fd   :  { %4601 = vmatprep.subr.bf16.mxu1 %v6287_v23  ;;  %4681 = vmatprep.subr.bf16.mxu0 %v6291_v24  ;;  %v7349_v22 = vmax.f32 %v7348_v21, 0.0  ;;  %v1791_v24 = vld [vmem:[%s7201_s4] sm:$0xff] }
 0x2ff   :  { %v7350_v23 = vmov %v7349_v22 }
 0x300   :  { %4603 = vmatpush1.bf16.msra.mxu1 %v6293_v25  ;;  %4683 = vmatpush1.bf16.msra.mxu0 %v6297_v26 }
 0x301   :  { %4605 = vmatprep.subr.bf16.mxu1 %v6299_v27  ;;  %4685 = vmatprep.subr.bf16.mxu0 %v6303_v29 }
 0x304   :  { %4607 = vmatpush1.bf16.msra.mxu1 %v6305_v56  ;;  %4687 = vmatpush1.bf16.msra.mxu0 %v6307_v59 }
 0x305   :  { %4609 = vmatprep.subr.bf16.mxu1 %v6311_v62  ;;  %4689 = vmatprep.subr.bf16.mxu0 %v6315_v35 }
 0x308   :  { %4611 = vmatpush1.bf16.msra.mxu1 %v6317_v36  ;;  %4691 = vmatpush1.bf16.msra.mxu0 %v6321_v37 }
 0x309   :  { %4613 = vmatprep.subr.bf16.mxu1 %v6323_v33  ;;  %4693 = vmatprep.subr.bf16.mxu0 %v6327_v45  ;;  %v7313_v33 = vld [vmem:[#allocation32_spill] sm:$0xff]  ;;  %v7314_v45 = vld [vmem:[#allocation33_spill] sm:$0xff] }
 0x30c   :  { %4615 = vmatpush1.bf16.msra.mxu1 %v6329_v34  ;;  %4695 = vmatpush1.bf16.msra.mxu0 %v6331_v16  ;;  %v7315_v34 = vld [vmem:[#allocation34_spill] sm:$0xff]  ;;  %v7316_v16 = vld [vmem:[#allocation35_spill] sm:$0xff] }
 0x30d   :  { %4617 = vmatprep.subr.bf16.mxu1 %v6335_v44  ;;  %4697 = vmatprep.subr.bf16.mxu0 %v6339_v31  ;;  %v7317_v44 = vld [vmem:[#allocation36_spill] sm:$0xff]  ;;  %v7318_v31 = vld [vmem:[#allocation37_spill] sm:$0xff] }
 0x310   :  { %4619 = vmatpush1.bf16.msra.mxu1 %v6341_v32  ;;  %4699 = vmatpush1.bf16.msra.mxu0 %v6343_v12  ;;  %v7319_v32 = vld [vmem:[#allocation38_spill] sm:$0xff]  ;;  %v7320_v12 = vld [vmem:[#allocation39_spill] sm:$0xff] }
 0x311   :  { %4621 = vmatprep.subr.bf16.mxu1 %v7310_v54  ;;  %4701 = vmatprep.subr.bf16.mxu0 %v7311_v7 }
 0x314   :  { %4623 = vmatpush1.bf16.msra.mxu1 %v7312_v46  ;;  %4703 = vmatpush1.bf16.msra.mxu0 %v7313_v33 }
 0x315   :  { %4625 = vmatprep.subr.bf16.mxu1 %v7314_v45  ;;  %4705 = vmatprep.subr.bf16.mxu0 %v7315_v34 }
 0x318   :  { %4627 = vmatpush1.bf16.msra.mxu1 %v7316_v16  ;;  %4707 = vmatpush1.bf16.msra.mxu0 %v7317_v44 }
 0x319   :  { %4629 = vmatprep.subr.bf16.mxu1 %v7318_v31  ;;  %4709 = vmatprep.subr.bf16.mxu0 %v7319_v32 }
 0x31c   :  { %4631 = vmatpush1.bf16.msra.mxu1 %v7320_v12  ;;  %4711 = vmatpush1.bf16.msra.mxu0 %v7321_v48 }
 0x31d   :  { %4633 = vmatprep.subr.bf16.mxu1 %v7322_v52  ;;  %4713 = vmatprep.subr.bf16.mxu0 %v7323_v53 }
 0x320   :  { %4635 = vmatpush1.bf16.msra.mxu1 %v7324_v55  ;;  %4715 = vmatpush1.bf16.msra.mxu0 %v7325_v57 }
 0x321   :  { %4637 = vmatprep.subr.bf16.mxu1 %v7326_v58  ;;  %4717 = vmatprep.subr.bf16.mxu0 %v7327_v60 }
 0x323   :  { %1536 = vmatmul.mubr.f32.vlgmr.msra.gmra.mrb[10].mxu1 %v7329_v63  ;;  %1690 = vmatmul.mubr.f32.vlgmr.msra.gmra.mrb[10].mxu0 %v7330_v0 }
 0x324   :  { %4639 = vmatpush1.bf16.msra.mxu1 %v6403_v51  ;;  %4719 = vmatpush1.bf16.msra.mxu0 %v7331_v1  ;;  %v7340_v51 = vld [vmem:[#allocation50_spill] sm:$0xff] }
 0x325   :  { %4641 = vmatprep.subr.bf16.mxu1 %v7332_v2  ;;  %4721 = vmatprep.subr.bf16.mxu0 %v7333_v3 }
 0x326   :  { %1541 = vmatprep.mubr.f32.mxu1 %v7335_v6  ;;  %1695 = vmatprep.mubr.f32.mxu0 %v7336_v8 }
 0x327   :  { %1542 = vmatmul.mubr.f32.gmra.mrb[12].mxu1 %v7338_v10  ;;  %1696 = vmatmul.mubr.f32.gmra.mrb[12].mxu0 %v7339_v11 }
 0x328   :  { %4643 = vmatpush1.bf16.msra.mxu1 %v6419_v50  ;;  %4723 = vmatpush1.bf16.msra.mxu0 %v7340_v51  ;;  %v7346_v50 = vld [vmem:[#allocation56_spill] sm:$0xff] }
 0x329   :  { %4645 = vmatprep.subr.bf16.mxu1 %v7341_v13  ;;  %4725 = vmatprep.subr.bf16.mxu0 %v7342_v14 }
 0x32a   :  { %1612 = vmatprep.mubr.f32.mxu1 %v7301_v47  ;;  %1766 = vmatprep.mubr.f32.mxu0 %v7301_v47 }
 0x32c   :  { %4647 = vmatpush1.bf16.msra.mxu1 %v7343_v15  ;;  %4727 = vmatpush1.bf16.msra.mxu0 %v7344_v17 }
 0x32d   :  { %4649 = vmatprep.subr.bf16.mxu1 %v6445_v49  ;;  %4729 = vmatprep.subr.bf16.mxu0 %v6447_v20 }
 0x330   :  { %4651 = vmatpush1.bf16.msra.mxu1 %v7345_v18  ;;  %4731 = vmatpush1.bf16.msra.mxu0 %v7346_v50 }
 0x331   :  { %4190 = vmatprep.subr.msk.mxu1 %vm434_vm0, %v1136_v39  ;;  %4194 = vmatprep.subr.msk.mxu0 %vm434_vm0, %v1138_v41  ;;  %v7351_v39 = vld [vmem:[#allocation28_spill] sm:$0xff] }
 0x332   :  { %v7352_v41 = vmax.f32 %v7351_v39, 0.0 }
 0x334   :  { %4191 = vmatpush1.msk.msra.mxu1 %vm434_vm0, %v1135_v43  ;;  %4195 = vmatpush1.msk.msra.mxu0 %vm434_vm0, %v7347_v19  ;;  %v7353_v43 = vmov %v7352_v41 }
 0x335   :  { %4192 = vmatmul.mubr.msk.f32.vlgmr.msra.gmra.mrb[10].mxu1 %vm755_vm2, %v7349_v22  ;;  %4196 = vmatmul.mubr.msk.f32.vlgmr.msra.gmra.mrb[10].mxu0 %vm755_vm2, %v7350_v23 }
 0x336   :  { %1618 = vmatprep.mubr.f32.mxu1 %v7301_v47  ;;  %1772 = vmatprep.mubr.f32.mxu0 %v7301_v47 }
 0x339   :  { %4193 = vmatmul.mubr.msk.f32.gmra.mrb[12].mxu1 %vm755_vm2, %v7352_v41  ;;  %4197 = vmatmul.mubr.msk.f32.gmra.mrb[12].mxu0 %vm755_vm2, %v7353_v43 }
 0x33a   :  { %4346 = vmatprep.mubr.msk.f32.mxu1 %vm1795_vm3, %v1791_v24  ;;  %4356 = vmatprep.mubr.msk.f32.mxu0 %vm1795_vm3, %v1791_v24 }
 0x3b5   :  { %v1300_v25 = vpop.f32.mrb[6].mxu1  ;;  %v1454_v26 = vpop.f32.mrb[6].mxu0 }
 0x3b6   :  { %v1302_v27 = vpop.f32.mrb[7].mxu1  ;;  %v1456_v29 = vpop.f32.mrb[7].mxu0 }
 0x3b7   :  { %v1779_v56 = vmax.f32 %v1300_v25, %v1302_v27  ;;  %v1783_v59 = vmax.f32 %v1454_v26, %v1456_v29 }
 0x3b9   :  { %v1787_v62 = vmax.f32 %v1779_v56, %v1783_v59  ;;  %v1306_v35 = vpop.f32.mrb[8].mxu1  ;;  %v1460_v36 = vpop.f32.mrb[8].mxu0 }
 0x3ba   :  { %v1308_v37 = vpop.f32.mrb[9].mxu1  ;;  %v1462_v49 = vpop.f32.mrb[9].mxu0 }
 0x3bb   :  { %v1780_v20 = vmax.f32 %v1306_v35, %v1308_v37  ;;  %v1784_v28 = vmax.f32 %v1460_v36, %v1462_v49 }
 0x3bd   :  { %v1788_v38 = vmax.f32 %v1780_v20, %v1784_v28 }
 0x3bf   :  { %v4732_v42 = vpack.c.bf16 %v1788_v38, %v1787_v62 }
 0x3c1   :  { %4733 = vmatprep.subr.bf16.mxu1 %v4732_v42 }
 0x3c2   :  { %4735 = vmatpush3.bf16.msra.mxu1 %v4732_v42 }
 0x3c5   :  { %4347 = vmatmul.mubr.msk.f32.vlgmr.msra.gmra.mrb[14].mxu1 %vm1795_vm3, %v1792_v30 }
 0x3c6   :  { %4349 = vmatprep.mubr.msk.f32.mxu1 %vm1795_vm3, %v1793_v40 }
 0x3c9   :  { %4350 = vmatmul.mubr.msk.f32.gmra.mrb[16].mxu1 %vm1795_vm3, %v1794_v4 }
 0x408   :  { %v1614_v54 = vpop.f32.mrb[10].mxu1  ;;  %v1768_v7 = vpop.f32.mrb[10].mxu0 }
 0x409   :  { %v1616_v46 = vpop.f32.mrb[11].mxu1  ;;  %v1770_v33 = vpop.f32.mrb[11].mxu0 }
 0x40a   :  { %v1781_v45 = vmax.f32 %v1614_v54, %v1616_v46  ;;  %v1785_v34 = vmax.f32 %v1768_v7, %v1770_v33 }
 0x40c   :  { %v1789_v16 = vmax.f32 %v1781_v45, %v1785_v34  ;;  %v1620_v44 = vpop.f32.mrb[12].mxu1  ;;  %v1774_v31 = vpop.f32.mrb[12].mxu0 }
 0x40d   :  { %v1622_v32 = vpop.f32.mrb[13].mxu1  ;;  %v1776_v12 = vpop.f32.mrb[13].mxu0 }
 0x40e   :  { %v1782_v48 = vmax.f32 %v1620_v44, %v1622_v32  ;;  %v1786_v52 = vmax.f32 %v1774_v31, %v1776_v12 }
 0x410   :  { %v1790_v53 = vmax.f32 %v1782_v48, %v1786_v52 }
 0x412   :  { %v4736_v55 = vpack.c.bf16 %v1790_v53, %v1789_v16 }
 0x414   :  { %4737 = vmatprep.subr.bf16.mxu0 %v4736_v55 }
 0x415   :  { %4739 = vmatpush3.bf16.msra.mxu0 %v4736_v55 }
 0x418   :  { %4357 = vmatmul.mubr.msk.f32.vlgmr.msra.gmra.mrb[14].mxu0 %vm1795_vm3, %v1792_v30 }
 0x419   :  { %4359 = vmatprep.mubr.msk.f32.mxu0 %vm1795_vm3, %v1793_v40 }
 0x41c   :  { %4360 = vmatmul.mubr.msk.f32.gmra.mrb[16].mxu0 %vm1795_vm3, %v1794_v4 }
 0x498   :  { %v6639_v57 = vpop.f32.mrb[14].mxu1 }
 0x499   :  { %v1982_v58 = vsel %vm1978_vm4, %v6639_v57, 0.0  ;;  %v2008_v60 = vmul.f32 %v6639_v57, %v6639_v57  ;;  %v6645_v61 = vpop.f32.mrb[15].mxu1 }
 0x49a   :  { %1983 = vadd.xlane.f32.xlu0 %v1982_v58  ;;  %v1979_v0 = vsel %vm1978_vm4, %v6645_v61, 0.0  ;;  %v2007_v1 = vmul.f32 %v6645_v61, %v6645_v61 }
 0x49b   :  { %v2018_v63 = vsel %vm1978_vm4, %v2008_v60, 0.0 }
 0x49c   :  { %2019 = vadd.xlane.f32.xlu1 %v2018_v63  ;;  %v6652_v2 = vpop.f32.mrb[16].mxu1  ;;  %v2015_v6 = vsel %vm1978_vm4, %v2007_v1, 0.0 }
 0x49d   :  { %v1988_v3 = vsel %vm1978_vm4, %v6652_v2, 0.0  ;;  %v6656_v5 = vpop.f32.mrb[17].mxu1  ;;  %v2010_v10 = vmul.f32 %v6652_v2, %v6652_v2 }
 0x49e   :  { %1980 = vadd.xlane.f32.xlu0 %v1979_v0  ;;  %v2009_v8 = vmul.f32 %v6656_v5, %v6656_v5  ;;  %v1985_v9 = vsel %vm1978_vm4, %v6656_v5, 0.0 }
 0x49f   :  { %v2024_v51 = vsel %vm1978_vm4, %v2010_v10, 0.0 }
 0x4a0   :  { %1989 = vadd.xlane.f32.xlu1 %v1988_v3  ;;  %v2021_v11 = vsel %vm1978_vm4, %v2009_v8, 0.0 }
 0x4a2   :  { %2016 = vadd.xlane.f32.xlu0 %v2015_v6 }
 0x4a4   :  { %1986 = vadd.xlane.f32.xlu1 %v1985_v9 }
 0x4a6   :  { %2022 = vadd.xlane.f32.xlu0 %v2021_v11 }
 0x4a8   :  { %2025 = vadd.xlane.f32.xlu1 %v2024_v51 }
 0x4eb   :  { %v6667_v13 = vpop.f32.mrb[14].mxu0 }
 0x4ec   :  { %v6669_v14 = vpop.f32.mrb[15].mxu0  ;;  %v1994_v15 = vsel %vm1978_vm4, %v6667_v13, 0.0  ;;  %v2012_v17 = vmul.f32 %v6667_v13, %v6667_v13 }
 0x4ed   :  { %1995 = vadd.xlane.f32.xlu1 %v1994_v15  ;;  %v1991_v18 = vsel %vm1978_vm4, %v6669_v14, 0.0  ;;  %v2011_v50 = vmul.f32 %v6669_v14, %v6669_v14  ;;  %v2060_v15 = vld [vmem:[%s7202_s5 + $0x8] sm:$0xff] }
 0x4ee   :  { %1992 = vadd.xlane.f32.xlu0 %v1991_v18  ;;  %v2030_v21 = vsel %vm1978_vm4, %v2012_v17, 0.0  ;;  %v2059_v17 = vld [vmem:[%s7202_s5] sm:$0xff] }
 0x4ef   :  { %v6679_v19 = vpop.f32.mrb[16].mxu0  ;;  %v2027_v23 = vsel %vm1978_vm4, %v2011_v50, 0.0 }
 0x4f0   :  { %v6682_v22 = vpop.f32.mrb[17].mxu0  ;;  %v2000_v39 = vsel %vm1978_vm4, %v6679_v19, 0.0  ;;  %v2014_v43 = vmul.f32 %v6679_v19, %v6679_v19 }
 0x4f1   :  { %2031 = vadd.xlane.f32.xlu1 %v2030_v21  ;;  %v1997_v41 = vsel %vm1978_vm4, %v6682_v22, 0.0  ;;  %v2013_v24 = vmul.f32 %v6682_v22, %v6682_v22 }
 0x4f2   :  { %2028 = vadd.xlane.f32.xlu0 %v2027_v23  ;;  %v2036_v25 = vsel %vm1978_vm4, %v2014_v43, 0.0 }
 0x4f3   :  { %v2033_v26 = vsel %vm1978_vm4, %v2013_v24, 0.0 }
 0x4f5   :  { %2001 = vadd.xlane.f32.xlu1 %v2000_v39 }
 0x4f6   :  { %1998 = vadd.xlane.f32.xlu0 %v1997_v41  ;;  %v2062_v41 = vld [vmem:[%s7202_s5 + $0x18] sm:$0xff] }
 0x4f9   :  { %2037 = vadd.xlane.f32.xlu1 %v2036_v25 }
 0x4fa   :  { %2034 = vadd.xlane.f32.xlu0 %v2033_v26  ;;  %v2076_v26 = vld [vmem:[%s7203_s6 + $0x8] sm:$0xff] }
 0x527   :  { %v1984_v29 = vpop.xlane.xlu0 %1983 }
 0x529   :  { %v2020_v27 = vpop.xlane.xlu1 %2019 }
 0x52b   :  { %v1981_v59 = vpop.xlane.xlu0 %1980 }
 0x52d   :  { %v1990_v56 = vpop.xlane.xlu1 %1989 }
 0x52f   :  { %v2017_v35 = vpop.xlane.xlu0 %2016 }
 0x531   :  { %v1987_v62 = vpop.xlane.xlu1 %1986 }
 0x533   :  { %v2023_v37 = vpop.xlane.xlu0 %2022 }
 0x535   :  { %v2026_v36 = vpop.xlane.xlu1 %2025 }
 0x57a   :  { %v1996_v49 = vpop.xlane.xlu1 %1995 }
 0x57b   :  { %v2004_v20 = vadd.f32 %v1996_v49, %v1984_v29  ;;  %v1993_v28 = vpop.xlane.xlu0 %1992  ;;  %v2077_v49 = vld [vmem:[%s7203_s6 + $0x10] sm:$0xff] }
 0x57c   :  { %v2003_v38 = vadd.f32 %v1993_v28, %v1981_v59 }
 0x57d   :  { %v2044_v42 = vmul.f32 0.004132231, %v2004_v20 }
 0x57e   :  { %v2043_v30 = vmul.f32 0.004132231, %v2003_v38  ;;  %v2032_v40 = vpop.xlane.xlu1 %2031  ;;  %v2078_v38 = vld [vmem:[%s7203_s6 + $0x18] sm:$0xff] }
 0x57f   :  { %v2040_v4 = vadd.f32 %v2032_v40, %v2020_v27  ;;  %v2029_v54 = vpop.xlane.xlu0 %2028  ;;  %v2052_v46 = vmul.f32 %v2044_v42, %v2044_v42 }
 0x580   :  { %v2039_v7 = vadd.f32 %v2029_v54, %v2017_v35  ;;  %v2051_v45 = vmul.f32 %v2043_v30, %v2043_v30  ;;  %v2075_v35 = vld [vmem:[%s7203_s6] sm:$0xff] }
 0x581   :  { %v2048_v33 = vmul.f32 0.004132231, %v2040_v4 }
 0x582   :  { %v2047_v34 = vmul.f32 0.004132231, %v2039_v7  ;;  %v2002_v16 = vpop.xlane.xlu1 %2001 }
 0x583   :  { %v2056_v44 = vsub.f32 %v2048_v33, %v2052_v46  ;;  %v2006_v31 = vadd.f32 %v2002_v16, %v1990_v56  ;;  %v1999_v32 = vpop.xlane.xlu0 %1998  ;;  %v2061_v56 = vld [vmem:[%s7202_s5 + $0x10] sm:$0xff] }
 0x584   :  { %v2055_v12 = vsub.f32 %v2047_v34, %v2051_v45  ;;  %v2005_v48 = vadd.f32 %v1999_v32, %v1987_v62 }
 0x585   :  { %v2064_v52 = vadd.f32 1e-05, %v2056_v44  ;;  %v2046_v53 = vmul.f32 0.004132231, %v2006_v31 }
 0x586   :  { %v2063_v55 = vadd.f32 1e-05, %v2055_v12  ;;  %v2038_v58 = vpop.xlane.xlu1 %2037  ;;  %v2045_v60 = vmul.f32 0.004132231, %v2005_v48 }
 0x587   :  { %5414 = vrsqrt.f32 %v2064_v52  ;;  %v2042_v63 = vadd.f32 %v2038_v58, %v2026_v36  ;;  %v2035_v0 = vpop.xlane.xlu0 %2034  ;;  %v2054_v3 = vmul.f32 %v2046_v53, %v2046_v53 }
 0x588   :  { %5416 = vrsqrt.f32 %v2063_v55  ;;  %v2041_v1 = vadd.f32 %v2035_v0, %v2023_v37  ;;  %v2053_v9 = vmul.f32 %v2045_v60, %v2045_v60 }
 0x589   :  { %v2050_v6 = vmul.f32 0.004132231, %v2042_v63 }
 0x58a   :  { %v2049_v8 = vmul.f32 0.004132231, %v2041_v1 }
 0x58b   :  { %v2058_v10 = vsub.f32 %v2050_v6, %v2054_v3 }
 0x58c   :  { %v2057_v51 = vsub.f32 %v2049_v8, %v2053_v9 }
 0x58d   :  { %v2066_v11 = vadd.f32 1e-05, %v2058_v10 }
 0x58e   :  { %v2065_v50 = vadd.f32 1e-05, %v2057_v51 }
 0x58f   :  { %5418 = vrsqrt.f32 %v2066_v11 }
 0x590   :  { %5420 = vrsqrt.f32 %v2065_v50 }
 0x591   :  { %v5415_v18 = vpop.eup %5414 }
 0x592   :  { %v5417_v21 = vpop.eup %5416  ;;  %v2072_v23 = vmul.f32 %v5415_v18, %v2060_v15 }
 0x593   :  { %v2071_v39 = vmul.f32 %v5417_v21, %v2059_v17 }
 0x594   :  { %2094 = vperm.xlu1 %5293, %v2072_v23   ;;  %v2080_v25 = vmul.f32 %v2072_v23, %v2044_v42 }
 0x595   :  { %2089 = vperm.xlu0 %5292, %v2071_v39   ;;  %v2079_v62 = vmul.f32 %v2071_v39, %v2043_v30 }
 0x596   :  { %v2084_v27 = vsub.f32 %v2076_v26, %v2080_v25 }
 0x597   :  { %v2083_v36 = vsub.f32 %v2075_v35, %v2079_v62 }
 0x599   :  { %v5419_v43 = vpop.eup %5418 }
 0x59a   :  { %v2074_v24 = vmul.f32 %v5419_v43, %v2062_v41  ;;  %v5421_v29 = vpop.eup %5420 }
 0x59b   :  { %v2073_v59 = vmul.f32 %v5421_v29, %v2061_v56 }
 0x59c   :  { %2104 = vperm.xlu1 %5293, %v2074_v24   ;;  %v2082_v28 = vmul.f32 %v2074_v24, %v2046_v53 }
 0x59d   :  { %v2081_v37 = vmul.f32 %v2073_v59, %v2045_v60 }
 0x59e   :  { %v2086_v42 = vsub.f32 %v2078_v38, %v2082_v28 }
 0x59f   :  { %v2085_v20 = vsub.f32 %v2077_v49, %v2081_v37 }
 0x5a0   :  { %2122 = vperm.xlu1 %5293, %v2084_v27  }
 0x5a4   :  { %2099 = vperm.xlu1 %5293, %v2073_v59  }
 0x5a8   :  { %2117 = vperm.xlu1 %5293, %v2083_v36  }
 0x5ac   :  { %2127 = vperm.xlu1 %5293, %v2085_v20  }
 0x5b0   :  { %2132 = vperm.xlu1 %5293, %v2086_v42  }
 0x613   :  { %v2095_v30 = vpop.permute.xlu1 %2094 }
 0x614   :  { %v2108_v4 = vmul.f32 %v6639_v57, %v2095_v30  ;;  %v2112_v54 = vmul.f32 %v6667_v13, %v2095_v30  ;;  %v2090_v16 = vpop.permute.xlu0 %2089 }
 0x615   :  { %v2107_v31 = vmul.f32 %v2090_v16, %v6645_v61  ;;  %v2111_v32 = vmul.f32 %v2090_v16, %v6669_v14 }
 0x61b   :  { %v2105_v40 = vpop.permute.xlu1 %2104 }
 0x61c   :  { %v2110_v61 = vmul.f32 %v6652_v2, %v2105_v40  ;;  %v2114_v14 = vmul.f32 %v6679_v19, %v2105_v40 }
 0x61f   :  { %v2123_v7 = vpop.permute.xlu1 %2122 }
 0x620   :  { %v6721_v46 = vadd.f32 %v2123_v7, %v2108_v4  ;;  %v6723_v33 = vadd.f32 %v2123_v7, %v2112_v54 }
 0x622   :  { %v2144_v45 = vmax.f32 %v6721_v46, 0.0  ;;  %v2148_v34 = vmax.f32 %v6723_v33, 0.0 }
 0x623   :  { %v2100_v44 = vpop.permute.xlu1 %2099 }
 0x624   :  { %v2109_v13 = vmul.f32 %v2100_v44, %v6656_v5  ;;  %v2113_v52 = vmul.f32 %v2100_v44, %v6682_v22 }
 0x627   :  { %v2118_v12 = vpop.permute.xlu1 %2117 }
 0x628   :  { %v6729_v48 = vadd.f32 %v2118_v12, %v2107_v31  ;;  %v6731_v57 = vadd.f32 %v2118_v12, %v2111_v32 }
 0x62a   :  { %v2143_v53 = vmax.f32 %v6729_v48, 0.0  ;;  %v2147_v55 = vmax.f32 %v6731_v57, 0.0 }
 0x62b   :  { %v2128_v58 = vpop.permute.xlu1 %2127 }
 0x62c   :  { %v6737_v60 = vadd.f32 %v2128_v58, %v2109_v13  ;;  %v6739_v63 = vadd.f32 %v2128_v58, %v2113_v52 }
 0x62e   :  { %v2145_v0 = vmax.f32 %v6737_v60, 0.0  ;;  %v2149_v1 = vmax.f32 %v6739_v63, 0.0 }
 0x62f   :  { %v2133_v5 = vpop.permute.xlu1 %2132 }
 0x630   :  { %v6745_v3 = vadd.f32 %v2133_v5, %v2110_v61  ;;  %v6747_v22 = vadd.f32 %v2133_v5, %v2114_v14 }
 0x632   :  { %v2146_v6 = vmax.f32 %v6745_v3, 0.0  ;;  %v2150_v8 = vmax.f32 %v6747_v22, 0.0 }
 0x633   :  { %5588 = dma.done.wait [#allocation6 + $0x1], 4096 }
 0x634   :  { %5589 = vsyncadd [#allocation6 + $0x1], 4294963200  ;;  %2340 = vmatprep.mubr.f32.mxu1 %v7301_v47  ;;  %2429 = vmatprep.mubr.f32.mxu0 %v7301_v47  ;;  %v7354_v2 = vmov 0   ;;  %v6755_v19 = vld [vmem:[#allocation3 + $0x4] ss:$16 sps:$4 sm:$0xff]   ;;  %vm2263_vm5 = vcmask 1040384  }
 0x635   :  { %5423 = vset.pattern.permute.xlu1 %v7354_v2  ;;  %5422 = vset.pattern.permute.xlu0 %v7354_v2  ;;  %v6757_v9 = vld [vmem:[#allocation3 + $0xc] ss:$16 sps:$4 sm:$0xff]   ;;  %v6760_v10 = vld [vmem:[#allocation3] ss:$16 sps:$4 sm:$0xff]   ;;  %v6762_v11 = vld [vmem:[#allocation3 + $0x8] ss:$16 sps:$4 sm:$0xff]  }
 0x636   :  { %4741 = vmatprep.subr.bf16.mxu1 %v6755_v19  ;;  %4775 = vmatprep.subr.bf16.mxu0 %v6757_v9  ;;  %v6765_v51 = vld [vmem:[#allocation3 + $0x24] ss:$16 sps:$4 sm:$0xff]   ;;  %v6769_v15 = vld [vmem:[#allocation3 + $0x2c] ss:$16 sps:$4 sm:$0xff]   ;;  %v6771_v17 = vld [vmem:[#allocation3 + $0x20] ss:$16 sps:$4 sm:$0xff]  }
 0x637   :  { %4743 = vmatpush1.bf16.msra.mxu1 %v6760_v10  ;;  %4777 = vmatpush1.bf16.msra.mxu0 %v6762_v11  ;;  %v6774_v18 = vld [vmem:[#allocation3 + $0x28] ss:$16 sps:$4 sm:$0xff]   ;;  %v6777_v50 = vld [vmem:[#allocation3 + $0x44] ss:$16 sps:$4 sm:$0xff]   ;;  %v6779_v21 = vld [vmem:[#allocation3 + $0x4c] ss:$16 sps:$4 sm:$0xff]  }
 0x638   :  { %4745 = vmatprep.subr.bf16.mxu1 %v6765_v51  ;;  %4779 = vmatprep.subr.bf16.mxu0 %v6769_v15  ;;  %v6781_v23 = vld [vmem:[#allocation3 + $0x40] ss:$16 sps:$4 sm:$0xff]   ;;  %v6783_v39 = vld [vmem:[#allocation3 + $0x48] ss:$16 sps:$4 sm:$0xff]   ;;  %v6787_v41 = vld [vmem:[#allocation3 + $0x64] ss:$16 sps:$4 sm:$0xff]  }
 0x639   :  { %v6791_v43 = vld [vmem:[#allocation3 + $0x6c] ss:$16 sps:$4 sm:$0xff]   ;;  %v6793_v24 = vld [vmem:[#allocation3 + $0x60] ss:$16 sps:$4 sm:$0xff]   ;;  %v6797_v25 = vld [vmem:[#allocation3 + $0x68] ss:$16 sps:$4 sm:$0xff]  }
 0x63a   :  { %v6799_v26 = vld [vmem:[#allocation3 + $0x84] ss:$16 sps:$4 sm:$0xff]   ;;  %v6803_v27 = vld [vmem:[#allocation3 + $0x8c] ss:$16 sps:$4 sm:$0xff]   ;;  %v6805_v29 = vld [vmem:[#allocation3 + $0x80] ss:$16 sps:$4 sm:$0xff]  }
 0x63b   :  { %4747 = vmatpush1.bf16.msra.mxu1 %v6771_v17  ;;  %4781 = vmatpush1.bf16.msra.mxu0 %v6774_v18  ;;  %v6807_v56 = vld [vmem:[#allocation3 + $0x88] ss:$16 sps:$4 sm:$0xff]   ;;  %v6811_v59 = vld [vmem:[#allocation3 + $0xa4] ss:$16 sps:$4 sm:$0xff]   ;;  %v6815_v62 = vld [vmem:[#allocation3 + $0xac] ss:$16 sps:$4 sm:$0xff]  }
 0x63c   :  { %4749 = vmatprep.subr.bf16.mxu1 %v6777_v50  ;;  %4783 = vmatprep.subr.bf16.mxu0 %v6779_v21  ;;  %v5458_v35 = vld [vmem:[#allocation3 + $0xa0] ss:$16 sps:$4 sm:$0xff]   ;;  %v5459_v36 = vld [vmem:[#allocation3 + $0xa8] ss:$16 sps:$4 sm:$0xff]   ;;  %v5460_v37 = vld [vmem:[#allocation3 + $0xc4] ss:$16 sps:$4 sm:$0xff]  }
 0x63d   :  { %v5462_v49 = vld [vmem:[#allocation3 + $0xcc] ss:$16 sps:$4 sm:$0xff]   ;;  %v5464_v20 = vld [vmem:[#allocation3 + $0xc0] ss:$16 sps:$4 sm:$0xff]   ;;  %v5465_v28 = vld [vmem:[#allocation3 + $0xc8] ss:$16 sps:$4 sm:$0xff]  }
 0x63e   :  { %v5466_v38 = vld [vmem:[#allocation3 + $0xe4] ss:$16 sps:$4 sm:$0x1f]   ;;  %v5468_v42 = vld [vmem:[#allocation3 + $0xec] ss:$16 sps:$4 sm:$0x1f]  }
 0x63f   :  { %4751 = vmatpush1.bf16.msra.mxu1 %v6781_v23  ;;  %4785 = vmatpush1.bf16.msra.mxu0 %v6783_v39  ;;  %vm5601_vm6 = vmmov 1   ;;  %v5470_v40 = vld [vmem:[#allocation3 + $0xe0] ss:$16 sps:$4 sm:$0x1f]   ;;  %vm2672_vm8 = vcmask 261120   ;;  %vm2855_vm9 = vcmask 400384  }
 0x640   :  { %4753 = vmatprep.subr.bf16.mxu1 %v6787_v41  ;;  %4787 = vmatprep.subr.bf16.mxu0 %v6791_v43  ;;  %vm6822_vm7 = vmpackc.low %vm2263_vm5, %vm5601_vm6  ;;  %v5471_v4 = vld [vmem:[#allocation3 + $0xe8] ss:$16 sps:$4 sm:$0x1f]   ;;  %v2668_v54 = vld [vmem:[#allocation7] sm:$0xff] }
 0x643   :  { %4755 = vmatpush1.bf16.msra.mxu1 %v6793_v24  ;;  %4789 = vmatpush1.bf16.msra.mxu0 %v6797_v25 }
 0x644   :  { %4757 = vmatprep.subr.bf16.mxu1 %v6799_v26  ;;  %4791 = vmatprep.subr.bf16.mxu0 %v6803_v27 }
 0x647   :  { %4759 = vmatpush1.bf16.msra.mxu1 %v6805_v29  ;;  %4793 = vmatpush1.bf16.msra.mxu0 %v6807_v56 }
 0x648   :  { %4761 = vmatprep.subr.bf16.mxu1 %v6811_v59  ;;  %4795 = vmatprep.subr.bf16.mxu0 %v6815_v62 }
 0x64b   :  { %4763 = vmatpush1.bf16.msra.mxu1 %v5458_v35  ;;  %4797 = vmatpush1.bf16.msra.mxu0 %v5459_v36 }
 0x64c   :  { %4765 = vmatprep.subr.bf16.mxu1 %v5460_v37  ;;  %4799 = vmatprep.subr.bf16.mxu0 %v5462_v49 }
 0x64f   :  { %4767 = vmatpush1.bf16.msra.mxu1 %v5464_v20  ;;  %4801 = vmatpush1.bf16.msra.mxu0 %v5465_v28 }
 0x650   :  { %4770 = vmatprep.subr.msk.bf16.mxu1 %vm6822_vm7, %v5466_v38  ;;  %4804 = vmatprep.subr.msk.bf16.mxu0 %vm6822_vm7, %v5468_v42 }
 0x653   :  { %4773 = vmatpush1.bf16.msk.msra.mxu1 %vm6822_vm7, %v5470_v40  ;;  %4807 = vmatpush1.bf16.msk.msra.mxu0 %vm6822_vm7, %v5471_v4 }
 0x654   :  { %4809 = vmatprep.subr.bf16.mxu1 %v6755_v19  ;;  %4843 = vmatprep.subr.bf16.mxu0 %v6757_v9 }
 0x656   :  { %4208 = vmatmul.mubr.msk.f32.vlgmr.msra.gmra.mrb[18].mxu1 %vm1978_vm4, %v2143_v53  ;;  %4214 = vmatmul.mubr.msk.f32.vlgmr.msra.gmra.mrb[18].mxu0 %vm1978_vm4, %v2143_v53 }
 0x657   :  { %4811 = vmatpush1.bf16.msra.mxu1 %v6760_v10  ;;  %4845 = vmatpush1.bf16.msra.mxu0 %v6762_v11  ;;  %v2669_v10 = vld [vmem:[#allocation7 + $0x8] sm:$0xff]  ;;  %v2670_v11 = vld [vmem:[#allocation7 + $0x10] sm:$0xff] }
 0x658   :  { %2346 = vmatprep.mubr.f32.mxu1 %v7301_v47  ;;  %2435 = vmatprep.mubr.f32.mxu0 %v7301_v47 }
 0x659   :  { %4813 = vmatprep.subr.bf16.mxu1 %v6765_v51  ;;  %4847 = vmatprep.subr.bf16.mxu0 %v6769_v15  ;;  %v2671_v51 = vld [vmem:[#allocation7 + $0x18] sm:$0xff] }
 0x65a   :  { %4209 = vmatmul.mubr.msk.f32.gmra.mrb[20].mxu1 %vm1978_vm4, %v2144_v45  ;;  %4215 = vmatmul.mubr.msk.f32.gmra.mrb[20].mxu0 %vm1978_vm4, %v2144_v45 }
 0x65b   :  { %4815 = vmatpush1.bf16.msra.mxu1 %v6771_v17  ;;  %4849 = vmatpush1.bf16.msra.mxu0 %v6774_v18 }
 0x65c   :  { %4817 = vmatprep.subr.bf16.mxu1 %v6777_v50  ;;  %4851 = vmatprep.subr.bf16.mxu0 %v6779_v21 }
 0x65d   :  { %2352 = vmatprep.mubr.f32.mxu1 %v7301_v47  ;;  %2441 = vmatprep.mubr.f32.mxu0 %v7301_v47 }
 0x65e   :  { %4210 = vmatmul.mubr.msk.f32.gmra.mrb[22].mxu1 %vm1978_vm4, %v2145_v0  ;;  %4216 = vmatmul.mubr.msk.f32.gmra.mrb[22].mxu0 %vm1978_vm4, %v2145_v0 }
 0x65f   :  { %4819 = vmatpush1.bf16.msra.mxu1 %v6781_v23  ;;  %4853 = vmatpush1.bf16.msra.mxu0 %v6783_v39 }
 0x660   :  { %4821 = vmatprep.subr.bf16.mxu1 %v6787_v41  ;;  %4855 = vmatprep.subr.bf16.mxu0 %v6791_v43 }
 0x661   :  { %2358 = vmatprep.mubr.f32.mxu1 %v7301_v47  ;;  %2447 = vmatprep.mubr.f32.mxu0 %v7301_v47 }
 0x662   :  { %4211 = vmatmul.mubr.msk.f32.gmra.mrb[24].mxu1 %vm1978_vm4, %v2146_v6  ;;  %4217 = vmatmul.mubr.msk.f32.gmra.mrb[24].mxu0 %vm1978_vm4, %v2146_v6 }
 0x663   :  { %4823 = vmatpush1.bf16.msra.mxu1 %v6793_v24  ;;  %4857 = vmatpush1.bf16.msra.mxu0 %v6797_v25 }
 0x664   :  { %4825 = vmatprep.subr.bf16.mxu1 %v6799_v26  ;;  %4859 = vmatprep.subr.bf16.mxu0 %v6803_v27 }
 0x665   :  { %2530 = vmatprep.mubr.f32.mxu1 %v7301_v47  ;;  %2619 = vmatprep.mubr.f32.mxu0 %v7301_v47 }
 0x667   :  { %4827 = vmatpush1.bf16.msra.mxu1 %v6805_v29  ;;  %4861 = vmatpush1.bf16.msra.mxu0 %v6807_v56 }
 0x668   :  { %4829 = vmatprep.subr.bf16.mxu1 %v6811_v59  ;;  %4863 = vmatprep.subr.bf16.mxu0 %v6815_v62 }
 0x66b   :  { %4831 = vmatpush1.bf16.msra.mxu1 %v5458_v35  ;;  %4865 = vmatpush1.bf16.msra.mxu0 %v5459_v36 }
 0x66c   :  { %4833 = vmatprep.subr.bf16.mxu1 %v5460_v37  ;;  %4867 = vmatprep.subr.bf16.mxu0 %v5462_v49 }
 0x66f   :  { %4835 = vmatpush1.bf16.msra.mxu1 %v5464_v20  ;;  %4869 = vmatpush1.bf16.msra.mxu0 %v5465_v28 }
 0x670   :  { %4838 = vmatprep.subr.msk.bf16.mxu1 %vm6822_vm7, %v5466_v38  ;;  %4872 = vmatprep.subr.msk.bf16.mxu0 %vm6822_vm7, %v5468_v42 }
 0x673   :  { %4841 = vmatpush1.bf16.msk.msra.mxu1 %vm6822_vm7, %v5470_v40  ;;  %4875 = vmatpush1.bf16.msk.msra.mxu0 %vm6822_vm7, %v5471_v4 }
 0x676   :  { %4220 = vmatmul.mubr.msk.f32.vlgmr.msra.gmra.mrb[26].mxu1 %vm1978_vm4, %v2147_v55  ;;  %4226 = vmatmul.mubr.msk.f32.vlgmr.msra.gmra.mrb[26].mxu0 %vm1978_vm4, %v2147_v55 }
 0x677   :  { %2536 = vmatprep.mubr.f32.mxu1 %v7301_v47  ;;  %2625 = vmatprep.mubr.f32.mxu0 %v7301_v47 }
 0x67a   :  { %4221 = vmatmul.mubr.msk.f32.gmra.mrb[28].mxu1 %vm1978_vm4, %v2148_v34  ;;  %4227 = vmatmul.mubr.msk.f32.gmra.mrb[28].mxu0 %vm1978_vm4, %v2148_v34 }
 0x67b   :  { %2542 = vmatprep.mubr.f32.mxu1 %v7301_v47  ;;  %2631 = vmatprep.mubr.f32.mxu0 %v7301_v47 }
 0x67e   :  { %4222 = vmatmul.mubr.msk.f32.gmra.mrb[30].mxu1 %vm1978_vm4, %v2149_v1  ;;  %4228 = vmatmul.mubr.msk.f32.gmra.mrb[30].mxu0 %vm1978_vm4, %v2149_v1 }
 0x67f   :  { %2548 = vmatprep.mubr.f32.mxu1 %v7301_v47  ;;  %2637 = vmatprep.mubr.f32.mxu0 %v7301_v47 }
 0x682   :  { %4223 = vmatmul.mubr.msk.f32.gmra.mrb[32].mxu1 %vm1978_vm4, %v2150_v8  ;;  %4229 = vmatmul.mubr.msk.f32.gmra.mrb[32].mxu0 %vm1978_vm4, %v2150_v8 }
 0x683   :  { %4370 = vmatprep.mubr.msk.f32.mxu1 %vm2672_vm8, %v2668_v54  ;;  %4384 = vmatprep.mubr.msk.f32.mxu0 %vm2672_vm8, %v2668_v54 }
 0x729   :  { %v2342_v7 = vpop.f32.mrb[18].mxu1  ;;  %v2431_v46 = vpop.f32.mrb[18].mxu0 }
 0x72a   :  { %v2344_v33 = vpop.f32.mrb[19].mxu1  ;;  %v2433_v45 = vpop.f32.mrb[19].mxu0 }
 0x72b   :  { %v2644_v34 = vmax.f32 %v2342_v7, %v2344_v33  ;;  %v2652_v16 = vmax.f32 %v2431_v46, %v2433_v45 }
 0x72d   :  { %v2660_v44 = vmax.f32 %v2644_v34, %v2652_v16  ;;  %v2348_v31 = vpop.f32.mrb[20].mxu1  ;;  %v2437_v32 = vpop.f32.mrb[20].mxu0 }
 0x72e   :  { %v2350_v12 = vpop.f32.mrb[21].mxu1  ;;  %v2439_v48 = vpop.f32.mrb[21].mxu0 }
 0x72f   :  { %v2645_v57 = vmax.f32 %v2348_v31, %v2350_v12  ;;  %v2653_v13 = vmax.f32 %v2437_v32, %v2439_v48 }
 0x731   :  { %v2661_v52 = vmax.f32 %v2645_v57, %v2653_v13  ;;  %v2354_v53 = vpop.f32.mrb[22].mxu1  ;;  %v2443_v55 = vpop.f32.mrb[22].mxu0 }
 0x732   :  { %v2356_v58 = vpop.f32.mrb[23].mxu1  ;;  %v2445_v60 = vpop.f32.mrb[23].mxu0 }
 0x733   :  { %v4876_v63 = vpack.c.bf16 %v2661_v52, %v2660_v44  ;;  %v2646_v61 = vmax.f32 %v2354_v53, %v2356_v58  ;;  %v2654_v14 = vmax.f32 %v2443_v55, %v2445_v60 }
 0x735   :  { %4877 = vmatprep.subr.bf16.mxu1 %v4876_v63  ;;  %v2662_v0 = vmax.f32 %v2646_v61, %v2654_v14  ;;  %v2360_v1 = vpop.f32.mrb[24].mxu1  ;;  %v2449_v5 = vpop.f32.mrb[24].mxu0 }
 0x736   :  { %4879 = vmatpush3.bf16.msra.mxu1 %v4876_v63  ;;  %v2362_v3 = vpop.f32.mrb[25].mxu1  ;;  %v2451_v22 = vpop.f32.mrb[25].mxu0 }
 0x737   :  { %v2647_v6 = vmax.f32 %v2360_v1, %v2362_v3  ;;  %v2655_v8 = vmax.f32 %v2449_v5, %v2451_v22 }
 0x739   :  { %v2663_v19 = vmax.f32 %v2647_v6, %v2655_v8 }
 0x73b   :  { %v4880_v9 = vpack.c.bf16 %v2663_v19, %v2662_v0 }
 0x73d   :  { %4881 = vmatprep.subr.bf16.mxu1 %v4880_v9 }
 0x73e   :  { %4883 = vmatpush3.bf16.msra.mxu1 %v4880_v9 }
 0x741   :  { %4371 = vmatmul.mubr.msk.f32.vlgmr.msra.gmra.mrb[34].mxu1 %vm2672_vm8, %v2669_v10 }
 0x742   :  { %4373 = vmatprep.mubr.msk.f32.mxu1 %vm2672_vm8, %v2670_v11 }
 0x745   :  { %4374 = vmatmul.mubr.msk.f32.gmra.mrb[36].mxu1 %vm2672_vm8, %v2671_v51 }
 0x749   :  { %v2532_v15 = vpop.f32.mrb[26].mxu1  ;;  %v2621_v17 = vpop.f32.mrb[26].mxu0 }
 0x74a   :  { %v2534_v18 = vpop.f32.mrb[27].mxu1  ;;  %v2623_v50 = vpop.f32.mrb[27].mxu0 }
 0x74b   :  { %v2648_v21 = vmax.f32 %v2532_v15, %v2534_v18  ;;  %v2656_v23 = vmax.f32 %v2621_v17, %v2623_v50 }
 0x74d   :  { %v2664_v39 = vmax.f32 %v2648_v21, %v2656_v23  ;;  %v2538_v41 = vpop.f32.mrb[28].mxu1  ;;  %v2627_v43 = vpop.f32.mrb[28].mxu0 }
 0x74e   :  { %v2540_v24 = vpop.f32.mrb[29].mxu1  ;;  %v2629_v25 = vpop.f32.mrb[29].mxu0 }
 0x74f   :  { %v2649_v26 = vmax.f32 %v2538_v41, %v2540_v24  ;;  %v2657_v27 = vmax.f32 %v2627_v43, %v2629_v25 }
 0x751   :  { %v2665_v29 = vmax.f32 %v2649_v26, %v2657_v27  ;;  %v2544_v56 = vpop.f32.mrb[30].mxu1  ;;  %v2633_v59 = vpop.f32.mrb[30].mxu0 }
 0x752   :  { %v2546_v62 = vpop.f32.mrb[31].mxu1  ;;  %v2635_v35 = vpop.f32.mrb[31].mxu0 }
 0x753   :  { %v2650_v36 = vmax.f32 %v2544_v56, %v2546_v62  ;;  %v2658_v37 = vmax.f32 %v2633_v59, %v2635_v35  ;;  %v4884_v49 = vpack.c.bf16 %v2665_v29, %v2664_v39 }
 0x755   :  { %v2666_v20 = vmax.f32 %v2650_v36, %v2658_v37  ;;  %v2550_v28 = vpop.f32.mrb[32].mxu1  ;;  %v2639_v38 = vpop.f32.mrb[32].mxu0  ;;  %4885 = vmatprep.subr.bf16.mxu0 %v4884_v49 }
 0x756   :  { %v2552_v42 = vpop.f32.mrb[33].mxu1  ;;  %v2641_v40 = vpop.f32.mrb[33].mxu0  ;;  %4887 = vmatpush3.bf16.msra.mxu0 %v4884_v49 }
 0x757   :  { %v2651_v4 = vmax.f32 %v2550_v28, %v2552_v42  ;;  %v2659_v54 = vmax.f32 %v2639_v38, %v2641_v40 }
 0x759   :  { %v2667_v7 = vmax.f32 %v2651_v4, %v2659_v54 }
 0x75b   :  { %v4888_v46 = vpack.c.bf16 %v2667_v7, %v2666_v20 }
 0x75d   :  { %4889 = vmatprep.subr.bf16.mxu0 %v4888_v46 }
 0x75e   :  { %4891 = vmatpush3.bf16.msra.mxu0 %v4888_v46 }
 0x761   :  { %4385 = vmatmul.mubr.msk.f32.vlgmr.msra.gmra.mrb[34].mxu0 %vm2672_vm8, %v2669_v10 }
 0x762   :  { %4387 = vmatprep.mubr.msk.f32.mxu0 %vm2672_vm8, %v2670_v11 }
 0x765   :  { %4388 = vmatmul.mubr.msk.f32.gmra.mrb[36].mxu0 %vm2672_vm8, %v2671_v51 }
 0x814   :  { %v6934_v33 = vpop.f32.mrb[34].mxu1 }
 0x815   :  { %v2859_v45 = vsel %vm2855_vm9, %v6934_v33, 0.0  ;;  %v2885_v34 = vmul.f32 %v6934_v33, %v6934_v33  ;;  %v6940_v16 = vpop.f32.mrb[35].mxu1 }
 0x816   :  { %2860 = vadd.xlane.f32.xlu0 %v2859_v45  ;;  %v2856_v31 = vsel %vm2855_vm9, %v6940_v16, 0.0  ;;  %v2884_v32 = vmul.f32 %v6940_v16, %v6940_v16 }
 0x817   :  { %v2895_v44 = vsel %vm2855_vm9, %v2885_v34, 0.0 }
 0x818   :  { %2896 = vadd.xlane.f32.xlu1 %v2895_v44  ;;  %v6947_v12 = vpop.f32.mrb[36].mxu1  ;;  %v2892_v13 = vsel %vm2855_vm9, %v2884_v32, 0.0 }
 0x819   :  { %v2865_v48 = vsel %vm2855_vm9, %v6947_v12, 0.0  ;;  %v6951_v57 = vpop.f32.mrb[37].mxu1  ;;  %v2887_v55 = vmul.f32 %v6947_v12, %v6947_v12 }
 0x81a   :  { %2857 = vadd.xlane.f32.xlu0 %v2856_v31  ;;  %v2886_v52 = vmul.f32 %v6951_v57, %v6951_v57  ;;  %v2862_v53 = vsel %vm2855_vm9, %v6951_v57, 0.0 }
 0x81b   :  { %v2901_v60 = vsel %vm2855_vm9, %v2887_v55, 0.0 }
 0x81c   :  { %2866 = vadd.xlane.f32.xlu1 %v2865_v48  ;;  %v2898_v58 = vsel %vm2855_vm9, %v2886_v52, 0.0 }
 0x81e   :  { %2893 = vadd.xlane.f32.xlu0 %v2892_v13 }
 0x820   :  { %2863 = vadd.xlane.f32.xlu1 %v2862_v53 }
 0x822   :  { %2899 = vadd.xlane.f32.xlu0 %v2898_v58 }
 0x824   :  { %2902 = vadd.xlane.f32.xlu1 %v2901_v60 }
 0x834   :  { %v6962_v63 = vpop.f32.mrb[34].mxu0 }
 0x835   :  { %v6964_v61 = vpop.f32.mrb[35].mxu0  ;;  %v2871_v14 = vsel %vm2855_vm9, %v6962_v63, 0.0  ;;  %v2889_v0 = vmul.f32 %v6962_v63, %v6962_v63 }
 0x836   :  { %2872 = vadd.xlane.f32.xlu1 %v2871_v14  ;;  %v2868_v1 = vsel %vm2855_vm9, %v6964_v61, 0.0  ;;  %v2888_v5 = vmul.f32 %v6964_v61, %v6964_v61 }
 0x837   :  { %2869 = vadd.xlane.f32.xlu0 %v2868_v1  ;;  %v2907_v22 = vsel %vm2855_vm9, %v2889_v0, 0.0  ;;  %v2937_v1 = vld [vmem:[%s7205_s8 + $0x8] sm:$0xff] }
 0x838   :  { %v6974_v3 = vpop.f32.mrb[36].mxu0  ;;  %v2904_v8 = vsel %vm2855_vm9, %v2888_v5, 0.0  ;;  %v2936_v5 = vld [vmem:[%s7205_s8] sm:$0xff] }
 0x839   :  { %v6977_v6 = vpop.f32.mrb[37].mxu0  ;;  %v2877_v19 = vsel %vm2855_vm9, %v6974_v3, 0.0  ;;  %v2891_v10 = vmul.f32 %v6974_v3, %v6974_v3 }
 0x83a   :  { %2908 = vadd.xlane.f32.xlu1 %v2907_v22  ;;  %v2874_v9 = vsel %vm2855_vm9, %v6977_v6, 0.0  ;;  %v2890_v11 = vmul.f32 %v6977_v6, %v6977_v6 }
 0x83b   :  { %2905 = vadd.xlane.f32.xlu0 %v2904_v8  ;;  %v2913_v51 = vsel %vm2855_vm9, %v2891_v10, 0.0 }
 0x83c   :  { %v2910_v15 = vsel %vm2855_vm9, %v2890_v11, 0.0  ;;  %v2939_v11 = vld [vmem:[%s7205_s8 + $0x18] sm:$0xff] }
 0x83e   :  { %2878 = vadd.xlane.f32.xlu1 %v2877_v19 }
 0x83f   :  { %2875 = vadd.xlane.f32.xlu0 %v2874_v9 }
 0x842   :  { %2914 = vadd.xlane.f32.xlu1 %v2913_v51 }
 0x843   :  { %2911 = vadd.xlane.f32.xlu0 %v2910_v15 }
 0x8a3   :  { %v2861_v18 = vpop.xlane.xlu0 %2860 }
 0x8a5   :  { %v2897_v17 = vpop.xlane.xlu1 %2896 }
 0x8a7   :  { %v2858_v21 = vpop.xlane.xlu0 %2857 }
 0x8a9   :  { %v2867_v50 = vpop.xlane.xlu1 %2866 }
 0x8ab   :  { %v2894_v39 = vpop.xlane.xlu0 %2893 }
 0x8ad   :  { %v2864_v23 = vpop.xlane.xlu1 %2863 }
 0x8af   :  { %v2900_v43 = vpop.xlane.xlu0 %2899 }
 0x8b1   :  { %v2903_v41 = vpop.xlane.xlu1 %2902 }
 0x8c3   :  { %v2873_v24 = vpop.xlane.xlu1 %2872 }
 0x8c4   :  { %v2881_v25 = vadd.f32 %v2873_v24, %v2861_v18  ;;  %v2870_v26 = vpop.xlane.xlu0 %2869  ;;  %v2953_v18 = vld [vmem:[%s7206_s9 + $0x8] sm:$0xff] }
 0x8c5   :  { %v2880_v27 = vadd.f32 %v2870_v26, %v2858_v21  ;;  %v2954_v26 = vld [vmem:[%s7206_s9 + $0x10] sm:$0xff] }
 0x8c6   :  { %v2921_v29 = vmul.f32 0.010204081, %v2881_v25 }
 0x8c7   :  { %v2920_v56 = vmul.f32 0.010204081, %v2880_v27  ;;  %v2909_v59 = vpop.xlane.xlu1 %2908 }
 0x8c8   :  { %v2917_v62 = vadd.f32 %v2909_v59, %v2897_v17  ;;  %v2906_v35 = vpop.xlane.xlu0 %2905  ;;  %v2929_v37 = vmul.f32 %v2921_v29, %v2921_v29  ;;  %v2955_v59 = vld [vmem:[%s7206_s9 + $0x18] sm:$0xff] }
 0x8c9   :  { %v2916_v36 = vadd.f32 %v2906_v35, %v2894_v39  ;;  %v2928_v20 = vmul.f32 %v2920_v56, %v2920_v56 }
 0x8ca   :  { %v2925_v49 = vmul.f32 0.010204081, %v2917_v62 }
 0x8cb   :  { %v2924_v28 = vmul.f32 0.010204081, %v2916_v36  ;;  %v2879_v38 = vpop.xlane.xlu1 %2878 }
 0x8cc   :  { %v2933_v42 = vsub.f32 %v2925_v49, %v2929_v37  ;;  %v2883_v40 = vadd.f32 %v2879_v38, %v2867_v50  ;;  %v2876_v4 = vpop.xlane.xlu0 %2875 }
 0x8cd   :  { %v2932_v54 = vsub.f32 %v2924_v28, %v2928_v20  ;;  %v2882_v7 = vadd.f32 %v2876_v4, %v2864_v23  ;;  %v2938_v23 = vld [vmem:[%s7205_s8 + $0x10] sm:$0xff] }
 0x8ce   :  { %v2941_v46 = vadd.f32 1e-05, %v2933_v42  ;;  %v2923_v45 = vmul.f32 0.010204081, %v2883_v40 }
 0x8cf   :  { %v2940_v34 = vadd.f32 1e-05, %v2932_v54  ;;  %v2915_v44 = vpop.xlane.xlu1 %2914  ;;  %v2922_v31 = vmul.f32 0.010204081, %v2882_v7 }
 0x8d0   :  { %5472 = vrsqrt.f32 %v2941_v46  ;;  %v2919_v32 = vadd.f32 %v2915_v44, %v2903_v41  ;;  %v2912_v48 = vpop.xlane.xlu0 %2911  ;;  %v2931_v52 = vmul.f32 %v2923_v45, %v2923_v45 }
 0x8d1   :  { %5474 = vrsqrt.f32 %v2940_v34  ;;  %v2918_v13 = vadd.f32 %v2912_v48, %v2900_v43  ;;  %v2930_v58 = vmul.f32 %v2922_v31, %v2922_v31  ;;  %v2952_v43 = vld [vmem:[%s7206_s9] sm:$0xff] }
 0x8d2   :  { %v2927_v53 = vmul.f32 0.010204081, %v2919_v32 }
 0x8d3   :  { %v2926_v55 = vmul.f32 0.010204081, %v2918_v13 }
 0x8d4   :  { %v2935_v60 = vsub.f32 %v2927_v53, %v2931_v52 }
 0x8d5   :  { %v2934_v0 = vsub.f32 %v2926_v55, %v2930_v58 }
 0x8d6   :  { %v2943_v14 = vadd.f32 1e-05, %v2935_v60 }
 0x8d7   :  { %v2942_v8 = vadd.f32 1e-05, %v2934_v0 }
 0x8d8   :  { %5476 = vrsqrt.f32 %v2943_v14 }
 0x8d9   :  { %5478 = vrsqrt.f32 %v2942_v8 }
 0x8da   :  { %v5473_v22 = vpop.eup %5472 }
 0x8db   :  { %v5475_v19 = vpop.eup %5474  ;;  %v2949_v9 = vmul.f32 %v5473_v22, %v2937_v1 }
 0x8dc   :  { %v2948_v10 = vmul.f32 %v5475_v19, %v2936_v5 }
 0x8dd   :  { %2971 = vperm.xlu1 %5423, %v2949_v9   ;;  %v2957_v17 = vmul.f32 %v2949_v9, %v2921_v29 }
 0x8de   :  { %2966 = vperm.xlu0 %5422, %v2948_v10   ;;  %v2956_v41 = vmul.f32 %v2948_v10, %v2920_v56 }
 0x8df   :  { %v2961_v50 = vsub.f32 %v2953_v18, %v2957_v17 }
 0x8e0   :  { %v2960_v24 = vsub.f32 %v2952_v43, %v2956_v41 }
 0x8e2   :  { %v5477_v51 = vpop.eup %5476 }
 0x8e3   :  { %v2951_v15 = vmul.f32 %v5477_v51, %v2939_v11  ;;  %v5479_v21 = vpop.eup %5478 }
 0x8e4   :  { %v2950_v39 = vmul.f32 %v5479_v21, %v2938_v23 }
 0x8e5   :  { %2981 = vperm.xlu1 %5423, %v2951_v15   ;;  %v2959_v29 = vmul.f32 %v2951_v15, %v2923_v45 }
 0x8e6   :  { %v2958_v25 = vmul.f32 %v2950_v39, %v2922_v31 }
 0x8e7   :  { %v2963_v56 = vsub.f32 %v2955_v59, %v2959_v29 }
 0x8e8   :  { %v2962_v27 = vsub.f32 %v2954_v26, %v2958_v25 }
 0x8e9   :  { %2999 = vperm.xlu1 %5423, %v2961_v50  }
 0x8ed   :  { %2976 = vperm.xlu1 %5423, %v2950_v39  }
 0x8f1   :  { %2994 = vperm.xlu1 %5423, %v2960_v24  }
 0x8f5   :  { %3004 = vperm.xlu1 %5423, %v2962_v27  }
 0x8f9   :  { %3009 = vperm.xlu1 %5423, %v2963_v56  }
 0x95c   :  { %v2972_v62 = vpop.permute.xlu1 %2971 }
 0x95d   :  { %v2985_v36 = vmul.f32 %v6934_v33, %v2972_v62  ;;  %v2989_v37 = vmul.f32 %v6962_v63, %v2972_v62  ;;  %v2967_v40 = vpop.permute.xlu0 %2966 }
 0x95e   :  { %v2984_v54 = vmul.f32 %v2967_v40, %v6940_v16  ;;  %v2988_v7 = vmul.f32 %v2967_v40, %v6964_v61 }
 0x964   :  { %v2982_v35 = vpop.permute.xlu1 %2981 }
 0x965   :  { %v2987_v16 = vmul.f32 %v6947_v12, %v2982_v35  ;;  %v2991_v61 = vmul.f32 %v6974_v3, %v2982_v35 }
 0x968   :  { %v3000_v49 = vpop.permute.xlu1 %2999 }
 0x969   :  { %v7016_v20 = vadd.f32 %v3000_v49, %v2985_v36  ;;  %v7018_v28 = vadd.f32 %v3000_v49, %v2989_v37 }
 0x96b   :  { %v3021_v38 = vmax.f32 %v7016_v20, 0.0  ;;  %v3025_v42 = vmax.f32 %v7018_v28, 0.0 }
 0x96c   :  { %v2977_v4 = vpop.permute.xlu1 %2976 }
 0x96d   :  { %v2986_v63 = vmul.f32 %v2977_v4, %v6951_v57  ;;  %v2990_v34 = vmul.f32 %v2977_v4, %v6977_v6 }
 0x970   :  { %v2995_v46 = vpop.permute.xlu1 %2994 }
 0x971   :  { %v3012_v45 = vadd.f32 %v2995_v46, %v2984_v54  ;;  %v7024_v33 = vadd.f32 %v2995_v46, %v2988_v7 }
 0x973   :  { %v3020_v44 = vmax.f32 %v3012_v45, 0.0  ;;  %v3024_v31 = vmax.f32 %v7024_v33, 0.0 }
 0x974   :  { %v3005_v32 = vpop.permute.xlu1 %3004 }
 0x975   :  { %v7029_v48 = vadd.f32 %v3005_v32, %v2986_v63  ;;  %v7031_v13 = vadd.f32 %v3005_v32, %v2990_v34 }
 0x977   :  { %v3022_v52 = vmax.f32 %v7029_v48, 0.0  ;;  %v3026_v53 = vmax.f32 %v7031_v13, 0.0 }
 0x978   :  { %v3010_v55 = vpop.permute.xlu1 %3009 }
 0x979   :  { %v7037_v57 = vadd.f32 %v3010_v55, %v2987_v16  ;;  %v7039_v6 = vadd.f32 %v3010_v55, %v2991_v61 }
 0x97b   :  { %v3023_v58 = vmax.f32 %v7037_v57, 0.0  ;;  %v3027_v60 = vmax.f32 %v7039_v6, 0.0 }
 0x97c   :  { %5590 = dma.done.wait [#allocation6 + $0x2], 1792 }
 0x97d   :  { %5591 = vsyncadd [#allocation6 + $0x2], 4294965504  ;;  %3162 = vmatprep.mubr.f32.mxu1 %v7301_v47  ;;  %3251 = vmatprep.mubr.f32.mxu0 %v7301_v47  ;;  %v5482_v12 = vld [vmem:[#allocation4 + $0x4] ss:$16 sps:$4 sm:$0xff]   ;;  %v5484_v3 = vld [vmem:[#allocation4 + $0xc] ss:$16 sps:$4 sm:$0xff]  }
 0x97e   :  { %5480 = vset.pattern.permute.xlu0 %v7354_v2  ;;  %5481 = vset.pattern.permute.xlu1 %v7354_v2  ;;  %v5486_v14 = vld [vmem:[#allocation4] ss:$16 sps:$4 sm:$0xff]   ;;  %v5487_v0 = vld [vmem:[#allocation4 + $0x8] ss:$16 sps:$4 sm:$0xff]   ;;  %v5488_v1 = vld [vmem:[#allocation4 + $0x24] ss:$16 sps:$4 sm:$0xff]  }
 0x97f   :  { %4893 = vmatprep.subr.bf16.mxu1 %v5482_v12  ;;  %4905 = vmatprep.subr.bf16.mxu0 %v5484_v3  ;;  %v5490_v5 = vld [vmem:[#allocation4 + $0x2c] ss:$16 sps:$4 sm:$0xff]   ;;  %v5492_v22 = vld [vmem:[#allocation4 + $0x20] ss:$16 sps:$4 sm:$0xff]   ;;  %v5493_v8 = vld [vmem:[#allocation4 + $0x28] ss:$16 sps:$4 sm:$0xff]  }
 0x980   :  { %4895 = vmatpush1.bf16.msra.mxu1 %v5486_v14  ;;  %4907 = vmatpush1.bf16.msra.mxu0 %v5487_v0  ;;  %v5494_v19 = vld [vmem:[#allocation4 + $0x44] ss:$16 sps:$4 sm:$0xff]   ;;  %v5496_v9 = vld [vmem:[#allocation4 + $0x4c] ss:$16 sps:$4 sm:$0xff]   ;;  %v5498_v10 = vld [vmem:[#allocation4 + $0x40] ss:$16 sps:$4 sm:$0xff]  }
 0x981   :  { %4897 = vmatprep.subr.bf16.mxu1 %v5488_v1  ;;  %4909 = vmatprep.subr.bf16.mxu0 %v5490_v5  ;;  %v5499_v2 = vld [vmem:[#allocation4 + $0x48] ss:$16 sps:$4 sm:$0xff]   ;;  %v3044_v11 = vld [vmem:[#allocation4 + $0x60] sm:$0x11]  ;;  %v3490_v21 = vld [vmem:[#allocation9] sm:$0xff]  ;;  %vm3648_vm10 = vcmask 203776  }
 0x982   :  { %v3045_v51 = vld [vmem:[#allocation4 + $0x68] sm:$0x11]  ;;  %v3071_v15 = vunpack.c.h.bf16 %v3044_v11  ;;  %v3070_v18 = vunpack.c.l.bf16 %v3044_v11 }
 0x983   :  { %v3073_v17 = vunpack.c.h.bf16 %v3045_v51  ;;  %v3072_v50 = vunpack.c.l.bf16 %v3045_v51 }
 0x984   :  { %4899 = vmatpush1.bf16.msra.mxu1 %v5492_v22  ;;  %4911 = vmatpush1.bf16.msra.mxu0 %v5493_v8 }
 0x985   :  { %4901 = vmatprep.subr.bf16.mxu1 %v5494_v19  ;;  %4913 = vmatprep.subr.bf16.mxu0 %v5496_v9 }
 0x988   :  { %4903 = vmatpush1.bf16.msra.mxu1 %v5498_v10  ;;  %4915 = vmatpush1.bf16.msra.mxu0 %v5499_v2 }
 0x989   :  { %4238 = vmatprep.subr.msk.mxu1 %vm2263_vm5, %v3071_v15  ;;  %4244 = vmatprep.subr.msk.mxu0 %vm2263_vm5, %v3073_v17 }
 0x98c   :  { %4239 = vmatpush1.msk.msra.mxu1 %vm2263_vm5, %v3070_v18  ;;  %4245 = vmatpush1.msk.msra.mxu0 %vm2263_vm5, %v3072_v50 }
 0x98d   :  { %4240 = vmatmul.mubr.msk.f32.vlgmr.msra.gmra.mrb[38].mxu1 %vm2855_vm9, %v3020_v44  ;;  %4246 = vmatmul.mubr.msk.f32.vlgmr.msra.gmra.mrb[38].mxu0 %vm2855_vm9, %v3020_v44 }
 0x98e   :  { %4917 = vmatprep.subr.bf16.mxu1 %v5482_v12  ;;  %4929 = vmatprep.subr.bf16.mxu0 %v5484_v3 }
 0x98f   :  { %3168 = vmatprep.mubr.f32.mxu1 %v7301_v47  ;;  %3257 = vmatprep.mubr.f32.mxu0 %v7301_v47 }
 0x990   :  { %4919 = vmatpush1.bf16.msra.mxu1 %v5486_v14  ;;  %4931 = vmatpush1.bf16.msra.mxu0 %v5487_v0 }
 0x991   :  { %4241 = vmatmul.mubr.msk.f32.gmra.mrb[40].mxu1 %vm2855_vm9, %v3021_v38  ;;  %4247 = vmatmul.mubr.msk.f32.gmra.mrb[40].mxu0 %vm2855_vm9, %v3021_v38 }
 0x992   :  { %4921 = vmatprep.subr.bf16.mxu1 %v5488_v1  ;;  %4933 = vmatprep.subr.bf16.mxu0 %v5490_v5 }
 0x993   :  { %3174 = vmatprep.mubr.f32.mxu1 %v7301_v47  ;;  %3263 = vmatprep.mubr.f32.mxu0 %v7301_v47 }
 0x994   :  { %4923 = vmatpush1.bf16.msra.mxu1 %v5492_v22  ;;  %4935 = vmatpush1.bf16.msra.mxu0 %v5493_v8 }
 0x995   :  { %4242 = vmatmul.mubr.msk.f32.gmra.mrb[42].mxu1 %vm2855_vm9, %v3022_v52  ;;  %4248 = vmatmul.mubr.msk.f32.gmra.mrb[42].mxu0 %vm2855_vm9, %v3022_v52 }
 0x996   :  { %4925 = vmatprep.subr.bf16.mxu1 %v5494_v19  ;;  %4937 = vmatprep.subr.bf16.mxu0 %v5496_v9 }
 0x997   :  { %3180 = vmatprep.mubr.f32.mxu1 %v7301_v47  ;;  %3269 = vmatprep.mubr.f32.mxu0 %v7301_v47 }
 0x998   :  { %4927 = vmatpush1.bf16.msra.mxu1 %v5498_v10  ;;  %4939 = vmatpush1.bf16.msra.mxu0 %v5499_v2 }
 0x999   :  { %4243 = vmatmul.mubr.msk.f32.gmra.mrb[44].mxu1 %vm2855_vm9, %v3023_v58  ;;  %4249 = vmatmul.mubr.msk.f32.gmra.mrb[44].mxu0 %vm2855_vm9, %v3023_v58  ;;  %v3491_v58 = vld [vmem:[#allocation9 + $0x8] sm:$0xff] }
 0x99a   :  { %4250 = vmatprep.subr.msk.mxu1 %vm2263_vm5, %v3071_v15  ;;  %4256 = vmatprep.subr.msk.mxu0 %vm2263_vm5, %v3073_v17 }
 0x99b   :  { %3352 = vmatprep.mubr.f32.mxu1 %v7301_v47  ;;  %3441 = vmatprep.mubr.f32.mxu0 %v7301_v47 }
 0x99c   :  { %4251 = vmatpush1.msk.msra.mxu1 %vm2263_vm5, %v3070_v18  ;;  %4257 = vmatpush1.msk.msra.mxu0 %vm2263_vm5, %v3072_v50 }
 0x99d   :  { %4252 = vmatmul.mubr.msk.f32.vlgmr.msra.gmra.mrb[46].mxu1 %vm2855_vm9, %v3024_v31  ;;  %4258 = vmatmul.mubr.msk.f32.vlgmr.msra.gmra.mrb[46].mxu0 %vm2855_vm9, %v3024_v31 }
 0x99e   :  { %3358 = vmatprep.mubr.f32.mxu1 %v7301_v47  ;;  %3447 = vmatprep.mubr.f32.mxu0 %v7301_v47 }
 0x9a1   :  { %4253 = vmatmul.mubr.msk.f32.gmra.mrb[48].mxu1 %vm2855_vm9, %v3025_v42  ;;  %4259 = vmatmul.mubr.msk.f32.gmra.mrb[48].mxu0 %vm2855_vm9, %v3025_v42 }
 0x9a2   :  { %3364 = vmatprep.mubr.f32.mxu1 %v7301_v47  ;;  %3453 = vmatprep.mubr.f32.mxu0 %v7301_v47 }
 0x9a5   :  { %4254 = vmatmul.mubr.msk.f32.gmra.mrb[50].mxu1 %vm2855_vm9, %v3026_v53  ;;  %4260 = vmatmul.mubr.msk.f32.gmra.mrb[50].mxu0 %vm2855_vm9, %v3026_v53 }
 0x9a6   :  { %3370 = vmatprep.mubr.f32.mxu1 %v7301_v47  ;;  %3459 = vmatprep.mubr.f32.mxu0 %v7301_v47 }
 0x9a9   :  { %4255 = vmatmul.mubr.msk.f32.gmra.mrb[52].mxu1 %vm2855_vm9, %v3027_v60  ;;  %4261 = vmatmul.mubr.msk.f32.gmra.mrb[52].mxu0 %vm2855_vm9, %v3027_v60 }
 0x9aa   :  { %4398 = vmatprep.mubr.msk.f32.mxu1 %vm2672_vm8, %v3490_v21  ;;  %4409 = vmatprep.mubr.msk.f32.mxu0 %vm2672_vm8, %v3490_v21 }
 0xa60   :  { %v3164_v23 = vpop.f32.mrb[38].mxu1  ;;  %v3253_v39 = vpop.f32.mrb[38].mxu0 }
 0xa61   :  { %v3166_v41 = vpop.f32.mrb[39].mxu1  ;;  %v3255_v43 = vpop.f32.mrb[39].mxu0 }
 0xa62   :  { %v3466_v24 = vmax.f32 %v3164_v23, %v3166_v41  ;;  %v3474_v25 = vmax.f32 %v3253_v39, %v3255_v43 }
 0xa64   :  { %v3482_v26 = vmax.f32 %v3466_v24, %v3474_v25  ;;  %v3170_v27 = vpop.f32.mrb[40].mxu1  ;;  %v3259_v29 = vpop.f32.mrb[40].mxu0 }
 0xa65   :  { %v3172_v59 = vpop.f32.mrb[41].mxu1  ;;  %v3261_v56 = vpop.f32.mrb[41].mxu0 }
 0xa66   :  { %v3467_v62 = vmax.f32 %v3170_v27, %v3172_v59  ;;  %v3475_v35 = vmax.f32 %v3259_v29, %v3261_v56 }
 0xa68   :  { %v3483_v36 = vmax.f32 %v3467_v62, %v3475_v35  ;;  %v3176_v37 = vpop.f32.mrb[42].mxu1  ;;  %v3265_v49 = vpop.f32.mrb[42].mxu0 }
 0xa69   :  { %v3178_v20 = vpop.f32.mrb[43].mxu1  ;;  %v3267_v28 = vpop.f32.mrb[43].mxu0 }
 0xa6a   :  { %v3468_v38 = vmax.f32 %v3176_v37, %v3178_v20  ;;  %v3476_v42 = vmax.f32 %v3265_v49, %v3267_v28  ;;  %v4940_v40 = vpack.c.bf16 %v3483_v36, %v3482_v26 }
 0xa6c   :  { %v3484_v4 = vmax.f32 %v3468_v38, %v3476_v42  ;;  %v3182_v54 = vpop.f32.mrb[44].mxu1  ;;  %v3271_v7 = vpop.f32.mrb[44].mxu0  ;;  %4941 = vmatprep.subr.bf16.mxu1 %v4940_v40 }
 0xa6d   :  { %v3184_v46 = vpop.f32.mrb[45].mxu1  ;;  %v3273_v45 = vpop.f32.mrb[45].mxu0  ;;  %4943 = vmatpush3.bf16.msra.mxu1 %v4940_v40 }
 0xa6e   :  { %v3469_v33 = vmax.f32 %v3182_v54, %v3184_v46  ;;  %v3477_v63 = vmax.f32 %v3271_v7, %v3273_v45 }
 0xa70   :  { %v3485_v34 = vmax.f32 %v3469_v33, %v3477_v63  ;;  %v3354_v44 = vpop.f32.mrb[46].mxu1  ;;  %v3443_v31 = vpop.f32.mrb[46].mxu0 }
 0xa71   :  { %v3356_v32 = vpop.f32.mrb[47].mxu1  ;;  %v3445_v48 = vpop.f32.mrb[47].mxu0 }
 0xa72   :  { %v3470_v13 = vmax.f32 %v3354_v44, %v3356_v32  ;;  %v3478_v16 = vmax.f32 %v3443_v31, %v3445_v48  ;;  %v4944_v61 = vpack.c.bf16 %v3485_v34, %v3484_v4 }
 0xa74   :  { %v3486_v52 = vmax.f32 %v3470_v13, %v3478_v16  ;;  %v3360_v53 = vpop.f32.mrb[48].mxu1  ;;  %v3449_v55 = vpop.f32.mrb[48].mxu0  ;;  %4945 = vmatprep.subr.bf16.mxu1 %v4944_v61 }
 0xa75   :  { %v3362_v57 = vpop.f32.mrb[49].mxu1  ;;  %v3451_v6 = vpop.f32.mrb[49].mxu0  ;;  %4947 = vmatpush3.bf16.msra.mxu1 %v4944_v61 }
 0xa76   :  { %v3471_v60 = vmax.f32 %v3360_v53, %v3362_v57  ;;  %v3479_v12 = vmax.f32 %v3449_v55, %v3451_v6  ;;  %v3689_v53 = vld [vmem:[%s7208_s11] sm:$0xff]  ;;  %v3690_v57 = vld [vmem:[%s7208_s11 + $0x8] sm:$0xff] }
 0xa78   :  { %v3487_v3 = vmax.f32 %v3471_v60, %v3479_v12  ;;  %v3366_v14 = vpop.f32.mrb[50].mxu1  ;;  %v3455_v0 = vpop.f32.mrb[50].mxu0  ;;  %4399 = vmatmul.mubr.msk.f32.vlgmr.msra.gmra.mrb[54].mxu1 %vm2672_vm8, %v3491_v58 }
 0xa79   :  { %v3368_v1 = vpop.f32.mrb[51].mxu1  ;;  %v3457_v5 = vpop.f32.mrb[51].mxu0 }
 0xa7a   :  { %v3472_v22 = vmax.f32 %v3366_v14, %v3368_v1  ;;  %v3480_v8 = vmax.f32 %v3455_v0, %v3457_v5  ;;  %v4948_v19 = vpack.c.bf16 %v3487_v3, %v3486_v52  ;;  %v3697_v3 = vld [vmem:[%s7209_s12] sm:$0xff]  ;;  %v3698_v1 = vld [vmem:[%s7209_s12 + $0x8] sm:$0xff] }
 0xa7c   :  { %v3488_v9 = vmax.f32 %v3472_v22, %v3480_v8  ;;  %v3372_v10 = vpop.f32.mrb[52].mxu1  ;;  %v3461_v2 = vpop.f32.mrb[52].mxu0  ;;  %4949 = vmatprep.subr.bf16.mxu0 %v4948_v19 }
 0xa7d   :  { %v3374_v11 = vpop.f32.mrb[53].mxu1  ;;  %v3463_v51 = vpop.f32.mrb[53].mxu0  ;;  %4951 = vmatpush3.bf16.msra.mxu0 %v4948_v19 }
 0xa7e   :  { %v3473_v15 = vmax.f32 %v3372_v10, %v3374_v11  ;;  %v3481_v17 = vmax.f32 %v3461_v2, %v3463_v51 }
 0xa80   :  { %v3489_v18 = vmax.f32 %v3473_v15, %v3481_v17 }
 0xa82   :  { %v4952_v50 = vpack.c.bf16 %v3489_v18, %v3488_v9 }
 0xa84   :  { %4953 = vmatprep.subr.bf16.mxu0 %v4952_v50 }
 0xa85   :  { %4955 = vmatpush3.bf16.msra.mxu0 %v4952_v50 }
 0xa88   :  { %4410 = vmatmul.mubr.msk.f32.vlgmr.msra.gmra.mrb[54].mxu0 %vm2672_vm8, %v3491_v58 }
 0xb4b   :  { %v7117_v21 = vpop.f32.mrb[54].mxu1 }
 0xb4c   :  { %v3652_v23 = vsel %vm3648_vm10, %v7117_v21, 0.0  ;;  %v7121_v39 = vpop.f32.mrb[55].mxu1  ;;  %v3664_v41 = vmul.f32 %v7117_v21, %v7117_v21 }
 0xb4d   :  { %3653 = vadd.xlane.f32.xlu0 %v3652_v23  ;;  %v3663_v43 = vmul.f32 %v7121_v39, %v7121_v39  ;;  %v3649_v24 = vsel %vm3648_vm10, %v7121_v39, 0.0 }
 0xb4e   :  { %v3670_v25 = vsel %vm3648_vm10, %v3664_v41, 0.0 }
 0xb4f   :  { %3671 = vadd.xlane.f32.xlu1 %v3670_v25  ;;  %v3667_v26 = vsel %vm3648_vm10, %v3663_v43, 0.0 }
 0xb51   :  { %3650 = vadd.xlane.f32.xlu0 %v3649_v24 }
 0xb55   :  { %3668 = vadd.xlane.f32.xlu0 %v3667_v26 }
 0xb5b   :  { %v4411_v27 = vpop.f32.mrb[54].mxu0 }
 0xb5c   :  { %v3639_v29 = vpop.f32.mrb[55].mxu0  ;;  %v3658_v59 = vsel %vm3648_vm10, %v4411_v27, 0.0  ;;  %v3666_v36 = vmul.f32 %v4411_v27, %v4411_v27 }
 0xb5d   :  { %v3665_v56 = vmul.f32 %v3639_v29, %v3639_v29  ;;  %3659 = vadd.xlane.f32.xlu1 %v3658_v59  ;;  %v3655_v35 = vsel %vm3648_vm10, %v3639_v29, 0.0 }
 0xb5e   :  { %v3676_v37 = vsel %vm3648_vm10, %v3666_v36, 0.0 }
 0xb5f   :  { %v3673_v62 = vsel %vm3648_vm10, %v3665_v56, 0.0 }
 0xb60   :  { %3674 = vadd.xlane.f32.xlu0 %v3673_v62 }
 0xb61   :  { %3656 = vadd.xlane.f32.xlu1 %v3655_v35 }
 0xb65   :  { %3677 = vadd.xlane.f32.xlu1 %v3676_v37 }
 0xbda   :  { %v3654_v49 = vpop.xlane.xlu0 %3653 }
 0xbdc   :  { %v3672_v28 = vpop.xlane.xlu1 %3671 }
 0xbde   :  { %v3651_v20 = vpop.xlane.xlu0 %3650 }
 0xbe2   :  { %v3669_v38 = vpop.xlane.xlu0 %3668 }
 0xbea   :  { %v3660_v42 = vpop.xlane.xlu1 %3659 }
 0xbeb   :  { %v3662_v40 = vadd.f32 %v3660_v42, %v3654_v49 }
 0xbed   :  { %v3675_v4 = vpop.xlane.xlu0 %3674  ;;  %v3682_v45 = vmul.f32 0.02, %v3662_v40 }
 0xbee   :  { %v3657_v54 = vpop.xlane.xlu1 %3656  ;;  %v3679_v7 = vadd.f32 %v3675_v4, %v3669_v38 }
 0xbef   :  { %v3661_v46 = vadd.f32 %v3657_v54, %v3651_v20  ;;  %v3686_v32 = vmul.f32 %v3682_v45, %v3682_v45 }
 0xbf0   :  { %v3683_v34 = vmul.f32 0.02, %v3679_v7 }
 0xbf1   :  { %v3681_v33 = vmul.f32 0.02, %v3661_v46 }
 0xbf2   :  { %v3678_v63 = vpop.xlane.xlu1 %3677 }
 0xbf3   :  { %v3685_v44 = vmul.f32 %v3681_v33, %v3681_v33  ;;  %v3680_v31 = vadd.f32 %v3678_v63, %v3672_v28 }
 0xbf5   :  { %v3687_v48 = vsub.f32 %v3683_v34, %v3685_v44  ;;  %v3684_v13 = vmul.f32 0.02, %v3680_v31 }
 0xbf7   :  { %v3691_v16 = vadd.f32 1e-05, %v3687_v48  ;;  %v3688_v61 = vsub.f32 %v3684_v13, %v3686_v32 }
 0xbf9   :  { %5500 = vrsqrt.f32 %v3691_v16  ;;  %v3692_v52 = vadd.f32 1e-05, %v3688_v61 }
 0xbfb   :  { %5502 = vrsqrt.f32 %v3692_v52 }
 0xc03   :  { %v5501_v55 = vpop.eup %5500 }
 0xc04   :  { %v3695_v6 = vmul.f32 %v5501_v55, %v3689_v53 }
 0xc05   :  { %v5503_v58 = vpop.eup %5502 }
 0xc06   :  { %v3699_v60 = vmul.f32 %v3695_v6, %v3681_v33  ;;  %3705 = vperm.xlu0 %5480, %v3695_v6   ;;  %v3696_v12 = vmul.f32 %v5503_v58, %v3690_v57 }
 0xc08   :  { %3710 = vperm.xlu1 %5481, %v3696_v12   ;;  %v3701_v14 = vsub.f32 %v3697_v3, %v3699_v60  ;;  %v3700_v0 = vmul.f32 %v3696_v12, %v3682_v45 }
 0xc0a   :  { %v3702_v5 = vsub.f32 %v3698_v1, %v3700_v0 }
 0xc0c   :  { %3719 = vperm.xlu1 %5481, %v3701_v14  }
 0xc10   :  { %3724 = vperm.xlu1 %5481, %v3702_v5  }
 0xc85   :  { %v3706_v22 = vpop.permute.xlu0 %3705 }
 0xc86   :  { %v3713_v19 = vmul.f32 %v3706_v22, %v7121_v39  ;;  %v3715_v9 = vmul.f32 %v3706_v22, %v3639_v29 }
 0xc87   :  { %v3711_v8 = vpop.permute.xlu1 %3710 }
 0xc88   :  { %v3714_v51 = vmul.f32 %v7117_v21, %v3711_v8  ;;  %v3716_v15 = vmul.f32 %v4411_v27, %v3711_v8 }
 0xc8b   :  { %v3720_v10 = vpop.permute.xlu1 %3719 }
 0xc8c   :  { %v3727_v2 = vadd.f32 %v3720_v10, %v3713_v19  ;;  %v3729_v11 = vadd.f32 %v3720_v10, %v3715_v9 }
 0xc8e   :  { %v3731_v17 = vmax.f32 %v3727_v2, 0.0  ;;  %v3733_v18 = vmax.f32 %v3729_v11, 0.0 }
 0xc8f   :  { %v3725_v50 = vpop.permute.xlu1 %3724 }
 0xc90   :  { %v3728_v23 = vadd.f32 %v3725_v50, %v3714_v51  ;;  %v3730_v41 = vadd.f32 %v3725_v50, %v3716_v15 }
 0xc92   :  { %v3732_v43 = vmax.f32 %v3728_v23, 0.0  ;;  %v3734_v24 = vmax.f32 %v3730_v41, 0.0 }
 0xc93   :  { %5592 = dma.done.wait [#allocation6 + $0x3], 1024 }
 0xc94   :  { %5593 = vsyncadd [#allocation6 + $0x3], 4294966272  ;;  %3845 = vmatprep.mubr.f32.mxu1 %v7301_v47  ;;  %3922 = vmatprep.mubr.f32.mxu0 %v7301_v47  ;;  %v5504_v39 = vld [vmem:[#allocation5 + $0x4] ss:$16 sps:$4 sm:$0xff]   ;;  %v5506_v25 = vld [vmem:[#allocation5 + $0xc] ss:$16 sps:$4 sm:$0xff]  }
 0xc95   :  { %4957 = vmatprep.subr.bf16.mxu1 %v5504_v39  ;;  %v5508_v26 = vld [vmem:[#allocation5] ss:$16 sps:$4 sm:$0xff]   ;;  %v5509_v29 = vld [vmem:[#allocation5 + $0x8] ss:$16 sps:$4 sm:$0xff]   ;;  %4967 = vmatprep.subr.bf16.mxu0 %v5506_v25 }
 0xc96   :  { %v5510_v21 = vld [vmem:[#allocation5 + $0x24] ss:$16 sps:$4 sm:$0x1f]   ;;  %4959 = vmatpush1.bf16.msra.mxu1 %v5508_v26  ;;  %4969 = vmatpush1.bf16.msra.mxu0 %v5509_v29  ;;  %v5512_v27 = vld [vmem:[#allocation5 + $0x2c] ss:$16 sps:$4 sm:$0x1f]  }
 0xc97   :  { %4962 = vmatprep.subr.msk.bf16.mxu1 %vm6822_vm7, %v5510_v21  ;;  %v5514_v59 = vld [vmem:[#allocation5 + $0x20] ss:$16 sps:$4 sm:$0x1f]   ;;  %v5515_v56 = vld [vmem:[#allocation5 + $0x28] ss:$16 sps:$4 sm:$0x1f]   ;;  %4972 = vmatprep.subr.msk.bf16.mxu0 %vm6822_vm7, %v5512_v27 }
 0xc9a   :  { %4965 = vmatpush1.bf16.msk.msra.mxu1 %vm6822_vm7, %v5514_v59  ;;  %4975 = vmatpush1.bf16.msk.msra.mxu0 %vm6822_vm7, %v5515_v56 }
 0xc9b   :  { %4977 = vmatprep.subr.bf16.mxu1 %v5504_v39  ;;  %4987 = vmatprep.subr.bf16.mxu0 %v5506_v25 }
 0xc9d   :  { %4268 = vmatmul.mubr.msk.f32.vlgmr.msra.gmra.mrb[56].mxu1 %vm3648_vm10, %v3731_v17  ;;  %4272 = vmatmul.mubr.msk.f32.vlgmr.msra.gmra.mrb[56].mxu0 %vm3648_vm10, %v3731_v17 }
 0xc9e   :  { %4979 = vmatpush1.bf16.msra.mxu1 %v5508_v26  ;;  %4989 = vmatpush1.bf16.msra.mxu0 %v5509_v29 }
 0xc9f   :  { %3851 = vmatprep.mubr.f32.mxu1 %v7301_v47  ;;  %3928 = vmatprep.mubr.f32.mxu0 %v7301_v47 }
 0xca0   :  { %4982 = vmatprep.subr.msk.bf16.mxu1 %vm6822_vm7, %v5510_v21  ;;  %4992 = vmatprep.subr.msk.bf16.mxu0 %vm6822_vm7, %v5512_v27 }
 0xca1   :  { %4269 = vmatmul.mubr.msk.f32.gmra.mrb[58].mxu1 %vm3648_vm10, %v3732_v43  ;;  %4273 = vmatmul.mubr.msk.f32.gmra.mrb[58].mxu0 %vm3648_vm10, %v3732_v43 }
 0xca2   :  { %4985 = vmatpush1.bf16.msk.msra.mxu1 %vm6822_vm7, %v5514_v59  ;;  %4995 = vmatpush1.bf16.msk.msra.mxu0 %vm6822_vm7, %v5515_v56 }
 0xca3   :  { %4005 = vmatprep.mubr.f32.mxu1 %v7301_v47  ;;  %4082 = vmatprep.mubr.f32.mxu0 %v7301_v47 }
 0xca5   :  { %4276 = vmatmul.mubr.msk.f32.vlgmr.msra.gmra.mrb[60].mxu1 %vm3648_vm10, %v3733_v18  ;;  %4280 = vmatmul.mubr.msk.f32.vlgmr.msra.gmra.mrb[60].mxu0 %vm3648_vm10, %v3733_v18 }
 0xca6   :  { %4011 = vmatprep.mubr.f32.mxu1 %v7301_v47  ;;  %4088 = vmatprep.mubr.f32.mxu0 %v7301_v47 }
 0xca9   :  { %4277 = vmatmul.mubr.msk.f32.gmra.mrb[62].mxu1 %vm3648_vm10, %v3734_v24  ;;  %4281 = vmatmul.mubr.msk.f32.gmra.mrb[62].mxu0 %vm3648_vm10, %v3734_v24 }
 0xd70   :  { %v3847_v62 = vpop.f32.mrb[56].mxu1  ;;  %v3924_v35 = vpop.f32.mrb[56].mxu0 }
 0xd71   :  { %v3849_v30 = vpop.f32.mrb[57].mxu1  ;;  %v3926_v36 = vpop.f32.mrb[57].mxu0 }
 0xd72   :  { %v4095_v37 = vmax.f32 %v3847_v62, %v3849_v30  ;;  %v4099_v49 = vmax.f32 %v3924_v35, %v3926_v36 }
 0xd74   :  { %v4103_v20 = vmax.f32 %v4095_v37, %v4099_v49  ;;  %v3853_v28 = vpop.f32.mrb[58].mxu1  ;;  %v3930_v38 = vpop.f32.mrb[58].mxu0 }
 0xd75   :  { %v3855_v42 = vpop.f32.mrb[59].mxu1  ;;  %v3932_v40 = vpop.f32.mrb[59].mxu0 }
 0xd76   :  { %4107 = vst.msk [vmem:[%s7214_s17] sm:$0xff] %vm427_vm1, %v4103_v20  ;;  %v4096_v47 = vmax.f32 %v3853_v28, %v3855_v42  ;;  %v4100_v4 = vmax.f32 %v3930_v38, %v3932_v40 }
 0xd78   :  { %v4104_v54 = vmax.f32 %v4096_v47, %v4100_v4  ;;  %v4007_v7 = vpop.f32.mrb[60].mxu1  ;;  %v4084_v46 = vpop.f32.mrb[60].mxu0 }
 0xd79   :  { %v4009_v45 = vpop.f32.mrb[61].mxu1  ;;  %v4086_v33 = vpop.f32.mrb[61].mxu0 }
 0xd7a   :  { %4108 = vst.msk [vmem:[%s7214_s17 + $0x8] sm:$0xff] %vm427_vm1, %v4104_v54  ;;  %v4097_v63 = vmax.f32 %v4007_v7, %v4009_v45  ;;  %v4101_v34 = vmax.f32 %v4084_v46, %v4086_v33 }
 0xd7c   :  { %v4105_v44 = vmax.f32 %v4097_v63, %v4101_v34  ;;  %v4013_v31 = vpop.f32.mrb[62].mxu1  ;;  %v4090_v32 = vpop.f32.mrb[62].mxu0 }
 0xd7d   :  { %v4015_v48 = vpop.f32.mrb[63].mxu1  ;;  %v4092_v13 = vpop.f32.mrb[63].mxu0 }
 0xd7e   :  { %4109 = vst.msk [vmem:[%s7214_s17 + $0x10] sm:$0xff] %vm427_vm1, %v4105_v44  ;;  %v4098_v16 = vmax.f32 %v4013_v31, %v4015_v48  ;;  %v4102_v61 = vmax.f32 %v4090_v32, %v4092_v13 }
 0xd80   :  { %v4106_v52 = vmax.f32 %v4098_v16, %v4102_v61 }
 0xd82   :  { %4110 = vst.msk [vmem:[%s7214_s17 + $0x18] sm:$0xff] %vm427_vm1, %v4106_v52 }
 0xd83   :  { %4115 = vsyncpa [#allocation8], 1 }
 0xd84   :  { %4116 = vsyncpa [#allocation10], 1 }
 0xd85   :  { %4117 = vsyncmov [#allocation6] }
 0xd88   :  { %s4118_s2 = vpop.sfrf %4117 }
 0xd89   :  { %p4282_p10 = scmp.ne.s32.totalorder %s4118_s2, 0 }
 0xd8b   :  { %4122 = shalt.err (%p4282_p10)  }
 0xd8c   :  { %4124 = vsyncmov [#allocation6 + $0x1] }
 0xd8f   :  { %s4125_s3 = vpop.sfrf %4124 }
 0xd90   :  { %p4283_p11 = scmp.ne.s32.totalorder %s4125_s3, 0 }
 0xd92   :  { %4129 = shalt.err (%p4283_p11)  }
 0xd93   :  { %4131 = vsyncmov [#allocation6 + $0x2] }
 0xd96   :  { %s4132_s0 = vpop.sfrf %4131 }
 0xd97   :  { %p4284_p12 = scmp.ne.s32.totalorder %s4132_s0, 0 }
 0xd99   :  { %4136 = shalt.err (%p4284_p12)  }
 0xd9a   :  { %4138 = vsyncmov [#allocation6 + $0x3] }
 0xd9d   :  { %s4139_s30 = vpop.sfrf %4138 }
 0xd9e   :  { %p4285_p13 = scmp.ne.s32.totalorder %s4139_s30, 0 }
 0xda0   :  { %4143 = shalt.err (%p4285_p13)  }

</bundles_post_ra>
